<compile_context>
chip_gen: v6e
topology: v6e:2x2x1
jax: 0.10.0
libtpu: 0.0.40
codegen_flags: <defaults>
</compile_context>

<pallas_src>
import jax
import jax.numpy as jnp
import numpy as np
from jax import lax
from jax.experimental import pallas as pl
from jax.experimental.pallas import tpu as pltpu

# ----------------------------------------------------------------------------
# Hyperparameters (small, but consistent with the module constructor arguments)
# ----------------------------------------------------------------------------
INPUT_COUNT = 2
OUTPUT_COUNT = 2
DIM_MODEL = 64
NUM_HEADS = 2
NUM_LAYERS = 2
DIM_HIDDEN = 64
HEAD_DIM = DIM_MODEL // NUM_HEADS
LN_EPS = 1e-5
OUT_PAD = 128            # lane-dense padded width of the output head

# ---- vector-slab row layout (every row is width DIM_MODEL) ------------------
_V_WEMB = 0                          # rows [0, INPUT_COUNT): embedding weight rows
_V_BEMB = INPUT_COUNT                # 1 row: embedding bias
_V_LAYER0 = INPUT_COUNT + 1
_V_PER_LAYER = 7                     # b_ao, b_ff1, b_ff2, ln1_w, ln1_b, ln2_w, ln2_b
_V_ROWS = _V_LAYER0 + _V_PER_LAYER * NUM_LAYERS


def _layer_norm(y, w, b):
    mu = jnp.mean(y, axis=-1, keepdims=True)
    var = jnp.mean(jnp.square(y - mu), axis=-1, keepdims=True)
    return (y - mu) * lax.rsqrt(var + LN_EPS) * w + b


# ----------------------------------------------------------------------------
# Pallas kernel: one invocation processes the whole flattened (B*S, feature)
# slab.  Full encoder stack fused (layers / heads statically unrolled).
# ----------------------------------------------------------------------------
def transformer_kernel(src_ref, mask_ref, vec_ref, wqkv_ref, mats_ref, wout_ref,
                       out_ref):
    D, HD = DIM_MODEL, HEAD_DIM
    mask = mask_ref[...]                       # (rows, rows) block-diag causal (-inf)
    src = src_ref[...]                         # (rows, INPUT_COUNT)

    # Embedding (K = INPUT_COUNT = 2): VPU broadcast-FMAs, no MXU push.
    x = src[:, 0:1] * vec_ref[_V_WEMB:_V_WEMB + 1, :]
    for i in range(1, INPUT_COUNT):
        x = x + src[:, i:i + 1] * vec_ref[_V_WEMB + i:_V_WEMB + i + 1, :]
    x = x + vec_ref[_V_BEMB:_V_BEMB + 1, :]

    for l in range(NUM_LAYERS):                # static unroll over layers
        vb = _V_LAYER0 + _V_PER_LAYER * l

        # ---- fused QKV projection: one lane-dense (rows,64)@(64,192) matmul ----
        # (1/sqrt(HEAD_DIM) already folded into the Q columns wrapper-side.)
        qkv = (jnp.dot(x, wqkv_ref[l, 0:D, :], preferred_element_type=jnp.float32)
               + wqkv_ref[l, D:D + 1, :])      # bias row stored below the weights

        w_ao = mats_ref[3 * l]                 # (D, D)
        attn = None
        for h in range(NUM_HEADS):             # static unroll over heads
            q = qkv[:, h * HD:(h + 1) * HD]
            k = qkv[:, D + h * HD:D + (h + 1) * HD]
            v = qkv[:, 2 * D + h * HD:2 * D + (h + 1) * HD]

            # Scores over the whole flattened slab; the block-diagonal -inf mask
            # makes the row softmax exactly per-sequence.  Contraction on the
            # last dims avoids an explicit transpose of K.
            s = lax.dot_general(q, k, (((1,), (1,)), ((), ())),
                                preferred_element_type=jnp.float32) + mask
            s = s - jnp.max(s, axis=-1, keepdims=True)
            p = jnp.exp(s)
            denom = jnp.sum(p, axis=-1, keepdims=True)
            inv = pl.reciprocal(denom, approx=True)       # EUP slot (nearly free)
            inv = inv * (2.0 - denom * inv)               # one Newton step -> exact
            p = p * inv

            o = jnp.dot(p, v, preferred_element_type=jnp.float32)   # (rows, HD)
            # accumulate the output projection per head (no lane concatenate)
            term = jnp.dot(o, w_ao[h * HD:(h + 1) * HD, :],
                           preferred_element_type=jnp.float32)
            attn = term if attn is None else attn + term
        attn = attn + vec_ref[vb + 0:vb + 1, :]            # b_ao

        # TODO(synk): dropout (p=0.1) omitted -> eval/inference semantics.
        x = _layer_norm(x + attn,
                        vec_ref[vb + 3:vb + 4, :], vec_ref[vb + 4:vb + 5, :])

        # ---- feed-forward (ReLU) ----
        hdn = (jnp.dot(x, mats_ref[3 * l + 1], preferred_element_type=jnp.float32)
               + vec_ref[vb + 1:vb + 2, :])                # b_ff1
        hdn = jnp.maximum(hdn, 0.0)
        ff = (jnp.dot(hdn, mats_ref[3 * l + 2], preferred_element_type=jnp.float32)
              + vec_ref[vb + 2:vb + 3, :])                 # b_ff2
        x = _layer_norm(x + ff,
                        vec_ref[vb + 5:vb + 6, :], vec_ref[vb + 6:vb + 7, :])

    # output head: lane-dense (rows, 128) store; wrapper slices [:, :OUTPUT_COUNT]
    out_ref[...] = (jnp.dot(x, wout_ref[0:D, :], preferred_element_type=jnp.float32)
                    + wout_ref[D:D + 1, :])


# ----------------------------------------------------------------------------
# Wrapper-side one-time parameter re-layout + mask (hoisted out of the jit)
# ----------------------------------------------------------------------------
def _block_causal_mask(batches, seq):
    """Block-diagonal causal additive mask over `batches` flattened sequences."""
    n = batches * seq
    idx = jnp.arange(n)
    same_batch = (idx[:, None] // seq) == (idx[None, :] // seq)
    causal = (idx[None, :] % seq) <= (idx[:, None] % seq)
    return jnp.where(same_batch & causal, 0.0, -jnp.inf).astype(jnp.float32)


def prepare_inputs(params, batches, seq):
    L, D = NUM_LAYERS, DIM_MODEL
    assert DIM_HIDDEN == DIM_MODEL, "matrix-slab packing assumes dim_hidden == dim_model"

    scale = 1.0 / np.sqrt(HEAD_DIM)
    # fold softmax scale into the Q columns (weights and bias)
    qscale = jnp.concatenate([jnp.full((D,), scale, jnp.float32),
                              jnp.ones((2 * D,), jnp.float32)])
    w_qkv = params["w_qkv"] * qscale                        # (L, D, 3D)
    b_qkv = params["b_qkv"] * qscale                        # (L, 1, 3D)
    wqkv_slab = jnp.concatenate([w_qkv, b_qkv], axis=1)     # (L, D+1, 3D)

    mats_slab = jnp.stack(
        [m for l in range(L)
         for m in (params["w_ao"][l], params["w_ff1"][l], params["w_ff2"][l])],
        axis=0)                                             # (3L, D, D)

    vec_rows = [params["w_emb"][i:i + 1, :] for i in range(INPUT_COUNT)]
    vec_rows.append(params["b_emb"])
    for l in range(L):
        vec_rows += [params["b_ao"][l], params["b_ff1"][l], params["b_ff2"][l],
                     params["ln1_w"][l], params["ln1_b"][l],
                     params["ln2_w"][l], params["ln2_b"][l]]
    vec_slab = jnp.concatenate(vec_rows, axis=0)            # (_V_ROWS, D)

    wout_slab = jnp.zeros((D + 1, OUT_PAD), jnp.float32)
    wout_slab = wout_slab.at[0:D, 0:OUTPUT_COUNT].set(params["w_out"])
    wout_slab = wout_slab.at[D:D + 1, 0:OUTPUT_COUNT].set(params["b_out"])

    mask = _block_causal_mask(batches, seq)                 # (B*S, B*S)
    return dict(vec=vec_slab, wqkv=wqkv_slab, mats=mats_slab,
                wout=wout_slab, mask=mask)


@jax.jit
def transformer_forward(src, prep):
    B, S, C = src.shape
    rows = B * S
    src_flat = src.reshape(rows, C)

    mask, vec = prep["mask"], prep["vec"]
    wqkv, mats, wout = prep["wqkv"], prep["mats"], prep["wout"]

    def full_spec(a):
        nd = a.ndim
        return pl.BlockSpec(a.shape, (lambda nd_: (lambda i: (0,) * nd_))(nd))

    out_flat = pl.pallas_call(
        transformer_kernel,
        out_shape=jax.ShapeDtypeStruct((rows, OUT_PAD), jnp.float32),
        grid_spec=pltpu.PrefetchScalarGridSpec(
            num_scalar_prefetch=0,
            grid=(1,),                      # single step: launch-latency bound workload
            in_specs=[full_spec(src_flat), full_spec(mask), full_spec(vec),
                      full_spec(wqkv), full_spec(mats), full_spec(wout)],
            out_specs=pl.BlockSpec((rows, OUT_PAD), lambda i: (0, 0)),
        ),
        compiler_params=pltpu.CompilerParams(dimension_semantics=("arbitrary",)),
    )(src_flat, mask, vec, wqkv, mats, wout)

    return out_flat[:, :OUTPUT_COUNT].reshape(B, S, OUTPUT_COUNT)


# ----------------------------------------------------------------------------
# Deterministic parameter init (synthetic weights; shapes follow the module)
# ----------------------------------------------------------------------------
def init_params(key):
    ks = jax.random.split(key, 12)

    def w(k, shape, scale=0.05):
        return jax.random.normal(k, shape, jnp.float32) * scale

    L, D, Hd = NUM_LAYERS, DIM_MODEL, DIM_HIDDEN
    return dict(
        w_emb=w(ks[0], (INPUT_COUNT, D)),
        b_emb=w(ks[1], (1, D)),
        w_qkv=w(ks[2], (L, D, 3 * D)),
        b_qkv=w(ks[3], (L, 1, 3 * D)),
        w_ao=w(ks[4], (L, D, D)),
        b_ao=w(ks[5], (L, 1, D)),
        w_ff1=w(ks[6], (L, D, Hd)),
        b_ff1=w(ks[7], (L, 1, Hd)),
        w_ff2=w(ks[8], (L, Hd, D)),
        b_ff2=w(ks[9], (L, 1, D)),
        ln1_w=jnp.ones((L, 1, D), jnp.float32),
        ln1_b=jnp.zeros((L, 1, D), jnp.float32),
        ln2_w=jnp.ones((L, 1, D), jnp.float32),
        ln2_b=jnp.zeros((L, 1, D), jnp.float32),
        w_out=w(ks[10], (D, OUTPUT_COUNT)),
        b_out=w(ks[11], (1, OUTPUT_COUNT)),
    )


# ----------------------------------------------------------------------------
# Pure-JAX reference (mirrors PyTorch post-norm encoder layer, eval mode)
# ----------------------------------------------------------------------------
def _causal_mask(n):
    row = jnp.arange(n)[:, None]
    col = jnp.arange(n)[None, :]
    return jnp.where(col <= row, 0.0, -jnp.inf).astype(jnp.float32)


def reference_forward(src, params):
    B, S, _ = src.shape
    mask = _causal_mask(S)
    x = src @ params["w_emb"] + params["b_emb"]
    for l in range(NUM_LAYERS):
        qkv = x @ params["w_qkv"][l] + params["b_qkv"][l]
        q, k, v = jnp.split(qkv, 3, axis=-1)

        def split_heads(t):
            return t.reshape(B, S, NUM_HEADS, HEAD_DIM).transpose(0, 2, 1, 3)

        qh, kh, vh = map(split_heads, (q, k, v))
        s = jnp.einsum("bhqd,bhkd->bhqk", qh, kh) / np.sqrt(HEAD_DIM) + mask
        p = jax.nn.softmax(s, axis=-1)
        o = jnp.einsum("bhqk,bhkd->bhqd", p, vh).transpose(0, 2, 1, 3).reshape(B, S, DIM_MODEL)
        attn = o @ params["w_ao"][l] + params["b_ao"][l]
        x = _layer_norm(x + attn, params["ln1_w"][l], params["ln1_b"][l])
        hdn = jnp.maximum(x @ params["w_ff1"][l] + params["b_ff1"][l], 0.0)
        ff = hdn @ params["w_ff2"][l] + params["b_ff2"][l]
        x = _layer_norm(x + ff, params["ln2_w"][l], params["ln2_b"][l])
    return x @ params["w_out"] + params["b_out"]


if __name__ == "__main__":
    key = jax.random.PRNGKey(0)
    pkey, xkey = jax.random.split(key)
    params = init_params(pkey)

    B = S = 8  # batch == seq (required by the original mask-construction quirk)
    src = jax.random.normal(xkey, (B, S, INPUT_COUNT), jnp.float32)

    # One-time wrapper-side re-layout + mask construction (hoisted out of jit).
    prep = prepare_inputs(params, B, S)

    out = transformer_forward(src, prep)
    out = jax.block_until_ready(out)

    ref = reference_forward(src, params)
    assert out.shape == (B, S, OUTPUT_COUNT)
    np.testing.assert_allclose(np.asarray(out), np.asarray(ref), atol=1e-4, rtol=1e-4)
    print("KERNEL_OK")
</pallas_src>

<mosaic_0001>
module attributes {stable_mosaic.version = 11 : i64} {
  func.func @transformer_kernel(%arg0: i32, %arg1: memref<64x2xf32, #tpu.memory_space<vmem>>, %arg2: memref<64x64xf32, #tpu.memory_space<vmem>>, %arg3: memref<17x64xf32, #tpu.memory_space<vmem>>, %arg4: memref<2x65x192xf32, #tpu.memory_space<vmem>>, %arg5: memref<6x64x64xf32, #tpu.memory_space<vmem>>, %arg6: memref<65x128xf32, #tpu.memory_space<vmem>>, %arg7: memref<64x128xf32, #tpu.memory_space<vmem>>) attributes {dimension_semantics = [#tpu.dimension_semantics<arbitrary>], iteration_bounds = array<i64: 1>, scalar_prefetch = 0 : i64, scratch_operands = 0 : i64, tpu.core_type = #tpu.core_type<tc>, window_params = [{pipeline_mode = #tpu.pipeline_mode<synchronous>, transform_indices = @transform_0, window_bounds = array<i64: 64, 2>}, {pipeline_mode = #tpu.pipeline_mode<synchronous>, transform_indices = @transform_1, window_bounds = array<i64: 64, 64>}, {pipeline_mode = #tpu.pipeline_mode<synchronous>, transform_indices = @transform_2, window_bounds = array<i64: 17, 64>}, {pipeline_mode = #tpu.pipeline_mode<synchronous>, transform_indices = @transform_3, window_bounds = array<i64: 2, 65, 192>}, {pipeline_mode = #tpu.pipeline_mode<synchronous>, transform_indices = @transform_4, window_bounds = array<i64: 6, 64, 64>}, {pipeline_mode = #tpu.pipeline_mode<synchronous>, transform_indices = @transform_5, window_bounds = array<i64: 65, 128>}, {pipeline_mode = #tpu.pipeline_mode<synchronous>, transform_indices = @transform_6, window_bounds = array<i64: 64, 128>}]} {
    %c0 = arith.constant 0 : index
    %c0_0 = arith.constant 0 : index
    %0 = vector.load %arg2[%c0, %c0_0] : memref<64x64xf32, #tpu.memory_space<vmem>>, vector<64x64xf32>
    %c0_1 = arith.constant 0 : index
    %c0_2 = arith.constant 0 : index
    %1 = vector.load %arg1[%c0_1, %c0_2] : memref<64x2xf32, #tpu.memory_space<vmem>>, vector<64x2xf32>
    %2 = vector.extract_strided_slice %1 {offsets = [0, 0], sizes = [64, 1], strides = [1, 1]} : vector<64x2xf32> to vector<64x1xf32>
    %c0_3 = arith.constant 0 : index
    %c0_4 = arith.constant 0 : index
    %3 = vector.load %arg3[%c0_3, %c0_4] : memref<17x64xf32, #tpu.memory_space<vmem>>, vector<1x64xf32>
    %4 = vector.broadcast %2 : vector<64x1xf32> to vector<64x64xf32>
    %5 = vector.broadcast %3 : vector<1x64xf32> to vector<64x64xf32>
    %6 = arith.mulf %4, %5 : vector<64x64xf32>
    %7 = vector.extract_strided_slice %1 {offsets = [0, 1], sizes = [64, 1], strides = [1, 1]} : vector<64x2xf32> to vector<64x1xf32>
    %c1 = arith.constant 1 : index
    %c0_5 = arith.constant 0 : index
    %8 = vector.load %arg3[%c1, %c0_5] : memref<17x64xf32, #tpu.memory_space<vmem>>, vector<1x64xf32>
    %9 = vector.broadcast %7 : vector<64x1xf32> to vector<64x64xf32>
    %10 = vector.broadcast %8 : vector<1x64xf32> to vector<64x64xf32>
    %11 = arith.mulf %9, %10 : vector<64x64xf32>
    %12 = arith.addf %6, %11 : vector<64x64xf32>
    %c2 = arith.constant 2 : index
    %c0_6 = arith.constant 0 : index
    %13 = vector.load %arg3[%c2, %c0_6] : memref<17x64xf32, #tpu.memory_space<vmem>>, vector<1x64xf32>
    %14 = vector.broadcast %13 : vector<1x64xf32> to vector<64x64xf32>
    %15 = arith.addf %12, %14 : vector<64x64xf32>
    %c0_7 = arith.constant 0 : index
    %c0_8 = arith.constant 0 : index
    %c0_9 = arith.constant 0 : index
    %16 = vector.load %arg4[%c0_7, %c0_8, %c0_9] : memref<2x65x192xf32, #tpu.memory_space<vmem>>, vector<1x64x192xf32>
    %17 = vector.shape_cast %16 : vector<1x64x192xf32> to vector<64x192xf32>
    %cst = arith.constant dense<0.000000e+00> : vector<64x192xf32>
    %18 = tpu.matmul %15, %17, %cst {dimension_numbers = #tpu.dot_dimension_numbers<[1], [0], [0], [1], [0, 0, 1, 1], [], []>} : vector<64x64xf32>, vector<64x192xf32>, vector<64x192xf32> -> vector<64x192xf32>
    %c0_10 = arith.constant 0 : index
    %c64 = arith.constant 64 : index
    %c0_11 = arith.constant 0 : index
    %19 = vector.load %arg4[%c0_10, %c64, %c0_11] : memref<2x65x192xf32, #tpu.memory_space<vmem>>, vector<1x1x192xf32>
    %20 = vector.shape_cast %19 : vector<1x1x192xf32> to vector<1x192xf32>
    %21 = vector.broadcast %20 : vector<1x192xf32> to vector<64x192xf32>
    %22 = arith.addf %18, %21 : vector<64x192xf32>
    %c0_12 = arith.constant 0 : index
    %c0_13 = arith.constant 0 : index
    %c0_14 = arith.constant 0 : index
    %23 = vector.load %arg5[%c0_12, %c0_13, %c0_14] : memref<6x64x64xf32, #tpu.memory_space<vmem>>, vector<1x64x64xf32>
    %24 = vector.shape_cast %23 : vector<1x64x64xf32> to vector<64x64xf32>
    %25 = vector.extract_strided_slice %22 {offsets = [0, 0], sizes = [64, 32], strides = [1, 1]} : vector<64x192xf32> to vector<64x32xf32>
    %26 = vector.extract_strided_slice %22 {offsets = [0, 64], sizes = [64, 32], strides = [1, 1]} : vector<64x192xf32> to vector<64x32xf32>
    %27 = vector.extract_strided_slice %22 {offsets = [0, 128], sizes = [64, 32], strides = [1, 1]} : vector<64x192xf32> to vector<64x32xf32>
    %cst_15 = arith.constant dense<0.000000e+00> : vector<64x64xf32>
    %28 = tpu.matmul %25, %26, %cst_15 {dimension_numbers = #tpu.dot_dimension_numbers<[1], [1], [0], [0], [0, 0, 1, 0], [], []>} : vector<64x32xf32>, vector<64x32xf32>, vector<64x64xf32> -> vector<64x64xf32>
    %29 = arith.addf %28, %0 : vector<64x64xf32>
    %cst_16 = arith.constant dense<0xFF800000> : vector<64xf32>
    %30 = vector.multi_reduction <maximumf>, %29, %cst_16 [1] : vector<64x64xf32> to vector<64xf32>
    %31 = vector.shape_cast %30 : vector<64xf32> to vector<64x1xf32>
    %32 = vector.broadcast %31 : vector<64x1xf32> to vector<64x64xf32>
    %33 = arith.subf %29, %32 : vector<64x64xf32>
    %34 = math.exp %33 : vector<64x64xf32>
    %cst_17 = arith.constant dense<0.000000e+00> : vector<64xf32>
    %35 = vector.multi_reduction <add>, %34, %cst_17 [1] : vector<64x64xf32> to vector<64xf32>
    %36 = vector.shape_cast %35 : vector<64xf32> to vector<64x1xf32>
    %37 = tpu.reciprocal %36 {approx = true} : vector<64x1xf32> -> vector<64x1xf32>
    %38 = arith.mulf %36, %37 : vector<64x1xf32>
    %cst_18 = arith.constant 2.000000e+00 : f32
    %39 = vector.broadcast %cst_18 : f32 to vector<64x1xf32>
    %40 = arith.subf %39, %38 : vector<64x1xf32>
    %41 = arith.mulf %37, %40 : vector<64x1xf32>
    %42 = vector.broadcast %41 : vector<64x1xf32> to vector<64x64xf32>
    %43 = arith.mulf %34, %42 : vector<64x64xf32>
    %cst_19 = arith.constant dense<0.000000e+00> : vector<64x32xf32>
    %44 = tpu.matmul %43, %27, %cst_19 {dimension_numbers = #tpu.dot_dimension_numbers<[1], [0], [0], [1], [0, 0, 1, 1], [], []>} : vector<64x64xf32>, vector<64x32xf32>, vector<64x32xf32> -> vector<64x32xf32>
    %45 = vector.extract_strided_slice %24 {offsets = [0, 0], sizes = [32, 64], strides = [1, 1]} : vector<64x64xf32> to vector<32x64xf32>
    %cst_20 = arith.constant dense<0.000000e+00> : vector<64x64xf32>
    %46 = tpu.matmul %44, %45, %cst_20 {dimension_numbers = #tpu.dot_dimension_numbers<[1], [0], [0], [1], [0, 0, 1, 1], [], []>} : vector<64x32xf32>, vector<32x64xf32>, vector<64x64xf32> -> vector<64x64xf32>
    %47 = vector.extract_strided_slice %22 {offsets = [0, 32], sizes = [64, 32], strides = [1, 1]} : vector<64x192xf32> to vector<64x32xf32>
    %48 = vector.extract_strided_slice %22 {offsets = [0, 96], sizes = [64, 32], strides = [1, 1]} : vector<64x192xf32> to vector<64x32xf32>
    %49 = vector.extract_strided_slice %22 {offsets = [0, 160], sizes = [64, 32], strides = [1, 1]} : vector<64x192xf32> to vector<64x32xf32>
    %cst_21 = arith.constant dense<0.000000e+00> : vector<64x64xf32>
    %50 = tpu.matmul %47, %48, %cst_21 {dimension_numbers = #tpu.dot_dimension_numbers<[1], [1], [0], [0], [0, 0, 1, 0], [], []>} : vector<64x32xf32>, vector<64x32xf32>, vector<64x64xf32> -> vector<64x64xf32>
    %51 = arith.addf %50, %0 : vector<64x64xf32>
    %cst_22 = arith.constant dense<0xFF800000> : vector<64xf32>
    %52 = vector.multi_reduction <maximumf>, %51, %cst_22 [1] : vector<64x64xf32> to vector<64xf32>
    %53 = vector.shape_cast %52 : vector<64xf32> to vector<64x1xf32>
    %54 = vector.broadcast %53 : vector<64x1xf32> to vector<64x64xf32>
    %55 = arith.subf %51, %54 : vector<64x64xf32>
    %56 = math.exp %55 : vector<64x64xf32>
    %cst_23 = arith.constant dense<0.000000e+00> : vector<64xf32>
    %57 = vector.multi_reduction <add>, %56, %cst_23 [1] : vector<64x64xf32> to vector<64xf32>
    %58 = vector.shape_cast %57 : vector<64xf32> to vector<64x1xf32>
    %59 = tpu.reciprocal %58 {approx = true} : vector<64x1xf32> -> vector<64x1xf32>
    %60 = arith.mulf %58, %59 : vector<64x1xf32>
    %cst_24 = arith.constant 2.000000e+00 : f32
    %61 = vector.broadcast %cst_24 : f32 to vector<64x1xf32>
    %62 = arith.subf %61, %60 : vector<64x1xf32>
    %63 = arith.mulf %59, %62 : vector<64x1xf32>
    %64 = vector.broadcast %63 : vector<64x1xf32> to vector<64x64xf32>
    %65 = arith.mulf %56, %64 : vector<64x64xf32>
    %cst_25 = arith.constant dense<0.000000e+00> : vector<64x32xf32>
    %66 = tpu.matmul %65, %49, %cst_25 {dimension_numbers = #tpu.dot_dimension_numbers<[1], [0], [0], [1], [0, 0, 1, 1], [], []>} : vector<64x64xf32>, vector<64x32xf32>, vector<64x32xf32> -> vector<64x32xf32>
    %67 = vector.extract_strided_slice %24 {offsets = [32, 0], sizes = [32, 64], strides = [1, 1]} : vector<64x64xf32> to vector<32x64xf32>
    %cst_26 = arith.constant dense<0.000000e+00> : vector<64x64xf32>
    %68 = tpu.matmul %66, %67, %cst_26 {dimension_numbers = #tpu.dot_dimension_numbers<[1], [0], [0], [1], [0, 0, 1, 1], [], []>} : vector<64x32xf32>, vector<32x64xf32>, vector<64x64xf32> -> vector<64x64xf32>
    %69 = arith.addf %46, %68 : vector<64x64xf32>
    %c3 = arith.constant 3 : index
    %c0_27 = arith.constant 0 : index
    %70 = vector.load %arg3[%c3, %c0_27] : memref<17x64xf32, #tpu.memory_space<vmem>>, vector<1x64xf32>
    %71 = vector.broadcast %70 : vector<1x64xf32> to vector<64x64xf32>
    %72 = arith.addf %69, %71 : vector<64x64xf32>
    %73 = arith.addf %15, %72 : vector<64x64xf32>
    %c6 = arith.constant 6 : index
    %c0_28 = arith.constant 0 : index
    %74 = vector.load %arg3[%c6, %c0_28] : memref<17x64xf32, #tpu.memory_space<vmem>>, vector<1x64xf32>
    %c7 = arith.constant 7 : index
    %c0_29 = arith.constant 0 : index
    %75 = vector.load %arg3[%c7, %c0_29] : memref<17x64xf32, #tpu.memory_space<vmem>>, vector<1x64xf32>
    %cst_30 = arith.constant dense<0.000000e+00> : vector<64xf32>
    %76 = vector.multi_reduction <add>, %73, %cst_30 [1] : vector<64x64xf32> to vector<64xf32>
    %77 = vector.shape_cast %76 : vector<64xf32> to vector<64x1xf32>
    %cst_31 = arith.constant 6.400000e+01 : f32
    %78 = vector.broadcast %cst_31 : f32 to vector<64x1xf32>
    %79 = arith.divf %77, %78 : vector<64x1xf32>
    %80 = vector.broadcast %79 : vector<64x1xf32> to vector<64x64xf32>
    %81 = arith.subf %73, %80 : vector<64x64xf32>
    %82 = arith.mulf %81, %81 : vector<64x64xf32>
    %cst_32 = arith.constant dense<0.000000e+00> : vector<64xf32>
    %83 = vector.multi_reduction <add>, %82, %cst_32 [1] : vector<64x64xf32> to vector<64xf32>
    %84 = vector.shape_cast %83 : vector<64xf32> to vector<64x1xf32>
    %cst_33 = arith.constant 6.400000e+01 : f32
    %85 = vector.broadcast %cst_33 : f32 to vector<64x1xf32>
    %86 = arith.divf %84, %85 : vector<64x1xf32>
    %87 = vector.broadcast %79 : vector<64x1xf32> to vector<64x64xf32>
    %88 = arith.subf %73, %87 : vector<64x64xf32>
    %cst_34 = arith.constant 9.99999974E-6 : f32
    %89 = vector.broadcast %cst_34 : f32 to vector<64x1xf32>
    %90 = arith.addf %86, %89 : vector<64x1xf32>
    %91 = math.rsqrt %90 : vector<64x1xf32>
    %92 = vector.broadcast %91 : vector<64x1xf32> to vector<64x64xf32>
    %93 = arith.mulf %88, %92 : vector<64x64xf32>
    %94 = vector.broadcast %74 : vector<1x64xf32> to vector<64x64xf32>
    %95 = arith.mulf %93, %94 : vector<64x64xf32>
    %96 = vector.broadcast %75 : vector<1x64xf32> to vector<64x64xf32>
    %97 = arith.addf %95, %96 : vector<64x64xf32>
    %c1_35 = arith.constant 1 : index
    %c0_36 = arith.constant 0 : index
    %c0_37 = arith.constant 0 : index
    %98 = vector.load %arg5[%c1_35, %c0_36, %c0_37] : memref<6x64x64xf32, #tpu.memory_space<vmem>>, vector<1x64x64xf32>
    %99 = vector.shape_cast %98 : vector<1x64x64xf32> to vector<64x64xf32>
    %cst_38 = arith.constant dense<0.000000e+00> : vector<64x64xf32>
    %100 = tpu.matmul %97, %99, %cst_38 {dimension_numbers = #tpu.dot_dimension_numbers<[1], [0], [0], [1], [0, 0, 1, 1], [], []>} : vector<64x64xf32>, vector<64x64xf32>, vector<64x64xf32> -> vector<64x64xf32>
    %c4 = arith.constant 4 : index
    %c0_39 = arith.constant 0 : index
    %101 = vector.load %arg3[%c4, %c0_39] : memref<17x64xf32, #tpu.memory_space<vmem>>, vector<1x64xf32>
    %102 = vector.broadcast %101 : vector<1x64xf32> to vector<64x64xf32>
    %103 = arith.addf %100, %102 : vector<64x64xf32>
    %cst_40 = arith.constant 0.000000e+00 : f32
    %104 = vector.broadcast %cst_40 : f32 to vector<64x64xf32>
    %105 = arith.maximumf %103, %104 : vector<64x64xf32>
    %c2_41 = arith.constant 2 : index
    %c0_42 = arith.constant 0 : index
    %c0_43 = arith.constant 0 : index
    %106 = vector.load %arg5[%c2_41, %c0_42, %c0_43] : memref<6x64x64xf32, #tpu.memory_space<vmem>>, vector<1x64x64xf32>
    %107 = vector.shape_cast %106 : vector<1x64x64xf32> to vector<64x64xf32>
    %cst_44 = arith.constant dense<0.000000e+00> : vector<64x64xf32>
    %108 = tpu.matmul %105, %107, %cst_44 {dimension_numbers = #tpu.dot_dimension_numbers<[1], [0], [0], [1], [0, 0, 1, 1], [], []>} : vector<64x64xf32>, vector<64x64xf32>, vector<64x64xf32> -> vector<64x64xf32>
    %c5 = arith.constant 5 : index
    %c0_45 = arith.constant 0 : index
    %109 = vector.load %arg3[%c5, %c0_45] : memref<17x64xf32, #tpu.memory_space<vmem>>, vector<1x64xf32>
    %110 = vector.broadcast %109 : vector<1x64xf32> to vector<64x64xf32>
    %111 = arith.addf %108, %110 : vector<64x64xf32>
    %112 = arith.addf %97, %111 : vector<64x64xf32>
    %c8 = arith.constant 8 : index
    %c0_46 = arith.constant 0 : index
    %113 = vector.load %arg3[%c8, %c0_46] : memref<17x64xf32, #tpu.memory_space<vmem>>, vector<1x64xf32>
    %c9 = arith.constant 9 : index
    %c0_47 = arith.constant 0 : index
    %114 = vector.load %arg3[%c9, %c0_47] : memref<17x64xf32, #tpu.memory_space<vmem>>, vector<1x64xf32>
    %cst_48 = arith.constant dense<0.000000e+00> : vector<64xf32>
    %115 = vector.multi_reduction <add>, %112, %cst_48 [1] : vector<64x64xf32> to vector<64xf32>
    %116 = vector.shape_cast %115 : vector<64xf32> to vector<64x1xf32>
    %cst_49 = arith.constant 6.400000e+01 : f32
    %117 = vector.broadcast %cst_49 : f32 to vector<64x1xf32>
    %118 = arith.divf %116, %117 : vector<64x1xf32>
    %119 = vector.broadcast %118 : vector<64x1xf32> to vector<64x64xf32>
    %120 = arith.subf %112, %119 : vector<64x64xf32>
    %121 = arith.mulf %120, %120 : vector<64x64xf32>
    %cst_50 = arith.constant dense<0.000000e+00> : vector<64xf32>
    %122 = vector.multi_reduction <add>, %121, %cst_50 [1] : vector<64x64xf32> to vector<64xf32>
    %123 = vector.shape_cast %122 : vector<64xf32> to vector<64x1xf32>
    %cst_51 = arith.constant 6.400000e+01 : f32
    %124 = vector.broadcast %cst_51 : f32 to vector<64x1xf32>
    %125 = arith.divf %123, %124 : vector<64x1xf32>
    %126 = vector.broadcast %118 : vector<64x1xf32> to vector<64x64xf32>
    %127 = arith.subf %112, %126 : vector<64x64xf32>
    %cst_52 = arith.constant 9.99999974E-6 : f32
    %128 = vector.broadcast %cst_52 : f32 to vector<64x1xf32>
    %129 = arith.addf %125, %128 : vector<64x1xf32>
    %130 = math.rsqrt %129 : vector<64x1xf32>
    %131 = vector.broadcast %130 : vector<64x1xf32> to vector<64x64xf32>
    %132 = arith.mulf %127, %131 : vector<64x64xf32>
    %133 = vector.broadcast %113 : vector<1x64xf32> to vector<64x64xf32>
    %134 = arith.mulf %132, %133 : vector<64x64xf32>
    %135 = vector.broadcast %114 : vector<1x64xf32> to vector<64x64xf32>
    %136 = arith.addf %134, %135 : vector<64x64xf32>
    %c1_53 = arith.constant 1 : index
    %c0_54 = arith.constant 0 : index
    %c0_55 = arith.constant 0 : index
    %137 = vector.load %arg4[%c1_53, %c0_54, %c0_55] : memref<2x65x192xf32, #tpu.memory_space<vmem>>, vector<1x64x192xf32>
    %138 = vector.shape_cast %137 : vector<1x64x192xf32> to vector<64x192xf32>
    %cst_56 = arith.constant dense<0.000000e+00> : vector<64x192xf32>
    %139 = tpu.matmul %136, %138, %cst_56 {dimension_numbers = #tpu.dot_dimension_numbers<[1], [0], [0], [1], [0, 0, 1, 1], [], []>} : vector<64x64xf32>, vector<64x192xf32>, vector<64x192xf32> -> vector<64x192xf32>
    %c1_57 = arith.constant 1 : index
    %c64_58 = arith.constant 64 : index
    %c0_59 = arith.constant 0 : index
    %140 = vector.load %arg4[%c1_57, %c64_58, %c0_59] : memref<2x65x192xf32, #tpu.memory_space<vmem>>, vector<1x1x192xf32>
    %141 = vector.shape_cast %140 : vector<1x1x192xf32> to vector<1x192xf32>
    %142 = vector.broadcast %141 : vector<1x192xf32> to vector<64x192xf32>
    %143 = arith.addf %139, %142 : vector<64x192xf32>
    %c3_60 = arith.constant 3 : index
    %c0_61 = arith.constant 0 : index
    %c0_62 = arith.constant 0 : index
    %144 = vector.load %arg5[%c3_60, %c0_61, %c0_62] : memref<6x64x64xf32, #tpu.memory_space<vmem>>, vector<1x64x64xf32>
    %145 = vector.shape_cast %144 : vector<1x64x64xf32> to vector<64x64xf32>
    %146 = vector.extract_strided_slice %143 {offsets = [0, 0], sizes = [64, 32], strides = [1, 1]} : vector<64x192xf32> to vector<64x32xf32>
    %147 = vector.extract_strided_slice %143 {offsets = [0, 64], sizes = [64, 32], strides = [1, 1]} : vector<64x192xf32> to vector<64x32xf32>
    %148 = vector.extract_strided_slice %143 {offsets = [0, 128], sizes = [64, 32], strides = [1, 1]} : vector<64x192xf32> to vector<64x32xf32>
    %cst_63 = arith.constant dense<0.000000e+00> : vector<64x64xf32>
    %149 = tpu.matmul %146, %147, %cst_63 {dimension_numbers = #tpu.dot_dimension_numbers<[1], [1], [0], [0], [0, 0, 1, 0], [], []>} : vector<64x32xf32>, vector<64x32xf32>, vector<64x64xf32> -> vector<64x64xf32>
    %150 = arith.addf %149, %0 : vector<64x64xf32>
    %cst_64 = arith.constant dense<0xFF800000> : vector<64xf32>
    %151 = vector.multi_reduction <maximumf>, %150, %cst_64 [1] : vector<64x64xf32> to vector<64xf32>
    %152 = vector.shape_cast %151 : vector<64xf32> to vector<64x1xf32>
    %153 = vector.broadcast %152 : vector<64x1xf32> to vector<64x64xf32>
    %154 = arith.subf %150, %153 : vector<64x64xf32>
    %155 = math.exp %154 : vector<64x64xf32>
    %cst_65 = arith.constant dense<0.000000e+00> : vector<64xf32>
    %156 = vector.multi_reduction <add>, %155, %cst_65 [1] : vector<64x64xf32> to vector<64xf32>
    %157 = vector.shape_cast %156 : vector<64xf32> to vector<64x1xf32>
    %158 = tpu.reciprocal %157 {approx = true} : vector<64x1xf32> -> vector<64x1xf32>
    %159 = arith.mulf %157, %158 : vector<64x1xf32>
    %cst_66 = arith.constant 2.000000e+00 : f32
    %160 = vector.broadcast %cst_66 : f32 to vector<64x1xf32>
    %161 = arith.subf %160, %159 : vector<64x1xf32>
    %162 = arith.mulf %158, %161 : vector<64x1xf32>
    %163 = vector.broadcast %162 : vector<64x1xf32> to vector<64x64xf32>
    %164 = arith.mulf %155, %163 : vector<64x64xf32>
    %cst_67 = arith.constant dense<0.000000e+00> : vector<64x32xf32>
    %165 = tpu.matmul %164, %148, %cst_67 {dimension_numbers = #tpu.dot_dimension_numbers<[1], [0], [0], [1], [0, 0, 1, 1], [], []>} : vector<64x64xf32>, vector<64x32xf32>, vector<64x32xf32> -> vector<64x32xf32>
    %166 = vector.extract_strided_slice %145 {offsets = [0, 0], sizes = [32, 64], strides = [1, 1]} : vector<64x64xf32> to vector<32x64xf32>
    %cst_68 = arith.constant dense<0.000000e+00> : vector<64x64xf32>
    %167 = tpu.matmul %165, %166, %cst_68 {dimension_numbers = #tpu.dot_dimension_numbers<[1], [0], [0], [1], [0, 0, 1, 1], [], []>} : vector<64x32xf32>, vector<32x64xf32>, vector<64x64xf32> -> vector<64x64xf32>
    %168 = vector.extract_strided_slice %143 {offsets = [0, 32], sizes = [64, 32], strides = [1, 1]} : vector<64x192xf32> to vector<64x32xf32>
    %169 = vector.extract_strided_slice %143 {offsets = [0, 96], sizes = [64, 32], strides = [1, 1]} : vector<64x192xf32> to vector<64x32xf32>
    %170 = vector.extract_strided_slice %143 {offsets = [0, 160], sizes = [64, 32], strides = [1, 1]} : vector<64x192xf32> to vector<64x32xf32>
    %cst_69 = arith.constant dense<0.000000e+00> : vector<64x64xf32>
    %171 = tpu.matmul %168, %169, %cst_69 {dimension_numbers = #tpu.dot_dimension_numbers<[1], [1], [0], [0], [0, 0, 1, 0], [], []>} : vector<64x32xf32>, vector<64x32xf32>, vector<64x64xf32> -> vector<64x64xf32>
    %172 = arith.addf %171, %0 : vector<64x64xf32>
    %cst_70 = arith.constant dense<0xFF800000> : vector<64xf32>
    %173 = vector.multi_reduction <maximumf>, %172, %cst_70 [1] : vector<64x64xf32> to vector<64xf32>
    %174 = vector.shape_cast %173 : vector<64xf32> to vector<64x1xf32>
    %175 = vector.broadcast %174 : vector<64x1xf32> to vector<64x64xf32>
    %176 = arith.subf %172, %175 : vector<64x64xf32>
    %177 = math.exp %176 : vector<64x64xf32>
    %cst_71 = arith.constant dense<0.000000e+00> : vector<64xf32>
    %178 = vector.multi_reduction <add>, %177, %cst_71 [1] : vector<64x64xf32> to vector<64xf32>
    %179 = vector.shape_cast %178 : vector<64xf32> to vector<64x1xf32>
    %180 = tpu.reciprocal %179 {approx = true} : vector<64x1xf32> -> vector<64x1xf32>
    %181 = arith.mulf %179, %180 : vector<64x1xf32>
    %cst_72 = arith.constant 2.000000e+00 : f32
    %182 = vector.broadcast %cst_72 : f32 to vector<64x1xf32>
    %183 = arith.subf %182, %181 : vector<64x1xf32>
    %184 = arith.mulf %180, %183 : vector<64x1xf32>
    %185 = vector.broadcast %184 : vector<64x1xf32> to vector<64x64xf32>
    %186 = arith.mulf %177, %185 : vector<64x64xf32>
    %cst_73 = arith.constant dense<0.000000e+00> : vector<64x32xf32>
    %187 = tpu.matmul %186, %170, %cst_73 {dimension_numbers = #tpu.dot_dimension_numbers<[1], [0], [0], [1], [0, 0, 1, 1], [], []>} : vector<64x64xf32>, vector<64x32xf32>, vector<64x32xf32> -> vector<64x32xf32>
    %188 = vector.extract_strided_slice %145 {offsets = [32, 0], sizes = [32, 64], strides = [1, 1]} : vector<64x64xf32> to vector<32x64xf32>
    %cst_74 = arith.constant dense<0.000000e+00> : vector<64x64xf32>
    %189 = tpu.matmul %187, %188, %cst_74 {dimension_numbers = #tpu.dot_dimension_numbers<[1], [0], [0], [1], [0, 0, 1, 1], [], []>} : vector<64x32xf32>, vector<32x64xf32>, vector<64x64xf32> -> vector<64x64xf32>
    %190 = arith.addf %167, %189 : vector<64x64xf32>
    %c10 = arith.constant 10 : index
    %c0_75 = arith.constant 0 : index
    %191 = vector.load %arg3[%c10, %c0_75] : memref<17x64xf32, #tpu.memory_space<vmem>>, vector<1x64xf32>
    %192 = vector.broadcast %191 : vector<1x64xf32> to vector<64x64xf32>
    %193 = arith.addf %190, %192 : vector<64x64xf32>
    %194 = arith.addf %136, %193 : vector<64x64xf32>
    %c13 = arith.constant 13 : index
    %c0_76 = arith.constant 0 : index
    %195 = vector.load %arg3[%c13, %c0_76] : memref<17x64xf32, #tpu.memory_space<vmem>>, vector<1x64xf32>
    %c14 = arith.constant 14 : index
    %c0_77 = arith.constant 0 : index
    %196 = vector.load %arg3[%c14, %c0_77] : memref<17x64xf32, #tpu.memory_space<vmem>>, vector<1x64xf32>
    %cst_78 = arith.constant dense<0.000000e+00> : vector<64xf32>
    %197 = vector.multi_reduction <add>, %194, %cst_78 [1] : vector<64x64xf32> to vector<64xf32>
    %198 = vector.shape_cast %197 : vector<64xf32> to vector<64x1xf32>
    %cst_79 = arith.constant 6.400000e+01 : f32
    %199 = vector.broadcast %cst_79 : f32 to vector<64x1xf32>
    %200 = arith.divf %198, %199 : vector<64x1xf32>
    %201 = vector.broadcast %200 : vector<64x1xf32> to vector<64x64xf32>
    %202 = arith.subf %194, %201 : vector<64x64xf32>
    %203 = arith.mulf %202, %202 : vector<64x64xf32>
    %cst_80 = arith.constant dense<0.000000e+00> : vector<64xf32>
    %204 = vector.multi_reduction <add>, %203, %cst_80 [1] : vector<64x64xf32> to vector<64xf32>
    %205 = vector.shape_cast %204 : vector<64xf32> to vector<64x1xf32>
    %cst_81 = arith.constant 6.400000e+01 : f32
    %206 = vector.broadcast %cst_81 : f32 to vector<64x1xf32>
    %207 = arith.divf %205, %206 : vector<64x1xf32>
    %208 = vector.broadcast %200 : vector<64x1xf32> to vector<64x64xf32>
    %209 = arith.subf %194, %208 : vector<64x64xf32>
    %cst_82 = arith.constant 9.99999974E-6 : f32
    %210 = vector.broadcast %cst_82 : f32 to vector<64x1xf32>
    %211 = arith.addf %207, %210 : vector<64x1xf32>
    %212 = math.rsqrt %211 : vector<64x1xf32>
    %213 = vector.broadcast %212 : vector<64x1xf32> to vector<64x64xf32>
    %214 = arith.mulf %209, %213 : vector<64x64xf32>
    %215 = vector.broadcast %195 : vector<1x64xf32> to vector<64x64xf32>
    %216 = arith.mulf %214, %215 : vector<64x64xf32>
    %217 = vector.broadcast %196 : vector<1x64xf32> to vector<64x64xf32>
    %218 = arith.addf %216, %217 : vector<64x64xf32>
    %c4_83 = arith.constant 4 : index
    %c0_84 = arith.constant 0 : index
    %c0_85 = arith.constant 0 : index
    %219 = vector.load %arg5[%c4_83, %c0_84, %c0_85] : memref<6x64x64xf32, #tpu.memory_space<vmem>>, vector<1x64x64xf32>
    %220 = vector.shape_cast %219 : vector<1x64x64xf32> to vector<64x64xf32>
    %cst_86 = arith.constant dense<0.000000e+00> : vector<64x64xf32>
    %221 = tpu.matmul %218, %220, %cst_86 {dimension_numbers = #tpu.dot_dimension_numbers<[1], [0], [0], [1], [0, 0, 1, 1], [], []>} : vector<64x64xf32>, vector<64x64xf32>, vector<64x64xf32> -> vector<64x64xf32>
    %c11 = arith.constant 11 : index
    %c0_87 = arith.constant 0 : index
    %222 = vector.load %arg3[%c11, %c0_87] : memref<17x64xf32, #tpu.memory_space<vmem>>, vector<1x64xf32>
    %223 = vector.broadcast %222 : vector<1x64xf32> to vector<64x64xf32>
    %224 = arith.addf %221, %223 : vector<64x64xf32>
    %cst_88 = arith.constant 0.000000e+00 : f32
    %225 = vector.broadcast %cst_88 : f32 to vector<64x64xf32>
    %226 = arith.maximumf %224, %225 : vector<64x64xf32>
    %c5_89 = arith.constant 5 : index
    %c0_90 = arith.constant 0 : index
    %c0_91 = arith.constant 0 : index
    %227 = vector.load %arg5[%c5_89, %c0_90, %c0_91] : memref<6x64x64xf32, #tpu.memory_space<vmem>>, vector<1x64x64xf32>
    %228 = vector.shape_cast %227 : vector<1x64x64xf32> to vector<64x64xf32>
    %cst_92 = arith.constant dense<0.000000e+00> : vector<64x64xf32>
    %229 = tpu.matmul %226, %228, %cst_92 {dimension_numbers = #tpu.dot_dimension_numbers<[1], [0], [0], [1], [0, 0, 1, 1], [], []>} : vector<64x64xf32>, vector<64x64xf32>, vector<64x64xf32> -> vector<64x64xf32>
    %c12 = arith.constant 12 : index
    %c0_93 = arith.constant 0 : index
    %230 = vector.load %arg3[%c12, %c0_93] : memref<17x64xf32, #tpu.memory_space<vmem>>, vector<1x64xf32>
    %231 = vector.broadcast %230 : vector<1x64xf32> to vector<64x64xf32>
    %232 = arith.addf %229, %231 : vector<64x64xf32>
    %233 = arith.addf %218, %232 : vector<64x64xf32>
    %c15 = arith.constant 15 : index
    %c0_94 = arith.constant 0 : index
    %234 = vector.load %arg3[%c15, %c0_94] : memref<17x64xf32, #tpu.memory_space<vmem>>, vector<1x64xf32>
    %c16 = arith.constant 16 : index
    %c0_95 = arith.constant 0 : index
    %235 = vector.load %arg3[%c16, %c0_95] : memref<17x64xf32, #tpu.memory_space<vmem>>, vector<1x64xf32>
    %cst_96 = arith.constant dense<0.000000e+00> : vector<64xf32>
    %236 = vector.multi_reduction <add>, %233, %cst_96 [1] : vector<64x64xf32> to vector<64xf32>
    %237 = vector.shape_cast %236 : vector<64xf32> to vector<64x1xf32>
    %cst_97 = arith.constant 6.400000e+01 : f32
    %238 = vector.broadcast %cst_97 : f32 to vector<64x1xf32>
    %239 = arith.divf %237, %238 : vector<64x1xf32>
    %240 = vector.broadcast %239 : vector<64x1xf32> to vector<64x64xf32>
    %241 = arith.subf %233, %240 : vector<64x64xf32>
    %242 = arith.mulf %241, %241 : vector<64x64xf32>
    %cst_98 = arith.constant dense<0.000000e+00> : vector<64xf32>
    %243 = vector.multi_reduction <add>, %242, %cst_98 [1] : vector<64x64xf32> to vector<64xf32>
    %244 = vector.shape_cast %243 : vector<64xf32> to vector<64x1xf32>
    %cst_99 = arith.constant 6.400000e+01 : f32
    %245 = vector.broadcast %cst_99 : f32 to vector<64x1xf32>
    %246 = arith.divf %244, %245 : vector<64x1xf32>
    %247 = vector.broadcast %239 : vector<64x1xf32> to vector<64x64xf32>
    %248 = arith.subf %233, %247 : vector<64x64xf32>
    %cst_100 = arith.constant 9.99999974E-6 : f32
    %249 = vector.broadcast %cst_100 : f32 to vector<64x1xf32>
    %250 = arith.addf %246, %249 : vector<64x1xf32>
    %251 = math.rsqrt %250 : vector<64x1xf32>
    %252 = vector.broadcast %251 : vector<64x1xf32> to vector<64x64xf32>
    %253 = arith.mulf %248, %252 : vector<64x64xf32>
    %254 = vector.broadcast %234 : vector<1x64xf32> to vector<64x64xf32>
    %255 = arith.mulf %253, %254 : vector<64x64xf32>
    %256 = vector.broadcast %235 : vector<1x64xf32> to vector<64x64xf32>
    %257 = arith.addf %255, %256 : vector<64x64xf32>
    %c0_101 = arith.constant 0 : index
    %c0_102 = arith.constant 0 : index
    %258 = vector.load %arg6[%c0_101, %c0_102] : memref<65x128xf32, #tpu.memory_space<vmem>>, vector<64x128xf32>
    %cst_103 = arith.constant dense<0.000000e+00> : vector<64x128xf32>
    %259 = tpu.matmul %257, %258, %cst_103 {dimension_numbers = #tpu.dot_dimension_numbers<[1], [0], [0], [1], [0, 0, 1, 1], [], []>} : vector<64x64xf32>, vector<64x128xf32>, vector<64x128xf32> -> vector<64x128xf32>
    %c64_104 = arith.constant 64 : index
    %c0_105 = arith.constant 0 : index
    %260 = vector.load %arg6[%c64_104, %c0_105] : memref<65x128xf32, #tpu.memory_space<vmem>>, vector<1x128xf32>
    %261 = vector.broadcast %260 : vector<1x128xf32> to vector<64x128xf32>
    %262 = arith.addf %259, %261 : vector<64x128xf32>
    %c0_106 = arith.constant 0 : index
    %c0_107 = arith.constant 0 : index
    %263 = vector.load %arg7[%c0_106, %c0_107] : memref<64x128xf32, #tpu.memory_space<vmem>>, vector<64x128xf32>
    tpu.vector_store %arg7[%c0_106, %c0_107], %262 {strides = array<i32>} : memref<64x128xf32, #tpu.memory_space<vmem>>, vector<64x128xf32>,
    return
  }
  func.func @transform_0(%arg0: i32) -> (i32, i32) {
    %c0_i32 = arith.constant 0 : i32
    %c0_i32_0 = arith.constant 0 : i32
    %c0_i32_1 = arith.constant 0 : i32
    return %c0_i32, %c0_i32_0 : i32, i32
  }
  func.func @transform_1(%arg0: i32) -> (i32, i32) {
    %c0_i32 = arith.constant 0 : i32
    %c0_i32_0 = arith.constant 0 : i32
    %c0_i32_1 = arith.constant 0 : i32
    return %c0_i32, %c0_i32_0 : i32, i32
  }
  func.func @transform_2(%arg0: i32) -> (i32, i32) {
    %c0_i32 = arith.constant 0 : i32
    %c0_i32_0 = arith.constant 0 : i32
    %c0_i32_1 = arith.constant 0 : i32
    return %c0_i32, %c0_i32_0 : i32, i32
  }
  func.func @transform_3(%arg0: i32) -> (i32, i32, i32) {
    %c0_i32 = arith.constant 0 : i32
    %c0_i32_0 = arith.constant 0 : i32
    %c0_i32_1 = arith.constant 0 : i32
    %c0_i32_2 = arith.constant 0 : i32
    return %c0_i32, %c0_i32_0, %c0_i32_1 : i32, i32, i32
  }
  func.func @transform_4(%arg0: i32) -> (i32, i32, i32) {
    %c0_i32 = arith.constant 0 : i32
    %c0_i32_0 = arith.constant 0 : i32
    %c0_i32_1 = arith.constant 0 : i32
    %c0_i32_2 = arith.constant 0 : i32
    return %c0_i32, %c0_i32_0, %c0_i32_1 : i32, i32, i32
  }
  func.func @transform_5(%arg0: i32) -> (i32, i32) {
    %c0_i32 = arith.constant 0 : i32
    %c0_i32_0 = arith.constant 0 : i32
    %c0_i32_1 = arith.constant 0 : i32
    return %c0_i32, %c0_i32_0 : i32, i32
  }
  func.func @transform_6(%arg0: i32) -> (i32, i32) {
    %c0_i32 = arith.constant 0 : i32
    %c0_i32_0 = arith.constant 0 : i32
    %c0_i32_1 = arith.constant 0 : i32
    return %c0_i32, %c0_i32_0 : i32, i32
  }
}

</mosaic_0001>

<bundles_post_ra>
// kernel: transformer_forward.1
= control target key start
LH: loop header
LB: loop body
LE: loop exit
PB: predicated region body
PF: predicated region fallthrough
CT: control target
= control target key end

     0   :  { %v5223_v0 = vmov 0   ;;  %v5224_v6 = vmov 1   ;;  %v5225_v10 = vmov 0.0   ;;  %vm187_vm0 = vcmask 523264   ;;  %s5226_s28 = smov 64   ;;  %s5227_s29 = smov 32   ;;  %s6860_s0 = inlined_call_operand.vmem [shape: f32[64,2], index: 0, kind: input, shape index: {}]   ;;  %s6861_s3 = inlined_call_operand.vmem [shape: f32[2,65,192], index: 3, kind: input, shape index: {}]   ;;  %s6862_s2 = inlined_call_operand.vmem [shape: f32[17,64], index: 2, kind: input, shape index: {}]   ;;  %s6863_s1 = inlined_call_operand.vmem [shape: f32[64,64], index: 1, kind: input, shape index: {}]   ;;  %s6864_s4 = inlined_call_operand.vmem [shape: f32[6,64,64], index: 4, kind: input, shape index: {}]   ;;  %s6865_s5 = inlined_call_operand.vmem [shape: f32[65,128], index: 5, kind: input, shape index: {}]   ;;  %s6866_s6 = inlined_call_operand.vmem [shape: f32[64,128], index: 6, kind: output, shape index: {}]  }
   0x1   :  { %5020 = vset.pattern.permute.xlu1 %v5223_v0  ;;  %5018 = vset.pattern.permute.xlu0 %v5223_v0  ;;  %v32_v1 = vld [vmem:[%s6860_s0 + $0x8] sm:$0xff]  ;;  %v31_v2 = vld [vmem:[%s6860_s0] sm:$0xff]  ;;  %v173_v3 = vld [vmem:[%s6861_s3 + $0x78] sm:$0xff]  ;;  %vm357_vm1 = vcmask 261120   ;;  %s5228_s30 = smov 96  }
   0x2   :  { %47 = vperm.xlu1 %5020, %v32_v1   ;;  %42 = vperm.xlu0 %5018, %v31_v2   ;;  %v172_v4 = vld [vmem:[%s6861_s3 + $0x70] sm:$0xff]  ;;  %v171_v5 = vld [vmem:[%s6861_s3 + $0x68] sm:$0xff]  ;;  %v170_v7 = vld [vmem:[%s6861_s3 + $0x60] sm:$0xff] }
   0x3   :  { %228 = vmatprep.subr.mxu0 %v173_v3  ;;  %v169_v8 = vld [vmem:[%s6861_s3 + $0x58] sm:$0xff]  ;;  %v33_v9 = vld [vmem:[%s6860_s0 + $0x10] sm:$0xff]  ;;  %276 = vmatprep.mubr.f32.mxu0 %v5225_v10  ;;  %v167_v12 = vld [vmem:[%s6861_s3 + $0x48] sm:$0xff] }
   0x4   :  { %229 = vmatpush1.msra.mxu0 %v172_v4  ;;  %v168_v11 = vld [vmem:[%s6861_s3 + $0x50] sm:$0xff]  ;;  %v166_v13 = vld [vmem:[%s6861_s3 + $0x40] sm:$0xff]  ;;  %v34_v14 = vld [vmem:[%s6860_s0 + $0x18] sm:$0xff] }
   0x5   :  { %230 = vmatprep.subr.mxu0 %v171_v5  ;;  %v165_v15 = vld [vmem:[%s6861_s3 + $0x38] sm:$0xff]  ;;  %v164_v16 = vld [vmem:[%s6861_s3 + $0x30] sm:$0xff]  ;;  %v163_v17 = vld [vmem:[%s6861_s3 + $0x28] sm:$0xff] }
   0x6   :  { %5021 = vset.pattern.permute.xlu1 %v5224_v6  ;;  %5019 = vset.pattern.permute.xlu0 %v5224_v6  ;;  %v162_v18 = vld [vmem:[%s6861_s3 + $0x20] sm:$0xff]  ;;  %v161_v20 = vld [vmem:[%s6861_s3 + $0x18] sm:$0xff]  ;;  %v160_v21 = vld [vmem:[%s6861_s3 + $0x10] sm:$0xff] }
   0x7   :  { %98 = vperm.xlu1 %5021, %v32_v1   ;;  %94 = vperm.xlu0 %5019, %v31_v2   ;;  %v35_v19 = vld [vmem:[%s6860_s0 + $0x20] sm:$0xff]  ;;  %v159_v22 = vld [vmem:[%s6861_s3 + $0x8] sm:$0xff]  ;;  %v37_v25 = vld [vmem:[%s6860_s0 + $0x30] sm:$0xff] }
   0x8   :  { %231 = vmatpush1.msra.mxu0 %v170_v7  ;;  %v158_v23 = vld [vmem:[%s6861_s3] sm:$0xff]  ;;  %v36_v24 = vld [vmem:[%s6860_s0 + $0x28] sm:$0xff]  ;;  %v38_v26 = vld [vmem:[%s6860_s0 + $0x38] sm:$0xff] }
   0x9   :  { %232 = vmatprep.subr.mxu0 %v169_v8  ;;  %v4036_v29 = vld [vmem:[%s6862_s2] ss:$0 sm:$0xff]  ;;  %v4037_v30 = vld [vmem:[%s6862_s2 + $0x1] ss:$0 sm:$0xff]  ;;  %v4038_v36 = vld [vmem:[%s6862_s2 + $0x2] ss:$0 sm:$0xff] }
   0xa   :  { %233 = vmatpush1.msra.mxu0 %v168_v11 }
   0xb   :  { %5022 = vset.pattern.permute.xlu1 %v5223_v0  ;;  %102 = vperm.xlu0 %5019, %v33_v9  }
   0xc   :  { %52 = vperm.xlu1 %5022, %v33_v9   ;;  %234 = vmatprep.subr.mxu0 %v167_v12 }
   0xd   :  { %235 = vmatpush1.msra.mxu0 %v166_v13 }
   0xe   :  { %236 = vmatprep.subr.mxu0 %v165_v15  ;;  %v177_v15 = vlaneseq }
   0xf   :  { %106 = vperm.xlu0 %5019, %v34_v14   ;;  %237 = vmatpush1.msra.mxu0 %v164_v16 }
  0x10   :  { %57 = vperm.xlu1 %5022, %v34_v14   ;;  %238 = vmatprep.subr.mxu0 %v163_v17  ;;  %v5385_v16 = vshrl.u32 %v177_v15, 7 }
  0x11   :  { %239 = vmatpush1.msra.mxu0 %v162_v18  ;;  %v4039_v18 = vld [vmem:[%s6861_s3 + $0x80] ss:$8 sm:$0x3] }
  0x12   :  { %240 = vmatprep.subr.mxu0 %v161_v20  ;;  %v179_v17 = vsub.s32 0, %v5385_v16 }
  0x13   :  { %110 = vperm.xlu0 %5019, %v35_v19   ;;  %241 = vmatpush1.msra.mxu0 %v160_v21 }
  0x14   :  { %62 = vperm.xlu1 %5022, %v35_v19   ;;  %242 = vmatprep.subr.mxu0 %v159_v22  ;;  %v180_v19 = vrot.slane %v4039_v18, %v179_v17 }
  0x15   :  { %243 = vmatpush1.msra.mxu0 %v158_v23 }
  0x17   :  { %114 = vperm.xlu0 %5019, %v36_v24  }
  0x18   :  { %67 = vperm.xlu1 %5022, %v36_v24  }
  0x1b   :  { %118 = vperm.xlu0 %5019, %v37_v25  }
  0x1c   :  { %72 = vperm.xlu1 %5022, %v37_v25  }
  0x1f   :  { %122 = vperm.xlu0 %5019, %v38_v26  }
  0x20   :  { %77 = vperm.xlu1 %5022, %v38_v26  }
  0x7d   :  { %v43_v27 = vpop.permute.xlu0 %42  ;;  %v48_v28 = vpop.permute.xlu1 %47 }
  0x7e   :  { %v84_v33 = vmul.f32 %v4036_v29, %v43_v27  ;;  %v85_v37 = vmul.f32 %v4036_v29, %v48_v28 }
  0x82   :  { %v99_v31 = vpop.permute.xlu1 %98  ;;  %v95_v32 = vpop.permute.xlu0 %94 }
  0x83   :  { %v130_v34 = vmul.f32 %v4037_v30, %v99_v31  ;;  %v129_v35 = vmul.f32 %v4037_v30, %v95_v32 }
  0x85   :  { %v137_v38 = vadd.f32 %v129_v35, %v84_v33  ;;  %v138_v40 = vadd.f32 %v130_v34, %v85_v37  ;;  %v183_v34 = vsub.s32 1, %v5385_v16 }
  0x86   :  { %v103_v39 = vpop.permute.xlu0 %102 }
  0x87   :  { %v5346_v41 = vadd.f32 %v4038_v36, %v137_v38  ;;  %v131_v42 = vmul.f32 %v4037_v30, %v103_v39  ;;  %v53_v43 = vpop.permute.xlu1 %52  ;;  %v5351_v46 = vadd.f32 %v4038_v36, %v138_v40  ;;  %v184_v38 = vrot.slane %v4039_v18, %v183_v34 }
  0x88   :  { %v86_v44 = vmul.f32 %v4036_v29, %v53_v43 }
  0x89   :  { %4040 = vmatmul.mubr.msk.f32.vlgmr.msra.gmra.mxu0 %vm187_vm0, %v5346_v41 }
  0x8a   :  { %v107_v45 = vpop.permute.xlu0 %106  ;;  %282 = vmatprep.mubr.f32.mxu0 %v5225_v10  ;;  %v139_v47 = vadd.f32 %v131_v42, %v86_v44 }
  0x8b   :  { %v132_v48 = vmul.f32 %v4037_v30, %v107_v45  ;;  %v58_v49 = vpop.permute.xlu1 %57 }
  0x8c   :  { %v87_v50 = vmul.f32 %v4036_v29, %v58_v49  ;;  %v5356_v52 = vadd.f32 %v4038_v36, %v139_v47 }
  0x8d   :  { %4041 = vmatmul.mubr.msk.f32.gmra.mxu0 %vm187_vm0, %v5351_v46 }
  0x8e   :  { %v111_v51 = vpop.permute.xlu0 %110  ;;  %288 = vmatprep.mubr.f32.mxu0 %v5225_v10  ;;  %v140_v53 = vadd.f32 %v132_v48, %v87_v50 }
  0x8f   :  { %v133_v54 = vmul.f32 %v4037_v30, %v111_v51  ;;  %v63_v55 = vpop.permute.xlu1 %62 }
  0x90   :  { %v88_v56 = vmul.f32 %v4036_v29, %v63_v55  ;;  %v5361_v58 = vadd.f32 %v4038_v36, %v140_v53 }
  0x91   :  { %4042 = vmatmul.mubr.msk.f32.gmra.mxu0 %vm187_vm0, %v5356_v52 }
  0x92   :  { %v115_v57 = vpop.permute.xlu0 %114  ;;  %294 = vmatprep.mubr.f32.mxu0 %v5225_v10  ;;  %v141_v59 = vadd.f32 %v133_v54, %v88_v56 }
  0x93   :  { %v134_v60 = vmul.f32 %v4037_v30, %v115_v57  ;;  %v68_v61 = vpop.permute.xlu1 %67 }
  0x94   :  { %v89_v62 = vmul.f32 %v4036_v29, %v68_v61  ;;  %v5366_v0 = vadd.f32 %v4038_v36, %v141_v59 }
  0x95   :  { %4043 = vmatmul.mubr.msk.f32.gmra.mxu0 %vm187_vm0, %v5361_v58 }
  0x96   :  { %v119_v63 = vpop.permute.xlu0 %118  ;;  %300 = vmatprep.mubr.f32.mxu0 %v5225_v10  ;;  %v142_v1 = vadd.f32 %v134_v60, %v89_v62 }
  0x97   :  { %v135_v2 = vmul.f32 %v4037_v30, %v119_v63  ;;  %v73_v3 = vpop.permute.xlu1 %72 }
  0x98   :  { %v90_v4 = vmul.f32 %v4036_v29, %v73_v3  ;;  %v5371_v6 = vadd.f32 %v4038_v36, %v142_v1 }
  0x99   :  { %4044 = vmatmul.mubr.msk.f32.gmra.mxu0 %vm187_vm0, %v5366_v0 }
  0x9a   :  { %v123_v5 = vpop.permute.xlu0 %122  ;;  %306 = vmatprep.mubr.f32.mxu0 %v5225_v10  ;;  %v143_v7 = vadd.f32 %v135_v2, %v90_v4 }
  0x9b   :  { %v136_v8 = vmul.f32 %v4037_v30, %v123_v5  ;;  %v78_v9 = vpop.permute.xlu1 %77 }
  0x9c   :  { %v91_v11 = vmul.f32 %v4036_v29, %v78_v9  ;;  %v5376_v12 = vadd.f32 %v4038_v36, %v143_v7 }
  0x9d   :  { %4045 = vmatmul.mubr.msk.f32.gmra.mxu0 %vm187_vm0, %v5371_v6 }
  0x9e   :  { %312 = vmatprep.mubr.f32.mxu0 %v5225_v10  ;;  %v144_v13 = vadd.f32 %v136_v8, %v91_v11 }
  0xa0   :  { %v5381_v14 = vadd.f32 %v4038_v36, %v144_v13 }
  0xa1   :  { %4046 = vmatmul.mubr.msk.f32.gmra.mxu0 %vm187_vm0, %v5376_v12 }
  0xa2   :  { %318 = vmatprep.mubr.f32.mxu0 %v5225_v10 }
  0xa5   :  { %4047 = vmatmul.mubr.msk.f32.gmra.mxu0 %vm187_vm0, %v5381_v14 }
 0x149   :  { %v278_v20 = vpop.f32.mrf.mxu0 }
 0x14a   :  { %v5393_v21 = vadd.f32 %v278_v20, %v180_v19 }
 0x14b   :  { %v280_v22 = vpop.f32.mrf.mxu0 }
 0x14c   :  { %4568 = vmatprep.mubr.msk.f32.mxu1 %vm357_vm1, %v5393_v21  ;;  %v5442_v56 = vadd.f32 %v280_v22, %v184_v38 }
 0x14d   :  { %v284_v23 = vpop.f32.mrf.mxu0 }
 0x14e   :  { %v5431_v54 = vadd.f32 %v284_v23, %v180_v19 }
 0x14f   :  { %v286_v24 = vpop.f32.mrf.mxu0 }
 0x150   :  { %v5434_v55 = vadd.f32 %v286_v24, %v184_v38 }
 0x151   :  { %v290_v25 = vpop.f32.mrf.mxu0 }
 0x152   :  { %v5412_v44 = vadd.f32 %v290_v25, %v180_v19 }
 0x153   :  { %v292_v26 = vpop.f32.mrf.mxu0 }
 0x154   :  { %v5428_v53 = vadd.f32 %v292_v26, %v184_v38 }
 0x155   :  { %v296_v27 = vpop.f32.mrf.mxu0 }
 0x156   :  { %v5420_v50 = vadd.f32 %v296_v27, %v180_v19 }
 0x157   :  { %v298_v28 = vpop.f32.mrf.mxu0 }
 0x158   :  { %v5422_v51 = vadd.f32 %v298_v28, %v184_v38 }
 0x159   :  { %v302_v29 = vpop.f32.mrf.mxu0 }
 0x15a   :  { %v5404_v39 = vadd.f32 %v302_v29, %v180_v19  ;;  %v24_v29 = vld [vmem:[%s6863_s1 + $0x8] sm:$0xff] }
 0x15b   :  { %v304_v30 = vpop.f32.mrf.mxu0 }
 0x15c   :  { %v305_v49 = vadd.f32 %v304_v30, %v184_v38 }
 0x15d   :  { %v308_v31 = vpop.f32.mrf.mxu0 }
 0x15e   :  { %v5414_v47 = vadd.f32 %v308_v31, %v180_v19  ;;  %v23_v31 = vld [vmem:[%s6863_s1] sm:$0xff] }
 0x15f   :  { %v310_v32 = vpop.f32.mrf.mxu0 }
 0x160   :  { %v311_v48 = vadd.f32 %v310_v32, %v184_v38 }
 0x161   :  { %v314_v33 = vpop.f32.mrf.mxu0 }
 0x162   :  { %v5398_v35 = vadd.f32 %v314_v33, %v180_v19 }
 0x163   :  { %v316_v36 = vpop.f32.mrf.mxu0 }
 0x164   :  { %353 = vrot.lane.b32.xlu0 %v5398_v35, %s5226_s28  ;;  %v317_v45 = vadd.f32 %v316_v36, %v184_v38 }
 0x165   :  { %v320_v37 = vpop.f32.mrf.mxu0 }
 0x166   :  { %v5406_v40 = vadd.f32 %v320_v37, %v180_v19 }
 0x167   :  { %v322_v42 = vpop.f32.mrf.mxu0 }
 0x168   :  { %v323_v43 = vadd.f32 %v322_v42, %v184_v38  ;;  %349 = vrot.lane.b32.xlu0 %v5404_v39, %s5226_s28  ;;  %355 = vrot.lane.b32.xlu1 %v5406_v40, %s5226_s28 }
 0x16a   :  { %4580 = vmatprep.subr.mxu0 %v323_v43 }
 0x16b   :  { %4581 = vmatpush3.msra.mxu0 %v323_v43 }
 0x16c   :  { %345 = vrot.lane.b32.xlu0 %v5412_v44, %s5226_s28  ;;  %4582 = vmatprep.subr.mxu0 %v317_v45 }
 0x16d   :  { %351 = vrot.lane.b32.xlu1 %v5414_v47, %s5226_s28  ;;  %4583 = vmatpush3.msra.mxu0 %v317_v45 }
 0x16e   :  { %4584 = vmatprep.subr.mxu0 %v311_v48 }
 0x16f   :  { %4585 = vmatpush3.msra.mxu0 %v311_v48 }
 0x170   :  { %341 = vrot.lane.b32.xlu0 %v5393_v21, %s5226_s28  ;;  %4586 = vmatprep.subr.mxu0 %v305_v49 }
 0x171   :  { %347 = vrot.lane.b32.xlu1 %v5420_v50, %s5226_s28  ;;  %4587 = vmatpush3.msra.mxu0 %v305_v49 }
 0x172   :  { %4588 = vmatprep.subr.mxu0 %v5422_v51 }
 0x173   :  { %4589 = vmatpush3.msra.mxu0 %v5422_v51 }
 0x174   :  { %764 = vrot.lane.b32.xlu0 %v5398_v35, %s5227_s29  ;;  %4590 = vmatprep.subr.mxu0 %v5428_v53 }
 0x175   :  { %343 = vrot.lane.b32.xlu1 %v5431_v54, %s5226_s28  ;;  %4591 = vmatpush3.msra.mxu0 %v5428_v53 }
 0x176   :  { %4592 = vmatprep.subr.mxu0 %v5434_v55 }
 0x177   :  { %4593 = vmatpush3.msra.mxu0 %v5434_v55 }
 0x178   :  { %760 = vrot.lane.b32.xlu0 %v5404_v39, %s5227_s29  ;;  %4594 = vmatprep.subr.mxu0 %v5442_v56 }
 0x179   :  { %766 = vrot.lane.b32.xlu1 %v5406_v40, %s5227_s29  ;;  %4595 = vmatpush3.msra.mxu0 %v5442_v56 }
 0x17c   :  { %756 = vrot.lane.b32.xlu0 %v5412_v44, %s5227_s29 }
 0x17d   :  { %762 = vrot.lane.b32.xlu1 %v5414_v47, %s5227_s29 }
 0x180   :  { %752 = vrot.lane.b32.xlu0 %v5393_v21, %s5227_s29 }
 0x181   :  { %758 = vrot.lane.b32.xlu1 %v5420_v50, %s5227_s29 }
 0x184   :  { %738 = vrot.lane.b32.xlu0 %v5431_v54, %s5228_s30 }
 0x185   :  { %754 = vrot.lane.b32.xlu1 %v5431_v54, %s5227_s29 }
 0x188   :  { %742 = vrot.lane.b32.xlu0 %v5420_v50, %s5228_s30 }
 0x189   :  { %736 = vrot.lane.b32.xlu1 %v5393_v21, %s5228_s30 }
 0x18c   :  { %746 = vrot.lane.b32.xlu0 %v5414_v47, %s5228_s30 }
 0x18d   :  { %740 = vrot.lane.b32.xlu1 %v5412_v44, %s5228_s30 }
 0x190   :  { %750 = vrot.lane.b32.xlu0 %v5406_v40, %s5228_s30 }
 0x191   :  { %744 = vrot.lane.b32.xlu1 %v5404_v39, %s5228_s30 }
 0x194   :  { %1033 = vrot.lane.b32.xlu0 %v305_v49, %s5228_s30 }
 0x195   :  { %748 = vrot.lane.b32.xlu1 %v5398_v35, %s5228_s30 }
 0x198   :  { %1039 = vrot.lane.b32.xlu0 %v323_v43, %s5228_s30 }
 0x199   :  { %1037 = vrot.lane.b32.xlu1 %v317_v45, %s5228_s30 }
 0x19d   :  { %1035 = vrot.lane.b32.xlu1 %v311_v48, %s5228_s30  ;;  %v27_v48 = vld [vmem:[%s6863_s1 + $0x20] sm:$0xff] }
 0x1d6   :  { %v354_v57 = vpop.permute.xlu0 %353 }
 0x1da   :  { %v356_v59 = vpop.permute.xlu1 %355  ;;  %v350_v60 = vpop.permute.xlu0 %349 }
 0x1db   :  { %4552 = vmatprep.subr.msk.mxu1 %vm357_vm1, %v356_v59 }
 0x1dc   :  { %4553 = vmatpush3.xpose.msk.msra.mxu1 %vm357_vm1, %v356_v59  ;;  %v30_v59 = vld [vmem:[%s6863_s1 + $0x38] sm:$0xff] }
 0x1dd   :  { %4554 = vmatprep.subr.msk.mxu1 %vm357_vm1, %v354_v57 }
 0x1de   :  { %v346_v61 = vpop.permute.xlu0 %345 }
 0x1df   :  { %v352_v62 = vpop.permute.xlu1 %351 }
 0x1e0   :  { %4555 = vmatpush3.xpose.msk.msra.mxu1 %vm357_vm1, %v354_v57 }
 0x1e1   :  { %4556 = vmatprep.subr.msk.mxu1 %vm357_vm1, %v352_v62 }
 0x1e2   :  { %v342_v63 = vpop.permute.xlu0 %341 }
 0x1e3   :  { %v348_v1 = vpop.permute.xlu1 %347 }
 0x1e4   :  { %4557 = vmatpush3.xpose.msk.msra.mxu1 %vm357_vm1, %v352_v62  ;;  %v29_v62 = vld [vmem:[%s6863_s1 + $0x30] sm:$0xff] }
 0x1e5   :  { %4558 = vmatprep.subr.msk.mxu1 %vm357_vm1, %v350_v60 }
 0x1e6   :  { %v765_v2 = vpop.permute.xlu0 %764 }
 0x1e7   :  { %v344_v3 = vpop.permute.xlu1 %343 }
 0x1e8   :  { %4559 = vmatpush3.xpose.msk.msra.mxu1 %vm357_vm1, %v350_v60 }
 0x1e9   :  { %4560 = vmatprep.subr.msk.mxu1 %vm357_vm1, %v348_v1 }
 0x1ea   :  { %v761_v4 = vpop.permute.xlu0 %760 }
 0x1eb   :  { %v767_v5 = vpop.permute.xlu1 %766 }
 0x1ec   :  { %4561 = vmatpush3.xpose.msk.msra.mxu1 %vm357_vm1, %v348_v1 }
 0x1ed   :  { %4562 = vmatprep.subr.msk.mxu1 %vm357_vm1, %v346_v61 }
 0x1ee   :  { %v757_v7 = vpop.permute.xlu0 %756 }
 0x1ef   :  { %v763_v8 = vpop.permute.xlu1 %762 }
 0x1f0   :  { %4563 = vmatpush3.xpose.msk.msra.mxu1 %vm357_vm1, %v346_v61 }
 0x1f1   :  { %4564 = vmatprep.subr.msk.mxu1 %vm357_vm1, %v344_v3 }
 0x1f2   :  { %v753_v9 = vpop.permute.xlu0 %752 }
 0x1f3   :  { %v759_v11 = vpop.permute.xlu1 %758 }
 0x1f4   :  { %4565 = vmatpush3.xpose.msk.msra.mxu1 %vm357_vm1, %v344_v3 }
 0x1f5   :  { %4566 = vmatprep.subr.msk.mxu1 %vm357_vm1, %v342_v63 }
 0x1f6   :  { %v739_v13 = vpop.permute.xlu0 %738 }
 0x1f7   :  { %v755_v15 = vpop.permute.xlu1 %754 }
 0x1f8   :  { %4567 = vmatpush3.xpose.msk.msra.mxu1 %vm357_vm1, %v342_v63 }
 0x1f9   :  { %4608 = vmatprep.subr.msk.mxu1 %vm357_vm1, %v767_v5 }
 0x1fa   :  { %v743_v18 = vpop.permute.xlu0 %742 }
 0x1fb   :  { %4569 = vmatmul.mubr.msk.f32.vlgmr.msra.gmra.mxu1 %vm357_vm1, %v5431_v54  ;;  %v737_v20 = vpop.permute.xlu1 %736 }
 0x1fc   :  { %4571 = vmatprep.mubr.msk.f32.mxu1 %vm357_vm1, %v5412_v44  ;;  %4609 = vmatpush3.xpose.msk.msra.mxu1 %vm357_vm1, %v767_v5  ;;  %v28_v44 = vld [vmem:[%s6863_s1 + $0x28] sm:$0xff] }
 0x1fd   :  { %4610 = vmatprep.subr.msk.mxu1 %vm357_vm1, %v765_v2 }
 0x1fe   :  { %v747_v19 = vpop.permute.xlu0 %746 }
 0x1ff   :  { %4572 = vmatmul.mubr.msk.f32.gmra.mxu1 %vm357_vm1, %v5420_v50  ;;  %v741_v22 = vpop.permute.xlu1 %740 }
 0x200   :  { %4574 = vmatprep.mubr.msk.f32.mxu1 %vm357_vm1, %v5404_v39  ;;  %4611 = vmatpush3.xpose.msk.msra.mxu1 %vm357_vm1, %v765_v2  ;;  %v25_v39 = vld [vmem:[%s6863_s1 + $0x10] sm:$0xff] }
 0x201   :  { %4612 = vmatprep.subr.msk.mxu1 %vm357_vm1, %v763_v8 }
 0x202   :  { %v751_v21 = vpop.permute.xlu0 %750 }
 0x203   :  { %4575 = vmatmul.mubr.msk.f32.gmra.mxu1 %vm357_vm1, %v5414_v47  ;;  %v745_v25 = vpop.permute.xlu1 %744 }
 0x204   :  { %4577 = vmatprep.mubr.msk.f32.mxu1 %vm357_vm1, %v5398_v35  ;;  %4613 = vmatpush3.xpose.msk.msra.mxu1 %vm357_vm1, %v763_v8  ;;  %v26_v35 = vld [vmem:[%s6863_s1 + $0x18] sm:$0xff] }
 0x205   :  { %4614 = vmatprep.subr.msk.mxu1 %vm357_vm1, %v761_v4 }
 0x206   :  { %v5517_v23 = vpop.permute.xlu0 %1033 }
 0x207   :  { %4578 = vmatmul.mubr.msk.f32.gmra.mxu1 %vm357_vm1, %v5406_v40  ;;  %v749_v26 = vpop.permute.xlu1 %748 }
 0x208   :  { %4615 = vmatpush3.xpose.msk.msra.mxu1 %vm357_vm1, %v761_v4  ;;  %4624 = vmatprep.mubr.msk.f32.mxu1 %vm357_vm1, %v737_v20 }
 0x209   :  { %4616 = vmatprep.subr.msk.mxu1 %vm357_vm1, %v759_v11 }
 0x20a   :  { %v5524_v24 = vpop.permute.xlu0 %1039 }
 0x20b   :  { %4636 = vmatprep.subr.mxu0 %v5524_v24  ;;  %v5533_v27 = vpop.permute.xlu1 %1037 }
 0x20c   :  { %4617 = vmatpush3.xpose.msk.msra.mxu1 %vm357_vm1, %v759_v11 }
 0x20d   :  { %4618 = vmatprep.subr.msk.mxu1 %vm357_vm1, %v757_v7 }
 0x20f   :  { %v5541_v28 = vpop.permute.xlu1 %1035 }
 0x210   :  { %4619 = vmatpush3.xpose.msk.msra.mxu1 %vm357_vm1, %v757_v7 }
 0x211   :  { %4620 = vmatprep.subr.msk.mxu1 %vm357_vm1, %v755_v15 }
 0x214   :  { %4621 = vmatpush3.xpose.msk.msra.mxu1 %vm357_vm1, %v755_v15 }
 0x215   :  { %4622 = vmatprep.subr.msk.mxu1 %vm357_vm1, %v753_v9 }
 0x218   :  { %4623 = vmatpush3.xpose.msk.msra.mxu1 %vm357_vm1, %v753_v9 }
 0x219   :  { %4996 = vmatprep.subr.mxu1 %v5524_v24 }
 0x21b   :  { %4625 = vmatmul.mubr.msk.f32.vlgmr.msra.gmra.mxu1 %vm357_vm1, %v739_v13 }
 0x21c   :  { %4627 = vmatprep.mubr.msk.f32.mxu1 %vm357_vm1, %v741_v22  ;;  %5004 = vmatpush3.msra.mxu1 %v5524_v24 }
 0x21d   :  { %4997 = vmatprep.subr.mxu1 %v5533_v27 }
 0x21e   :  { %5005 = vmatpush3.msra.mxu1 %v5533_v27 }
 0x21f   :  { %4628 = vmatmul.mubr.msk.f32.gmra.mxu1 %vm357_vm1, %v743_v18  ;;  %4998 = vmatprep.subr.mxu1 %v5541_v28 }
 0x220   :  { %4630 = vmatprep.mubr.msk.f32.mxu1 %vm357_vm1, %v745_v25  ;;  %5006 = vmatpush3.msra.mxu1 %v5541_v28 }
 0x221   :  { %4999 = vmatprep.subr.mxu1 %v5517_v23 }
 0x222   :  { %5007 = vmatpush3.msra.mxu1 %v5517_v23 }
 0x223   :  { %4631 = vmatmul.mubr.msk.f32.gmra.mxu1 %vm357_vm1, %v747_v19 }
 0x224   :  { %4633 = vmatprep.mubr.msk.f32.mxu1 %vm357_vm1, %v749_v26 }
 0x227   :  { %4634 = vmatmul.mubr.msk.f32.gmra.mxu1 %vm357_vm1, %v751_v21 }
 0x2bb   :  { %v4570_v30 = vpop.f32.mrf.mxu1 }
 0x2bc   :  { %v5559_v32 = vadd.f32 %v4570_v30, %v24_v29 }
 0x2bd   :  { %v456_v33 = vpop.f32.mrf.mxu1 }
 0x2be   :  { %v5564_v36 = vadd.f32 %v456_v33, %v23_v31  ;;  %v498_v37 = vsel %vm187_vm0, %v5559_v32, -inf }
 0x2bf   :  { %499 = vmax.xlane.f32.xlu0 %v498_v37  ;;  %v4573_v38 = vpop.f32.mrf.mxu1 }
 0x2c0   :  { %v5571_v40 = vadd.f32 %v4573_v38, %v26_v35  ;;  %v495_v42 = vsel %vm187_vm0, %v5564_v36, -inf }
 0x2c1   :  { %v466_v43 = vpop.f32.mrf.mxu1  ;;  %496 = vmax.xlane.f32.xlu1 %v495_v42 }
 0x2c2   :  { %v5578_v45 = vadd.f32 %v466_v43, %v25_v39  ;;  %v504_v54 = vsel %vm187_vm0, %v5571_v40, -inf }
 0x2c3   :  { %v4576_v47 = vpop.f32.mrf.mxu1 }
 0x2c4   :  { %v5583_v49 = vadd.f32 %v4576_v47, %v28_v44  ;;  %v501_v50 = vsel %vm187_vm0, %v5578_v45, -inf }
 0x2c5   :  { %v476_v57 = vpop.f32.mrf.mxu1  ;;  %502 = vmax.xlane.f32.xlu0 %v501_v50  ;;  %505 = vmax.xlane.f32.xlu1 %v504_v54 }
 0x2c6   :  { %v5592_v60 = vadd.f32 %v476_v57, %v27_v48  ;;  %v510_v2 = vsel %vm187_vm0, %v5583_v49, -inf }
 0x2c7   :  { %v4579_v61 = vpop.f32.mrf.mxu1 }
 0x2c8   :  { %v5597_v63 = vadd.f32 %v4579_v61, %v30_v59  ;;  %v507_v1 = vsel %vm187_vm0, %v5592_v60, -inf }
 0x2c9   :  { %v486_v3 = vpop.f32.mrf.mxu1  ;;  %508 = vmax.xlane.f32.xlu0 %v507_v1  ;;  %511 = vmax.xlane.f32.xlu1 %v510_v2 }
 0x2ca   :  { %v5603_v4 = vadd.f32 %v486_v3, %v29_v62  ;;  %v516_v7 = vsel %vm187_vm0, %v5597_v63, -inf }
 0x2cc   :  { %v513_v5 = vsel %vm187_vm0, %v5603_v4, -inf }
 0x2cd   :  { %514 = vmax.xlane.f32.xlu0 %v513_v5  ;;  %517 = vmax.xlane.f32.xlu1 %v516_v7 }
 0x2db   :  { %v4626_v8 = vpop.f32.mrf.mxu1 }
 0x2dc   :  { %v5609_v9 = vadd.f32 %v4626_v8, %v24_v29 }
 0x2dd   :  { %v866_v11 = vpop.f32.mrf.mxu1 }
 0x2de   :  { %v5611_v13 = vadd.f32 %v866_v11, %v23_v31  ;;  %v908_v15 = vsel %vm187_vm0, %v5609_v9, -inf }
 0x2df   :  { %909 = vmax.xlane.f32.xlu1 %v908_v15  ;;  %v4629_v18 = vpop.f32.mrf.mxu1 }
 0x2e0   :  { %v5615_v19 = vadd.f32 %v4629_v18, %v26_v35  ;;  %v905_v20 = vsel %vm187_vm0, %v5611_v13, -inf }
 0x2e1   :  { %906 = vmax.xlane.f32.xlu0 %v905_v20  ;;  %v876_v21 = vpop.f32.mrf.mxu1 }
 0x2e2   :  { %v5619_v22 = vadd.f32 %v876_v21, %v25_v39  ;;  %v914_v25 = vsel %vm187_vm0, %v5615_v19, -inf }
 0x2e3   :  { %915 = vmax.xlane.f32.xlu1 %v914_v25  ;;  %v4632_v26 = vpop.f32.mrf.mxu1 }
 0x2e4   :  { %v5623_v29 = vadd.f32 %v4632_v26, %v28_v44  ;;  %v911_v30 = vsel %vm187_vm0, %v5619_v22, -inf }
 0x2e5   :  { %912 = vmax.xlane.f32.xlu0 %v911_v30  ;;  %v886_v31 = vpop.f32.mrf.mxu1 }
 0x2e6   :  { %v5627_v33 = vadd.f32 %v886_v31, %v27_v48  ;;  %v920_v35 = vsel %vm187_vm0, %v5623_v29, -inf }
 0x2e7   :  { %921 = vmax.xlane.f32.xlu1 %v920_v35  ;;  %v4635_v37 = vpop.f32.mrf.mxu1 }
 0x2e8   :  { %v5631_v38 = vadd.f32 %v4635_v37, %v30_v59  ;;  %v917_v39 = vsel %vm187_vm0, %v5627_v33, -inf }
 0x2e9   :  { %918 = vmax.xlane.f32.xlu0 %v917_v39  ;;  %v896_v42 = vpop.f32.mrf.mxu1 }
 0x2ea   :  { %v5635_v43 = vadd.f32 %v896_v42, %v29_v62  ;;  %v926_v44 = vsel %vm187_vm0, %v5631_v38, -inf }
 0x2eb   :  { %927 = vmax.xlane.f32.xlu1 %v926_v44 }
 0x2ec   :  { %v923_v47 = vsel %vm187_vm0, %v5635_v43, -inf }
 0x2ed   :  { %924 = vmax.xlane.f32.xlu0 %v923_v47 }
 0x2fc   :  { %1031 = vrot.lane.b32.xlu1 %v5422_v51, %s5228_s30 }
 0x303   :  { %1029 = vrot.lane.b32.xlu0 %v5428_v53, %s5228_s30 }
 0x348   :  { %v500_v48 = vpop.xlane.xlu0 %499 }
 0x349   :  { %v520_v50 = vsub.f32 %v5559_v32, %v500_v48 }
 0x34a   :  { %v497_v54 = vpop.xlane.xlu1 %496 }
 0x34b   :  { %v529_v57 = vmul.f32 1.442695, %v520_v50  ;;  %v519_v59 = vsub.f32 %v5564_v36, %v497_v54 }
 0x34d   :  { %5023 = vpow2.f32 %v529_v57  ;;  %v527_v61 = vmul.f32 1.442695, %v519_v59 }
 0x34e   :  { %v506_v62 = vpop.xlane.xlu1 %505  ;;  %v503_v1 = vpop.xlane.xlu0 %502 }
 0x34f   :  { %5025 = vpow2.f32 %v527_v61  ;;  %v522_v2 = vsub.f32 %v5571_v40, %v506_v62  ;;  %v521_v3 = vsub.f32 %v5578_v45, %v503_v1 }
 0x351   :  { %v533_v51 = vmul.f32 1.442695, %v522_v2  ;;  %v531_v5 = vmul.f32 1.442695, %v521_v3 }
 0x352   :  { %v512_v7 = vpop.xlane.xlu1 %511  ;;  %v509_v53 = vpop.xlane.xlu0 %508 }
 0x353   :  { %5027 = vpow2.f32 %v533_v51  ;;  %v524_v32 = vsub.f32 %v5583_v49, %v512_v7  ;;  %v523_v8 = vsub.f32 %v5592_v60, %v509_v53 }
 0x354   :  { %5029 = vpow2.f32 %v531_v5 }
 0x355   :  { %v537_v36 = vmul.f32 1.442695, %v524_v32  ;;  %v535_v11 = vmul.f32 1.442695, %v523_v8 }
 0x356   :  { %v518_v15 = vpop.xlane.xlu1 %517  ;;  %v515_v18 = vpop.xlane.xlu0 %514 }
 0x357   :  { %5031 = vpow2.f32 %v537_v36  ;;  %v526_v20 = vsub.f32 %v5597_v63, %v518_v15  ;;  %v525_v40 = vsub.f32 %v5603_v4, %v515_v18 }
 0x358   :  { %5033 = vpow2.f32 %v535_v11 }
 0x359   :  { %v541_v45 = vmul.f32 1.442695, %v526_v20  ;;  %v539_v21 = vmul.f32 1.442695, %v525_v40 }
 0x35a   :  { %v5653_v25 = vpop.eup %5023 }
 0x35b   :  { %5035 = vpow2.f32 %v541_v45  ;;  %v546_v49 = vsel %vm187_vm0, %v5653_v25, 0.0 }
 0x35c   :  { %v5657_v60 = vpop.eup %5025  ;;  %5037 = vpow2.f32 %v539_v21  ;;  %547 = vadd.xlane.f32.xlu1 %v546_v49 }
 0x35d   :  { %v543_v26 = vsel %vm187_vm0, %v5657_v60, 0.0 }
 0x35e   :  { %544 = vadd.xlane.f32.xlu0 %v543_v26 }
 0x360   :  { %v5661_v63 = vpop.eup %5027 }
 0x361   :  { %v5663_v4 = vpop.eup %5029  ;;  %v552_v30 = vsel %vm187_vm0, %v5661_v63, 0.0 }
 0x362   :  { %553 = vadd.xlane.f32.xlu1 %v552_v30  ;;  %v549_v31 = vsel %vm187_vm0, %v5663_v4, 0.0 }
 0x363   :  { %550 = vadd.xlane.f32.xlu0 %v549_v31 }
 0x364   :  { %v5669_v35 = vpop.eup %5031 }
 0x365   :  { %v5671_v37 = vpop.eup %5033  ;;  %v558_v39 = vsel %vm187_vm0, %v5669_v35, 0.0 }
 0x366   :  { %559 = vadd.xlane.f32.xlu1 %v558_v39  ;;  %v555_v42 = vsel %vm187_vm0, %v5671_v37, 0.0 }
 0x367   :  { %556 = vadd.xlane.f32.xlu0 %v555_v42 }
 0x368   :  { %v5677_v44 = vpop.eup %5035  ;;  %v910_v47 = vpop.xlane.xlu1 %909 }
 0x369   :  { %v5679_v48 = vpop.eup %5037  ;;  %v930_v50 = vsub.f32 %v5609_v9, %v910_v47  ;;  %v564_v54 = vsel %vm187_vm0, %v5677_v44, 0.0 }
 0x36a   :  { %565 = vadd.xlane.f32.xlu1 %v564_v54  ;;  %v561_v57 = vsel %vm187_vm0, %v5679_v48, 0.0  ;;  %v907_v59 = vpop.xlane.xlu0 %906 }
 0x36b   :  { %v939_v61 = vmul.f32 1.442695, %v930_v50  ;;  %562 = vadd.xlane.f32.xlu0 %v561_v57  ;;  %v929_v62 = vsub.f32 %v5611_v13, %v907_v59 }
 0x36c   :  { %v916_v1 = vpop.xlane.xlu1 %915 }
 0x36d   :  { %5039 = vpow2.f32 %v939_v61  ;;  %v937_v2 = vmul.f32 1.442695, %v929_v62  ;;  %v932_v3 = vsub.f32 %v5615_v19, %v916_v1 }
 0x36e   :  { %v913_v51 = vpop.xlane.xlu0 %912 }
 0x36f   :  { %5041 = vpow2.f32 %v937_v2  ;;  %v943_v9 = vmul.f32 1.442695, %v932_v3  ;;  %v931_v5 = vsub.f32 %v5619_v22, %v913_v51 }
 0x370   :  { %v922_v7 = vpop.xlane.xlu1 %921 }
 0x371   :  { %5043 = vpow2.f32 %v943_v9  ;;  %v941_v53 = vmul.f32 1.442695, %v931_v5  ;;  %v934_v32 = vsub.f32 %v5623_v29, %v922_v7 }
 0x372   :  { %v919_v8 = vpop.xlane.xlu0 %918 }
 0x373   :  { %5045 = vpow2.f32 %v941_v53  ;;  %v947_v36 = vmul.f32 1.442695, %v934_v32  ;;  %v933_v13 = vsub.f32 %v5627_v33, %v919_v8 }
 0x374   :  { %v928_v11 = vpop.xlane.xlu1 %927 }
 0x375   :  { %5047 = vpow2.f32 %v947_v36  ;;  %v945_v15 = vmul.f32 1.442695, %v933_v13  ;;  %v936_v19 = vsub.f32 %v5631_v38, %v928_v11 }
 0x376   :  { %v925_v18 = vpop.xlane.xlu0 %924 }
 0x377   :  { %5049 = vpow2.f32 %v945_v15  ;;  %v951_v20 = vmul.f32 1.442695, %v936_v19  ;;  %v935_v22 = vsub.f32 %v5635_v43, %v925_v18 }
 0x378   :  { %v5693_v40 = vpop.permute.xlu1 %1031 }
 0x379   :  { %5051 = vpow2.f32 %v951_v20  ;;  %v949_v45 = vmul.f32 1.442695, %v935_v22  ;;  %5000 = vmatprep.subr.mxu1 %v5693_v40 }
 0x37a   :  { %v5696_v29 = vpop.eup %5039  ;;  %5008 = vmatpush3.msra.mxu1 %v5693_v40  ;;  %v5699_v33 = vpop.permute.xlu0 %1029 }
 0x37b   :  { %5053 = vpow2.f32 %v949_v45  ;;  %5001 = vmatprep.subr.mxu1 %v5699_v33  ;;  %v956_v38 = vsel %vm187_vm0, %v5696_v29, 0.0 }
 0x37c   :  { %v5704_v21 = vpop.eup %5041  ;;  %957 = vadd.xlane.f32.xlu1 %v956_v38  ;;  %5009 = vmatpush3.msra.mxu1 %v5699_v33 }
 0x37d   :  { %v953_v43 = vsel %vm187_vm0, %v5704_v21, 0.0 }
 0x37e   :  { %v5709_v49 = vpop.eup %5043  ;;  %954 = vadd.xlane.f32.xlu0 %v953_v43 }
 0x37f   :  { %v962_v26 = vsel %vm187_vm0, %v5709_v49, 0.0 }
 0x380   :  { %v5713_v30 = vpop.eup %5045  ;;  %963 = vadd.xlane.f32.xlu1 %v962_v26 }
 0x381   :  { %v959_v31 = vsel %vm187_vm0, %v5713_v30, 0.0 }
 0x382   :  { %v5717_v39 = vpop.eup %5047  ;;  %960 = vadd.xlane.f32.xlu0 %v959_v31 }
 0x383   :  { %v968_v42 = vsel %vm187_vm0, %v5717_v39, 0.0 }
 0x384   :  { %v5721_v47 = vpop.eup %5049  ;;  %969 = vadd.xlane.f32.xlu1 %v968_v42 }
 0x385   :  { %v965_v50 = vsel %vm187_vm0, %v5721_v47, 0.0 }
 0x386   :  { %v5725_v54 = vpop.eup %5051  ;;  %966 = vadd.xlane.f32.xlu0 %v965_v50 }
 0x387   :  { %v974_v57 = vsel %vm187_vm0, %v5725_v54, 0.0 }
 0x388   :  { %v5729_v59 = vpop.eup %5053  ;;  %975 = vadd.xlane.f32.xlu1 %v974_v57 }
 0x389   :  { %v971_v61 = vsel %vm187_vm0, %v5729_v59, 0.0 }
 0x38a   :  { %972 = vadd.xlane.f32.xlu0 %v971_v61 }
 0x399   :  { %1027 = vrot.lane.b32.xlu1 %v5434_v55, %s5228_s30 }
 0x3a0   :  { %1025 = vrot.lane.b32.xlu0 %v5442_v56, %s5228_s30 }
 0x3e5   :  { %v548_v62 = vpop.xlane.xlu1 %547 }
 0x3e6   :  { %5055 = vrcp.f32 %v548_v62 }
 0x3e7   :  { %v545_v1 = vpop.xlane.xlu0 %544 }
 0x3e8   :  { %5057 = vrcp.f32 %v545_v1 }
 0x3eb   :  { %v554_v2 = vpop.xlane.xlu1 %553 }
 0x3ec   :  { %5059 = vrcp.f32 %v554_v2  ;;  %v551_v3 = vpop.xlane.xlu0 %550 }
 0x3ed   :  { %5061 = vrcp.f32 %v551_v3 }
 0x3ef   :  { %v560_v51 = vpop.xlane.xlu1 %559 }
 0x3f0   :  { %5063 = vrcp.f32 %v560_v51  ;;  %v557_v9 = vpop.xlane.xlu0 %556 }
 0x3f1   :  { %5065 = vrcp.f32 %v557_v9 }
 0x3f3   :  { %v5056_v5 = vpop.eup %5055  ;;  %v566_v7 = vpop.xlane.xlu1 %565 }
 0x3f4   :  { %v576_v53 = vmul.f32 %v5056_v5, %v548_v62  ;;  %5067 = vrcp.f32 %v566_v7  ;;  %v563_v55 = vpop.xlane.xlu0 %562 }
 0x3f5   :  { %v5058_v32 = vpop.eup %5057  ;;  %5069 = vrcp.f32 %v563_v55 }
 0x3f6   :  { %v584_v56 = vsub.f32 2.0, %v576_v53  ;;  %v575_v8 = vmul.f32 %v5058_v32, %v545_v1 }
 0x3f8   :  { %v583_v36 = vsub.f32 2.0, %v575_v8  ;;  %v592_v11 = vmul.f32 %v5056_v5, %v584_v56 }
 0x3f9   :  { %v5060_v13 = vpop.eup %5059 }
 0x3fa   :  { %v5062_v15 = vpop.eup %5061  ;;  %v591_v19 = vmul.f32 %v5058_v32, %v583_v36  ;;  %v578_v18 = vmul.f32 %v5060_v13, %v554_v2  ;;  %v600_v43 = vmul.f32 %v5653_v25, %v592_v11 }
 0x3fb   :  { %v577_v20 = vmul.f32 %v5062_v15, %v551_v3 }
 0x3fc   :  { %v586_v22 = vsub.f32 2.0, %v578_v18  ;;  %v599_v45 = vmul.f32 %v5657_v60, %v591_v19 }
 0x3fd   :  { %v5064_v38 = vpop.eup %5063  ;;  %v585_v26 = vsub.f32 2.0, %v577_v20 }
 0x3fe   :  { %v5066_v31 = vpop.eup %5065  ;;  %v594_v42 = vmul.f32 %v5060_v13, %v586_v22  ;;  %v580_v50 = vmul.f32 %v5064_v38, %v560_v51  ;;  %4596 = vmatprep.mubr.msk.f32.mxu0 %vm187_vm0, %v599_v45  ;;  %v328_v22 = vld [vmem:[%s6864_s4 + $0x18] sm:$0xff] }
 0x3ff   :  { %v593_v57 = vmul.f32 %v5062_v15, %v585_v26  ;;  %v579_v61 = vmul.f32 %v5066_v31, %v557_v9  ;;  %4597 = vmatmul.mubr.msk.f32.vlgmr.msra.gmra.mxu0 %vm187_vm0, %v600_v43 }
 0x400   :  { %v588_v62 = vsub.f32 2.0, %v580_v50  ;;  %4637 = vmatpush3.msra.mxu0 %v5524_v24  ;;  %v602_v1 = vmul.f32 %v5661_v63, %v594_v42 }
 0x401   :  { %v5068_v2 = vpop.eup %5067  ;;  %v587_v60 = vsub.f32 2.0, %v579_v61  ;;  %4638 = vmatprep.subr.mxu0 %v5533_v27  ;;  %v601_v25 = vmul.f32 %v5663_v4, %v593_v57 }
 0x402   :  { %v5070_v3 = vpop.eup %5069  ;;  %v596_v5 = vmul.f32 %v5064_v38, %v588_v62  ;;  %v582_v51 = vmul.f32 %v5068_v2, %v566_v7  ;;  %4639 = vmatpush3.msra.mxu0 %v5533_v27 }
 0x403   :  { %v595_v53 = vmul.f32 %v5066_v31, %v587_v60  ;;  %v581_v9 = vmul.f32 %v5070_v3, %v563_v55  ;;  %4599 = vmatprep.mubr.msk.f32.mxu0 %vm187_vm0, %v601_v25  ;;  %4640 = vmatprep.subr.mxu0 %v5541_v28 }
 0x404   :  { %v590_v24 = vsub.f32 2.0, %v582_v51  ;;  %4600 = vmatmul.mubr.msk.f32.gmra.mxu0 %vm187_vm0, %v602_v1  ;;  %v604_v63 = vmul.f32 %v5669_v35, %v596_v5 }
 0x405   :  { %v589_v32 = vsub.f32 2.0, %v581_v9  ;;  %4641 = vmatpush3.msra.mxu0 %v5541_v28  ;;  %v958_v4 = vpop.xlane.xlu1 %957  ;;  %v603_v56 = vmul.f32 %v5671_v37, %v595_v53 }
 0x406   :  { %v598_v7 = vmul.f32 %v5068_v2, %v590_v24  ;;  %4642 = vmatprep.subr.mxu0 %v5517_v23  ;;  %5071 = vrcp.f32 %v958_v4 }
 0x407   :  { %v597_v27 = vmul.f32 %v5070_v3, %v589_v32  ;;  %4643 = vmatpush3.msra.mxu0 %v5517_v23  ;;  %4602 = vmatprep.mubr.msk.f32.mxu0 %vm187_vm0, %v603_v56  ;;  %v955_v55 = vpop.xlane.xlu0 %954 }
 0x408   :  { %4644 = vmatprep.subr.mxu0 %v5693_v40  ;;  %4603 = vmatmul.mubr.msk.f32.gmra.mxu0 %vm187_vm0, %v604_v63  ;;  %5073 = vrcp.f32 %v955_v55  ;;  %v606_v28 = vmul.f32 %v5677_v44, %v598_v7 }
 0x409   :  { %4645 = vmatpush3.msra.mxu0 %v5693_v40  ;;  %v964_v35 = vpop.xlane.xlu1 %963  ;;  %v605_v37 = vmul.f32 %v5679_v48, %v597_v27 }
 0x40a   :  { %4646 = vmatprep.subr.mxu0 %v5699_v33  ;;  %5075 = vrcp.f32 %v964_v35 }
 0x40b   :  { %4647 = vmatpush3.msra.mxu0 %v5699_v33  ;;  %4605 = vmatprep.mubr.msk.f32.mxu0 %vm187_vm0, %v605_v37  ;;  %v961_v23 = vpop.xlane.xlu0 %960 }
 0x40c   :  { %4606 = vmatmul.mubr.msk.f32.gmra.mxu0 %vm187_vm0, %v606_v28  ;;  %5077 = vrcp.f32 %v961_v23 }
 0x40d   :  { %v970_v8 = vpop.xlane.xlu1 %969 }
 0x40e   :  { %5079 = vrcp.f32 %v970_v8 }
 0x40f   :  { %v967_v36 = vpop.xlane.xlu0 %966 }
 0x410   :  { %5081 = vrcp.f32 %v967_v36 }
 0x411   :  { %v976_v44 = vpop.xlane.xlu1 %975 }
 0x412   :  { %5083 = vrcp.f32 %v976_v44 }
 0x413   :  { %v5072_v40 = vpop.eup %5071  ;;  %v973_v13 = vpop.xlane.xlu0 %972 }
 0x414   :  { %v986_v48 = vmul.f32 %v5072_v40, %v958_v4  ;;  %5085 = vrcp.f32 %v973_v13 }
 0x415   :  { %v5074_v11 = vpop.eup %5073  ;;  %v1028_v15 = vpop.permute.xlu1 %1027 }
 0x416   :  { %v994_v19 = vsub.f32 2.0, %v986_v48  ;;  %v985_v33 = vmul.f32 %v5074_v11, %v955_v55  ;;  %4648 = vmatprep.subr.mxu0 %v1028_v15  ;;  %5002 = vmatprep.subr.mxu1 %v1028_v15 }
 0x417   :  { %v5076_v18 = vpop.eup %5075  ;;  %4649 = vmatpush3.msra.mxu0 %v1028_v15  ;;  %5010 = vmatpush3.msra.mxu1 %v1028_v15  ;;  %v1026_v20 = vpop.permute.xlu0 %1025 }
 0x418   :  { %v993_v45 = vsub.f32 2.0, %v985_v33  ;;  %v988_v38 = vmul.f32 %v5076_v18, %v964_v35  ;;  %4650 = vmatprep.subr.mxu0 %v1026_v20  ;;  %5003 = vmatprep.subr.mxu1 %v1026_v20  ;;  %v1002_v26 = vmul.f32 %v5072_v40, %v994_v19 }
 0x419   :  { %v5078_v43 = vpop.eup %5077  ;;  %4651 = vmatpush3.msra.mxu0 %v1026_v20  ;;  %5011 = vmatpush3.msra.mxu1 %v1026_v20 }
 0x41a   :  { %v1001_v31 = vmul.f32 %v5074_v11, %v993_v45  ;;  %v996_v42 = vsub.f32 2.0, %v988_v38  ;;  %v987_v50 = vmul.f32 %v5078_v43, %v961_v23  ;;  %4684 = vmatprep.subr.mxu1 %v328_v22  ;;  %v1010_v60 = vmul.f32 %v5696_v29, %v1002_v26 }
 0x41b   :  { %v5080_v57 = vpop.eup %5079 }
 0x41c   :  { %v995_v61 = vsub.f32 2.0, %v987_v50  ;;  %v990_v62 = vmul.f32 %v5080_v57, %v970_v8  ;;  %v1009_v1 = vmul.f32 %v5704_v21, %v1001_v31  ;;  %v1004_v25 = vmul.f32 %v5076_v18, %v996_v42  ;;  %v330_v8 = vld [vmem:[%s6864_s4 + $0x28] sm:$0xff] }
 0x41d   :  { %v5082_v2 = vpop.eup %5081 }
 0x41e   :  { %v1003_v3 = vmul.f32 %v5078_v43, %v995_v61  ;;  %v998_v5 = vsub.f32 2.0, %v990_v62  ;;  %v989_v51 = vmul.f32 %v5082_v2, %v967_v36  ;;  %4652 = vmatprep.mubr.msk.f32.mxu0 %vm187_vm0, %v1009_v1  ;;  %v1012_v21 = vmul.f32 %v5709_v49, %v1004_v25  ;;  %v327_v49 = vld [vmem:[%s6864_s4 + $0x10] sm:$0xff]  ;;  %v329_v36 = vld [vmem:[%s6864_s4 + $0x20] sm:$0xff] }
 0x41f   :  { %v5084_v53 = vpop.eup %5083  ;;  %4653 = vmatmul.mubr.msk.f32.vlgmr.msra.gmra.mxu0 %vm187_vm0, %v1010_v60  ;;  %v4112_v1 = vld [vmem:[%s6862_s2 + $0x3] ss:$0 sm:$0xff] }
 0x420   :  { %v997_v9 = vsub.f32 2.0, %v989_v51  ;;  %v992_v24 = vmul.f32 %v5084_v53, %v976_v44  ;;  %v1011_v63 = vmul.f32 %v5713_v30, %v1003_v3  ;;  %v1006_v4 = vmul.f32 %v5080_v57, %v998_v5 }
 0x421   :  { %v5086_v32 = vpop.eup %5085 }
 0x422   :  { %v1005_v56 = vmul.f32 %v5082_v2, %v997_v9  ;;  %v1000_v7 = vsub.f32 2.0, %v992_v24  ;;  %v991_v29 = vmul.f32 %v5086_v32, %v973_v13  ;;  %4655 = vmatprep.mubr.msk.f32.mxu0 %vm187_vm0, %v1011_v63  ;;  %v1014_v28 = vmul.f32 %v5717_v39, %v1006_v4  ;;  %v326_v39 = vld [vmem:[%s6864_s4 + $0x8] sm:$0xff] }
 0x423   :  { %4656 = vmatmul.mubr.msk.f32.gmra.mxu0 %vm187_vm0, %v1012_v21 }
 0x424   :  { %v999_v27 = vsub.f32 2.0, %v991_v29  ;;  %v1013_v55 = vmul.f32 %v5721_v47, %v1005_v56  ;;  %v1008_v35 = vmul.f32 %v5084_v53, %v1000_v7  ;;  %v325_v47 = vld [vmem:[%s6864_s4] sm:$0xff] }
 0x426   :  { %v1007_v37 = vmul.f32 %v5086_v32, %v999_v27  ;;  %4658 = vmatprep.mubr.msk.f32.mxu1 %vm187_vm0, %v1013_v55  ;;  %v1016_v23 = vmul.f32 %v5725_v54, %v1008_v35  ;;  %v332_v54 = vld [vmem:[%s6864_s4 + $0x38] sm:$0xff] }
 0x427   :  { %4659 = vmatmul.mubr.msk.f32.vlgmr.msra.gmra.mxu1 %vm187_vm0, %v1014_v28  ;;  %4664 = vmatprep.subr.mxu0 %v332_v54 }
 0x428   :  { %v1015_v30 = vmul.f32 %v5729_v59, %v1007_v37  ;;  %4685 = vmatpush3.msra.mxu1 %v328_v22  ;;  %v331_v59 = vld [vmem:[%s6864_s4 + $0x30] sm:$0xff]  ;;  %4665 = vmatpush3.msra.mxu0 %v332_v54 }
 0x429   :  { %4686 = vmatprep.subr.mxu1 %v327_v49  ;;  %4666 = vmatprep.subr.mxu0 %v331_v59 }
 0x42a   :  { %4661 = vmatprep.mubr.msk.f32.mxu1 %vm187_vm0, %v1015_v30  ;;  %4687 = vmatpush3.msra.mxu1 %v327_v49 }
 0x42b   :  { %4662 = vmatmul.mubr.msk.f32.gmra.mxu1 %vm187_vm0, %v1016_v23  ;;  %4688 = vmatprep.subr.mxu1 %v326_v39 }
 0x42c   :  { %4689 = vmatpush3.msra.mxu1 %v326_v39  ;;  %4667 = vmatpush3.msra.mxu0 %v331_v59 }
 0x42d   :  { %4690 = vmatprep.subr.mxu1 %v325_v47  ;;  %4668 = vmatprep.subr.mxu0 %v330_v8 }
 0x42e   :  { %4691 = vmatpush3.msra.mxu1 %v325_v47  ;;  %4669 = vmatpush3.msra.mxu0 %v330_v8 }
 0x42f   :  { %4670 = vmatprep.subr.mxu0 %v329_v36 }
 0x430   :  { %4671 = vmatpush3.msra.mxu0 %v329_v36 }
 0x4bf   :  { %v4598_v44 = vpop.f32.mrf.mxu0 }
 0x4c1   :  { %v697_v40 = vpop.f32.mrf.mxu0 }
 0x4c2   :  { %4692 = vmatprep.mubr.msk.f32.mxu1 %vm357_vm1, %v697_v40 }
 0x4c3   :  { %4693 = vmatmul.mubr.msk.f32.vlgmr.msra.gmra.mxu1 %vm357_vm1, %v4598_v44 }
 0x4c4   :  { %v4601_v13 = vpop.f32.mrf.mxu0 }
 0x4c6   :  { %v707_v48 = vpop.f32.mrf.mxu0 }
 0x4c7   :  { %4695 = vmatprep.mubr.msk.f32.mxu1 %vm357_vm1, %v707_v48 }
 0x4c8   :  { %v4604_v11 = vpop.f32.mrf.mxu0  ;;  %4696 = vmatmul.mubr.msk.f32.gmra.mxu1 %vm357_vm1, %v4601_v13 }
 0x4ca   :  { %v717_v15 = vpop.f32.mrf.mxu0 }
 0x4cb   :  { %4698 = vmatprep.mubr.msk.f32.mxu1 %vm357_vm1, %v717_v15 }
 0x4cc   :  { %v4607_v19 = vpop.f32.mrf.mxu0  ;;  %4699 = vmatmul.mubr.msk.f32.gmra.mxu1 %vm357_vm1, %v4604_v11 }
 0x4ce   :  { %v727_v33 = vpop.f32.mrf.mxu0 }
 0x4cf   :  { %4701 = vmatprep.mubr.msk.f32.mxu1 %vm357_vm1, %v727_v33 }
 0x4d0   :  { %4702 = vmatmul.mubr.msk.f32.gmra.mxu1 %vm357_vm1, %v4607_v19 }
 0x4df   :  { %v4654_v18 = vpop.f32.mrf.mxu0 }
 0x4e1   :  { %v1139_v20 = vpop.f32.mrf.mxu0 }
 0x4e2   :  { %4672 = vmatprep.mubr.msk.f32.mxu0 %vm357_vm1, %v1139_v20 }
 0x4e3   :  { %v4657_v22 = vpop.f32.mrf.mxu0  ;;  %4673 = vmatmul.mubr.msk.f32.vlgmr.msra.gmra.mxu0 %vm357_vm1, %v4654_v18 }
 0x4e5   :  { %v1149_v45 = vpop.f32.mrf.mxu0 }
 0x4e6   :  { %4675 = vmatprep.mubr.msk.f32.mxu0 %vm357_vm1, %v1149_v45 }
 0x4e7   :  { %v4660_v38 = vpop.f32.mrf.mxu1  ;;  %4676 = vmatmul.mubr.msk.f32.gmra.mxu0 %vm357_vm1, %v4657_v22 }
 0x4e9   :  { %v1159_v43 = vpop.f32.mrf.mxu1 }
 0x4ea   :  { %4678 = vmatprep.mubr.msk.f32.mxu0 %vm357_vm1, %v1159_v43 }
 0x4eb   :  { %v4663_v26 = vpop.f32.mrf.mxu1  ;;  %4679 = vmatmul.mubr.msk.f32.gmra.mxu0 %vm357_vm1, %v4660_v38 }
 0x4ed   :  { %v1169_v31 = vpop.f32.mrf.mxu1 }
 0x4ee   :  { %4681 = vmatprep.mubr.msk.f32.mxu0 %vm357_vm1, %v1169_v31 }
 0x4ef   :  { %4682 = vmatmul.mubr.msk.f32.gmra.mxu0 %vm357_vm1, %v4663_v26 }
 0x583   :  { %v4694_v42 = vpop.f32.mrf.mxu1 }
 0x585   :  { %v1397_v50 = vpop.f32.mrf.mxu1 }
 0x588   :  { %v4697_v57 = vpop.f32.mrf.mxu1 }
 0x58a   :  { %v1407_v61 = vpop.f32.mrf.mxu1 }
 0x58c   :  { %v4700_v60 = vpop.f32.mrf.mxu1 }
 0x58e   :  { %v1417_v63 = vpop.f32.mrf.mxu1 }
 0x590   :  { %v4703_v37 = vpop.f32.mrf.mxu1 }
 0x592   :  { %v1427_v36 = vpop.f32.mrf.mxu1 }
 0x5a3   :  { %v4674_v62 = vpop.f32.mrf.mxu0 }
 0x5a4   :  { %v1403_v2 = vadd.f32 %v4694_v42, %v4674_v62 }
 0x5a5   :  { %v1268_v25 = vpop.f32.mrf.mxu0 }
 0x5a6   :  { %v1442_v3 = vadd.f32 %v4112_v1, %v1403_v2  ;;  %v1398_v5 = vadd.f32 %v1397_v50, %v1268_v25 }
 0x5a7   :  { %v4677_v51 = vpop.f32.mrf.mxu0 }
 0x5a8   :  { %v1441_v53 = vadd.f32 %v4112_v1, %v1398_v5  ;;  %v1413_v9 = vadd.f32 %v4697_v57, %v4677_v51  ;;  %v1450_v24 = vadd.f32 %v1442_v3, %v5351_v46 }
 0x5a9   :  { %v1278_v32 = vpop.f32.mrf.mxu0 }
 0x5aa   :  { %v1444_v4 = vadd.f32 %v4112_v1, %v1413_v9  ;;  %v1408_v21 = vadd.f32 %v1407_v61, %v1278_v32  ;;  %v1462_v56 = vsel %vm187_vm0, %v1450_v24, 0.0  ;;  %v1449_v7 = vadd.f32 %v1441_v53, %v5346_v41 }
 0x5ab   :  { %1463 = vadd.xlane.f32.xlu0 %v1462_v56  ;;  %v4680_v29 = vpop.f32.mrf.mxu0 }
 0x5ac   :  { %v1443_v27 = vadd.f32 %v4112_v1, %v1408_v21  ;;  %v1423_v55 = vadd.f32 %v4700_v60, %v4680_v29  ;;  %v1459_v28 = vsel %vm187_vm0, %v1449_v7, 0.0  ;;  %v1452_v35 = vadd.f32 %v1444_v4, %v5361_v58 }
 0x5ad   :  { %1460 = vadd.xlane.f32.xlu1 %v1459_v28  ;;  %v1288_v49 = vpop.f32.mrf.mxu0 }
 0x5ae   :  { %v1446_v46 = vadd.f32 %v4112_v1, %v1423_v55  ;;  %v1418_v30 = vadd.f32 %v1417_v63, %v1288_v49  ;;  %v1451_v23 = vadd.f32 %v1443_v27, %v5356_v52  ;;  %v1468_v47 = vsel %vm187_vm0, %v1452_v35, 0.0 }
 0x5af   :  { %v4683_v39 = vpop.f32.mrf.mxu0 }
 0x5b0   :  { %v1445_v54 = vadd.f32 %v4112_v1, %v1418_v30  ;;  %v1433_v41 = vadd.f32 %v4703_v37, %v4683_v39  ;;  %v1465_v59 = vsel %vm187_vm0, %v1451_v23, 0.0  ;;  %v1454_v8 = vadd.f32 %v1446_v46, %v5371_v6  ;;  %v4122_v30 = vld [vmem:[%s6864_s4 + $0x78] sm:$0xff]  ;;  %v4120_v39 = vld [vmem:[%s6864_s4 + $0x68] sm:$0xff] }
 0x5b1   :  { %1469 = vadd.xlane.f32.xlu1 %v1468_v47  ;;  %1466 = vadd.xlane.f32.xlu0 %v1465_v59  ;;  %v1298_v58 = vpop.f32.mrf.mxu0  ;;  %v4119_v47 = vld [vmem:[%s6864_s4 + $0x60] sm:$0xff]  ;;  %v4116_v59 = vld [vmem:[%s6864_s4 + $0x48] sm:$0xff] }
 0x5b2   :  { %v1448_v44 = vadd.f32 %v4112_v1, %v1433_v41  ;;  %v1428_v40 = vadd.f32 %v1427_v36, %v1298_v58  ;;  %v1453_v13 = vadd.f32 %v1445_v54, %v5366_v0  ;;  %v1474_v52 = vsel %vm187_vm0, %v1454_v8, 0.0  ;;  %4704 = vmatprep.subr.mxu0 %v4122_v30  ;;  %v4118_v54 = vld [vmem:[%s6864_s4 + $0x58] sm:$0xff]  ;;  %v4117_v41 = vld [vmem:[%s6864_s4 + $0x50] sm:$0xff] }
 0x5b3   :  { %4705 = vmatpush3.msra.mxu0 %v4122_v30  ;;  %v4139_v36 = vld [vmem:[%s6864_s4 + $0xb8] sm:$0xff]  ;;  %v4138_v58 = vld [vmem:[%s6864_s4 + $0xb0] sm:$0xff] }
 0x5b4   :  { %v1447_v48 = vadd.f32 %v4112_v1, %v1428_v40  ;;  %v1471_v11 = vsel %vm187_vm0, %v1453_v13, 0.0  ;;  %v1456_v15 = vadd.f32 %v1448_v44, %v5381_v14  ;;  %4732 = vmatprep.subr.mxu1 %v4139_v36  ;;  %v4137_v44 = vld [vmem:[%s6864_s4 + $0xa8] sm:$0xff]  ;;  %v4136_v40 = vld [vmem:[%s6864_s4 + $0xa0] sm:$0xff] }
 0x5b5   :  { %1475 = vadd.xlane.f32.xlu1 %v1474_v52  ;;  %1472 = vadd.xlane.f32.xlu0 %v1471_v11 }
 0x5b6   :  { %v1455_v19 = vadd.f32 %v1447_v48, %v5376_v12  ;;  %v1480_v6 = vsel %vm187_vm0, %v1456_v15, 0.0  ;;  %4733 = vmatpush3.msra.mxu1 %v4139_v36 }
 0x5b7   :  { %4734 = vmatprep.subr.mxu1 %v4138_v58 }
 0x5b8   :  { %v1477_v33 = vsel %vm187_vm0, %v1455_v19, 0.0  ;;  %4735 = vmatpush3.msra.mxu1 %v4138_v58 }
 0x5b9   :  { %1481 = vadd.xlane.f32.xlu1 %v1480_v6  ;;  %1478 = vadd.xlane.f32.xlu0 %v1477_v33 }
 0x5ba   :  { %4736 = vmatprep.subr.mxu1 %v4137_v44 }
 0x5bb   :  { %4737 = vmatpush3.msra.mxu1 %v4137_v44 }
 0x5bc   :  { %4738 = vmatprep.subr.mxu1 %v4136_v40 }
 0x5bd   :  { %4739 = vmatpush3.msra.mxu1 %v4136_v40 }
 0x634   :  { %v1464_v18 = vpop.xlane.xlu0 %1463 }
 0x635   :  { %v1485_v20 = vmul.f32 0.015625, %v1464_v18 }
 0x636   :  { %v1461_v0 = vpop.xlane.xlu1 %1460 }
 0x637   :  { %v5839_v22 = vsub.f32 %v1450_v24, %v1485_v20  ;;  %v1484_v45 = vmul.f32 0.015625, %v1461_v0 }
 0x639   :  { %v5841_v38 = vsub.f32 %v1449_v7, %v1484_v45  ;;  %v1501_v14 = vmul.f32 %v5839_v22, %v5839_v22 }
 0x63a   :  { %v1470_v43 = vpop.xlane.xlu1 %1469  ;;  %v1467_v26 = vpop.xlane.xlu0 %1466 }
 0x63b   :  { %v1487_v12 = vmul.f32 0.015625, %v1470_v43  ;;  %v1486_v31 = vmul.f32 0.015625, %v1467_v26  ;;  %v1511_v42 = vsel %vm187_vm0, %v1501_v14, 0.0  ;;  %v1500_v50 = vmul.f32 %v5841_v38, %v5841_v38 }
 0x63c   :  { %1512 = vadd.xlane.f32.xlu1 %v1511_v42 }
 0x63d   :  { %v5848_v57 = vsub.f32 %v1452_v35, %v1487_v12  ;;  %v5850_v61 = vsub.f32 %v1451_v23, %v1486_v31  ;;  %v1508_v62 = vsel %vm187_vm0, %v1500_v50, 0.0  ;;  %v4121_v23 = vld [vmem:[%s6864_s4 + $0x70] sm:$0xff] }
 0x63e   :  { %v1476_v1 = vpop.xlane.xlu1 %1475  ;;  %v1473_v2 = vpop.xlane.xlu0 %1472  ;;  %1509 = vadd.xlane.f32.xlu0 %v1508_v62  ;;  %4706 = vmatprep.subr.mxu0 %v4121_v23 }
 0x63f   :  { %v1489_v60 = vmul.f32 0.015625, %v1476_v1  ;;  %v1488_v25 = vmul.f32 0.015625, %v1473_v2  ;;  %v1503_v3 = vmul.f32 %v5848_v57, %v5848_v57  ;;  %v1502_v5 = vmul.f32 %v5850_v61, %v5850_v61  ;;  %4707 = vmatpush3.msra.mxu0 %v4121_v23 }
 0x640   :  { %4708 = vmatprep.subr.mxu0 %v4120_v39 }
 0x641   :  { %v5857_v51 = vsub.f32 %v1454_v8, %v1489_v60  ;;  %v5859_v53 = vsub.f32 %v1453_v13, %v1488_v25  ;;  %v1517_v9 = vsel %vm187_vm0, %v1503_v3, 0.0  ;;  %v1514_v24 = vsel %vm187_vm0, %v1502_v5, 0.0  ;;  %4709 = vmatpush3.msra.mxu0 %v4120_v39  ;;  %v4115_v8 = vld [vmem:[%s6864_s4 + $0x40] sm:$0xff]  ;;  %v4135_v13 = vld [vmem:[%s6864_s4 + $0x98] sm:$0xff] }
 0x642   :  { %1518 = vadd.xlane.f32.xlu1 %v1517_v9  ;;  %v1482_v63 = vpop.xlane.xlu1 %1481  ;;  %1515 = vadd.xlane.f32.xlu0 %v1514_v24  ;;  %v1479_v32 = vpop.xlane.xlu0 %1478  ;;  %v4113_v9 = vld [vmem:[%s6862_s2 + $0x6] ss:$0 sm:$0xff] }
 0x643   :  { %v1491_v4 = vmul.f32 0.015625, %v1482_v63  ;;  %v1490_v21 = vmul.f32 0.015625, %v1479_v32  ;;  %v1505_v56 = vmul.f32 %v5857_v51, %v5857_v51  ;;  %v1504_v7 = vmul.f32 %v5859_v53, %v5859_v53  ;;  %4710 = vmatprep.subr.mxu0 %v4119_v47  ;;  %4740 = vmatprep.subr.mxu1 %v4135_v13 }
 0x644   :  { %4711 = vmatpush3.msra.mxu0 %v4119_v47  ;;  %4741 = vmatpush3.msra.mxu1 %v4135_v13 }
 0x645   :  { %v5867_v29 = vsub.f32 %v1456_v15, %v1491_v4  ;;  %v5869_v27 = vsub.f32 %v1455_v19, %v1490_v21  ;;  %v1523_v55 = vsel %vm187_vm0, %v1505_v56, 0.0  ;;  %v1520_v28 = vsel %vm187_vm0, %v1504_v7, 0.0  ;;  %4712 = vmatprep.subr.mxu0 %v4118_v54  ;;  %v4114_v21 = vld [vmem:[%s6862_s2 + $0x7] ss:$0 sm:$0xff] }
 0x646   :  { %1524 = vadd.xlane.f32.xlu1 %v1523_v55  ;;  %1521 = vadd.xlane.f32.xlu0 %v1520_v28 }
 0x647   :  { %v1507_v35 = vmul.f32 %v5867_v29, %v5867_v29  ;;  %v1506_v37 = vmul.f32 %v5869_v27, %v5869_v27  ;;  %4713 = vmatpush3.msra.mxu0 %v4118_v54 }
 0x648   :  { %4714 = vmatprep.subr.mxu0 %v4117_v41 }
 0x649   :  { %v1529_v49 = vsel %vm187_vm0, %v1507_v35, 0.0  ;;  %v1526_v46 = vsel %vm187_vm0, %v1506_v37, 0.0  ;;  %4715 = vmatpush3.msra.mxu0 %v4117_v41 }
 0x64a   :  { %1530 = vadd.xlane.f32.xlu1 %v1529_v49  ;;  %1527 = vadd.xlane.f32.xlu0 %v1526_v46 }
 0x64b   :  { %4716 = vmatprep.subr.mxu0 %v4116_v59 }
 0x64c   :  { %4717 = vmatpush3.msra.mxu0 %v4116_v59 }
 0x64d   :  { %4718 = vmatprep.subr.mxu0 %v4115_v8 }
 0x64e   :  { %4719 = vmatpush3.msra.mxu0 %v4115_v8 }
 0x6c5   :  { %v1513_v48 = vpop.xlane.xlu1 %1512 }
 0x6c6   :  { %v1533_v52 = vmul.f32 0.015625, %v1513_v48  ;;  %v4132_v48 = vld [vmem:[%s6864_s4 + $0x80] sm:$0xff] }
 0x6c7   :  { %v1510_v11 = vpop.xlane.xlu0 %1509 }
 0x6c8   :  { %v1541_v15 = vadd.f32 1e-05, %v1533_v52  ;;  %v1532_v19 = vmul.f32 0.015625, %v1510_v11  ;;  %v4123_v52 = vld [vmem:[%s6862_s2 + $0x4] ss:$0 sm:$0xff] }
 0x6ca   :  { %5087 = vrsqrt.f32 %v1541_v15  ;;  %v1540_v6 = vadd.f32 1e-05, %v1532_v19 }
 0x6cb   :  { %v1519_v33 = vpop.xlane.xlu1 %1518  ;;  %v1516_v18 = vpop.xlane.xlu0 %1515 }
 0x6cc   :  { %5089 = vrsqrt.f32 %v1540_v6  ;;  %v1535_v20 = vmul.f32 0.015625, %v1519_v33  ;;  %v1534_v0 = vmul.f32 0.015625, %v1516_v18 }
 0x6ce   :  { %v1543_v45 = vadd.f32 1e-05, %v1535_v20  ;;  %v1542_v14 = vadd.f32 1e-05, %v1534_v0 }
 0x6cf   :  { %v1525_v43 = vpop.xlane.xlu1 %1524  ;;  %v1522_v26 = vpop.xlane.xlu0 %1521 }
 0x6d0   :  { %5091 = vrsqrt.f32 %v1543_v45  ;;  %v1537_v12 = vmul.f32 0.015625, %v1525_v43  ;;  %v1536_v31 = vmul.f32 0.015625, %v1522_v26 }
 0x6d1   :  { %5093 = vrsqrt.f32 %v1542_v14 }
 0x6d2   :  { %v1545_v42 = vadd.f32 1e-05, %v1537_v12  ;;  %v1544_v50 = vadd.f32 1e-05, %v1536_v31 }
 0x6d3   :  { %v1531_v62 = vpop.xlane.xlu1 %1530  ;;  %v1528_v1 = vpop.xlane.xlu0 %1527 }
 0x6d4   :  { %5095 = vrsqrt.f32 %v1545_v42  ;;  %v1539_v2 = vmul.f32 0.015625, %v1531_v62  ;;  %v1538_v60 = vmul.f32 0.015625, %v1528_v1 }
 0x6d5   :  { %5097 = vrsqrt.f32 %v1544_v50 }
 0x6d6   :  { %v1547_v25 = vadd.f32 1e-05, %v1539_v2  ;;  %v1546_v3 = vadd.f32 1e-05, %v1538_v60 }
 0x6d7   :  { %v5088_v5 = vpop.eup %5087 }
 0x6d8   :  { %v1557_v24 = vmul.f32 %v5088_v5, %v5839_v22  ;;  %5099 = vrsqrt.f32 %v1547_v25 }
 0x6d9   :  { %v5090_v63 = vpop.eup %5089  ;;  %5101 = vrsqrt.f32 %v1546_v3 }
 0x6da   :  { %v1556_v32 = vmul.f32 %v5090_v63, %v5841_v38  ;;  %v1569_v4 = vmul.f32 %v4113_v9, %v1557_v24  ;;  %v4140_v24 = vld [vmem:[%s6862_s2 + $0x5] ss:$0 sm:$0xff] }
 0x6dc   :  { %v1568_v56 = vmul.f32 %v4113_v9, %v1556_v32  ;;  %v5929_v37 = vadd.f32 %v4114_v21, %v1569_v4 }
 0x6dd   :  { %v5092_v7 = vpop.eup %5091 }
 0x6de   :  { %v5094_v55 = vpop.eup %5093  ;;  %v5926_v28 = vadd.f32 %v4114_v21, %v1568_v56  ;;  %v1559_v35 = vmul.f32 %v5092_v7, %v5848_v57 }
 0x6df   :  { %v1558_v22 = vmul.f32 %v5094_v55, %v5850_v61 }
 0x6e0   :  { %4720 = vmatprep.mubr.msk.f32.mxu0 %vm187_vm0, %v5926_v28  ;;  %v1571_v38 = vmul.f32 %v4113_v9, %v1559_v35 }
 0x6e1   :  { %v5096_v49 = vpop.eup %5095  ;;  %4721 = vmatmul.mubr.msk.f32.vlgmr.msra.gmra.mxu0 %vm187_vm0, %v5929_v37  ;;  %v1570_v46 = vmul.f32 %v4113_v9, %v1558_v22 }
 0x6e2   :  { %v5098_v30 = vpop.eup %5097  ;;  %v5936_v23 = vadd.f32 %v4114_v21, %v1571_v38  ;;  %v1561_v39 = vmul.f32 %v5096_v49, %v5857_v51 }
 0x6e3   :  { %v5939_v47 = vadd.f32 %v4114_v21, %v1570_v46  ;;  %v1560_v57 = vmul.f32 %v5098_v30, %v5859_v53 }
 0x6e4   :  { %v1573_v54 = vmul.f32 %v4113_v9, %v1561_v39 }
 0x6e5   :  { %v5100_v61 = vpop.eup %5099  ;;  %4723 = vmatprep.mubr.msk.f32.mxu0 %vm187_vm0, %v5939_v47  ;;  %v1572_v41 = vmul.f32 %v4113_v9, %v1560_v57 }
 0x6e6   :  { %v5102_v59 = vpop.eup %5101  ;;  %4724 = vmatmul.mubr.msk.f32.gmra.mxu0 %vm187_vm0, %v5936_v23  ;;  %v5946_v8 = vadd.f32 %v4114_v21, %v1573_v54  ;;  %v1563_v36 = vmul.f32 %v5100_v61, %v5867_v29  ;;  %v4134_v29 = vld [vmem:[%s6864_s4 + $0x90] sm:$0xff] }
 0x6e7   :  { %v5949_v58 = vadd.f32 %v4114_v21, %v1572_v41  ;;  %v1562_v51 = vmul.f32 %v5102_v59, %v5869_v27  ;;  %4742 = vmatprep.subr.mxu1 %v4134_v29  ;;  %v4133_v27 = vld [vmem:[%s6864_s4 + $0x88] sm:$0xff] }
 0x6e8   :  { %v1575_v44 = vmul.f32 %v4113_v9, %v1563_v36  ;;  %4743 = vmatpush3.msra.mxu1 %v4134_v29 }
 0x6e9   :  { %4726 = vmatprep.mubr.msk.f32.mxu0 %vm187_vm0, %v5949_v58  ;;  %v1574_v53 = vmul.f32 %v4113_v9, %v1562_v51  ;;  %4744 = vmatprep.subr.mxu1 %v4133_v27 }
 0x6ea   :  { %4727 = vmatmul.mubr.msk.f32.gmra.mxu0 %vm187_vm0, %v5946_v8  ;;  %v5956_v40 = vadd.f32 %v4114_v21, %v1575_v44  ;;  %4745 = vmatpush3.msra.mxu1 %v4133_v27 }
 0x6eb   :  { %v5958_v13 = vadd.f32 %v4114_v21, %v1574_v53  ;;  %4746 = vmatprep.subr.mxu1 %v4132_v48 }
 0x6ec   :  { %4747 = vmatpush3.msra.mxu1 %v4132_v48 }
 0x6ed   :  { %4729 = vmatprep.mubr.msk.f32.mxu0 %vm187_vm0, %v5958_v13 }
 0x6ee   :  { %4730 = vmatmul.mubr.msk.f32.gmra.mxu0 %vm187_vm0, %v5956_v40 }
 0x6ef   :  { %2138 = vmatprep.mubr.f32.mxu0 %v5225_v10 }
 0x7a1   :  { %v4722_v11 = vpop.f32.mrf.mxu0 }
 0x7a2   :  { %v1698_v15 = vadd.f32 %v4722_v11, %v4123_v52 }
 0x7a3   :  { %v1692_v19 = vpop.f32.mrf.mxu0 }
 0x7a4   :  { %v1693_v6 = vadd.f32 %v4123_v52, %v1692_v19  ;;  %v1732_v20 = vmax.f32 %v1698_v15, 0.0 }
 0x7a6   :  { %v1731_v33 = vmax.f32 %v1693_v6, 0.0  ;;  %v4725_v18 = vpop.f32.mrf.mxu0 }
 0x7a7   :  { %v1708_v0 = vadd.f32 %v4725_v18, %v4123_v52 }
 0x7a8   :  { %v1702_v45 = vpop.f32.mrf.mxu0  ;;  %4748 = vmatprep.mubr.msk.f32.mxu1 %vm187_vm0, %v1731_v33 }
 0x7a9   :  { %v1703_v14 = vadd.f32 %v4123_v52, %v1702_v45  ;;  %4749 = vmatmul.mubr.msk.f32.vlgmr.msra.gmra.mxu1 %vm187_vm0, %v1732_v20  ;;  %v1734_v12 = vmax.f32 %v1708_v0, 0.0 }
 0x7aa   :  { %v4728_v43 = vpop.f32.mrf.mxu0 }
 0x7ab   :  { %v1733_v26 = vmax.f32 %v1703_v14, 0.0  ;;  %v1718_v31 = vadd.f32 %v4728_v43, %v4123_v52 }
 0x7ac   :  { %v1712_v42 = vpop.f32.mrf.mxu0 }
 0x7ad   :  { %v1713_v50 = vadd.f32 %v4123_v52, %v1712_v42  ;;  %4751 = vmatprep.mubr.msk.f32.mxu1 %vm187_vm0, %v1733_v26  ;;  %v1736_v2 = vmax.f32 %v1718_v31, 0.0 }
 0x7ae   :  { %v4731_v62 = vpop.f32.mrf.mxu0  ;;  %4752 = vmatmul.mubr.msk.f32.gmra.mxu1 %vm187_vm0, %v1734_v12 }
 0x7af   :  { %v1735_v1 = vmax.f32 %v1713_v50, 0.0  ;;  %v1728_v60 = vadd.f32 %v4731_v62, %v4123_v52 }
 0x7b0   :  { %v1722_v25 = vpop.f32.mrf.mxu0 }
 0x7b1   :  { %v1723_v3 = vadd.f32 %v4123_v52, %v1722_v25  ;;  %4754 = vmatprep.mubr.msk.f32.mxu1 %vm187_vm0, %v1735_v1  ;;  %v1738_v9 = vmax.f32 %v1728_v60, 0.0 }
 0x7b2   :  { %4755 = vmatmul.mubr.msk.f32.gmra.mxu1 %vm187_vm0, %v1736_v2 }
 0x7b3   :  { %v1737_v5 = vmax.f32 %v1723_v3, 0.0 }
 0x7b5   :  { %4757 = vmatprep.mubr.msk.f32.mxu1 %vm187_vm0, %v1737_v5 }
 0x7b6   :  { %4758 = vmatmul.mubr.msk.f32.gmra.mxu1 %vm187_vm0, %v1738_v9 }
 0x869   :  { %v4750_v63 = vpop.f32.mrf.mxu1 }
 0x86a   :  { %v1849_v32 = vadd.f32 %v4750_v63, %v4140_v24 }
 0x86b   :  { %v1843_v4 = vpop.f32.mrf.mxu1 }
 0x86c   :  { %v1844_v21 = vadd.f32 %v4140_v24, %v1843_v4  ;;  %v1883_v56 = vadd.f32 %v1849_v32, %v5929_v37 }
 0x86e   :  { %v4753_v7 = vpop.f32.mrf.mxu1  ;;  %v1895_v55 = vsel %vm187_vm0, %v1883_v56, 0.0  ;;  %v1882_v35 = vadd.f32 %v1844_v21, %v5926_v28 }
 0x86f   :  { %v1859_v22 = vadd.f32 %v4753_v7, %v4140_v24  ;;  %1896 = vadd.xlane.f32.xlu1 %v1895_v55 }
 0x870   :  { %v1853_v38 = vpop.f32.mrf.mxu1  ;;  %v1892_v49 = vsel %vm187_vm0, %v1882_v35, 0.0 }
 0x871   :  { %v1885_v46 = vadd.f32 %v1859_v22, %v5936_v23  ;;  %v1854_v30 = vadd.f32 %v4140_v24, %v1853_v38  ;;  %1893 = vadd.xlane.f32.xlu0 %v1892_v49 }
 0x872   :  { %v4756_v39 = vpop.f32.mrf.mxu1 }
 0x873   :  { %v1884_v57 = vadd.f32 %v1854_v30, %v5939_v47  ;;  %v1869_v54 = vadd.f32 %v4756_v39, %v4140_v24  ;;  %v1901_v37 = vsel %vm187_vm0, %v1885_v46, 0.0  ;;  %v4166_v30 = vld [vmem:[%s6861_s3 + $0x108] sm:$0xff]  ;;  %v4165_v39 = vld [vmem:[%s6861_s3 + $0x100] sm:$0xff] }
 0x874   :  { %1902 = vadd.xlane.f32.xlu1 %v1901_v37  ;;  %v1863_v61 = vpop.f32.mrf.mxu1  ;;  %2090 = vmatprep.subr.mxu0 %v4166_v30  ;;  %v4162_v37 = vld [vmem:[%s6861_s3 + $0xe8] sm:$0xff] }
 0x875   :  { %v1887_v41 = vadd.f32 %v1869_v54, %v5946_v8  ;;  %v1864_v28 = vadd.f32 %v4140_v24, %v1863_v61  ;;  %v1898_v59 = vsel %vm187_vm0, %v1884_v57, 0.0  ;;  %2091 = vmatpush1.msra.mxu0 %v4165_v39  ;;  %v4163_v54 = vld [vmem:[%s6861_s3 + $0xf0] sm:$0xff]  ;;  %v4161_v61 = vld [vmem:[%s6861_s3 + $0xe0] sm:$0xff] }
 0x876   :  { %1899 = vadd.xlane.f32.xlu0 %v1898_v59  ;;  %v4759_v36 = vpop.f32.mrf.mxu1  ;;  %v4158_v59 = vld [vmem:[%s6861_s3 + $0xc8] sm:$0xff] }
 0x877   :  { %v1886_v51 = vadd.f32 %v1864_v28, %v5949_v58  ;;  %v1879_v23 = vadd.f32 %v4759_v36, %v4140_v24  ;;  %v1907_v44 = vsel %vm187_vm0, %v1887_v41, 0.0  ;;  %v4159_v28 = vld [vmem:[%s6861_s3 + $0xd0] sm:$0xff]  ;;  %v4157_v36 = vld [vmem:[%s6861_s3 + $0xc0] sm:$0xff] }
 0x878   :  { %1908 = vadd.xlane.f32.xlu1 %v1907_v44  ;;  %v1873_v53 = vpop.f32.mrf.mxu1  ;;  %v4154_v44 = vld [vmem:[%s6861_s3 + $0xa8] sm:$0xff] }
 0x879   :  { %v1889_v47 = vadd.f32 %v1879_v23, %v5956_v40  ;;  %v1874_v29 = vadd.f32 %v4140_v24, %v1873_v53  ;;  %v1904_v27 = vsel %vm187_vm0, %v1886_v51, 0.0  ;;  %v4155_v23 = vld [vmem:[%s6861_s3 + $0xb0] sm:$0xff]  ;;  %v4153_v53 = vld [vmem:[%s6861_s3 + $0xa0] sm:$0xff] }
 0x87a   :  { %1905 = vadd.xlane.f32.xlu0 %v1904_v27 }
 0x87b   :  { %v1888_v8 = vadd.f32 %v1874_v29, %v5958_v13  ;;  %v1913_v48 = vsel %vm187_vm0, %v1889_v47, 0.0  ;;  %v4151_v29 = vld [vmem:[%s6861_s3 + $0x90] sm:$0xff] }
 0x87c   :  { %1914 = vadd.xlane.f32.xlu1 %v1913_v48 }
 0x87d   :  { %v1910_v52 = vsel %vm187_vm0, %v1888_v8, 0.0 }
 0x87e   :  { %1911 = vadd.xlane.f32.xlu0 %v1910_v52 }
 0x8f8   :  { %v1897_v58 = vpop.xlane.xlu1 %1896 }
 0x8f9   :  { %v1917_v11 = vmul.f32 0.015625, %v1897_v58 }
 0x8fa   :  { %v1894_v15 = vpop.xlane.xlu0 %1893 }
 0x8fb   :  { %v6004_v19 = vsub.f32 %v1883_v56, %v1917_v11  ;;  %v1916_v6 = vmul.f32 0.015625, %v1894_v15 }
 0x8fd   :  { %v6006_v33 = vsub.f32 %v1882_v35, %v1916_v6  ;;  %v1903_v40 = vpop.xlane.xlu1 %1902  ;;  %v1933_v18 = vmul.f32 %v6004_v19, %v6004_v19 }
 0x8fe   :  { %v1919_v20 = vmul.f32 0.015625, %v1903_v40 }
 0x8ff   :  { %v1900_v13 = vpop.xlane.xlu0 %1899  ;;  %v1943_v0 = vsel %vm187_vm0, %v1933_v18, 0.0  ;;  %v1932_v45 = vmul.f32 %v6006_v33, %v6006_v33 }
 0x900   :  { %v6013_v14 = vsub.f32 %v1885_v46, %v1919_v20  ;;  %v1918_v43 = vmul.f32 0.015625, %v1900_v13  ;;  %1944 = vadd.xlane.f32.xlu1 %v1943_v0 }
 0x901   :  { %v1909_v26 = vpop.xlane.xlu1 %1908  ;;  %v1940_v12 = vsel %vm187_vm0, %v1932_v45, 0.0 }
 0x902   :  { %v6016_v31 = vsub.f32 %v1884_v57, %v1918_v43  ;;  %v1921_v42 = vmul.f32 0.015625, %v1909_v26  ;;  %1941 = vadd.xlane.f32.xlu0 %v1940_v12  ;;  %v1935_v50 = vmul.f32 %v6013_v14, %v6013_v14  ;;  %v4164_v57 = vld [vmem:[%s6861_s3 + $0xf8] sm:$0xff] }
 0x903   :  { %v1906_v62 = vpop.xlane.xlu0 %1905  ;;  %2092 = vmatprep.subr.mxu0 %v4164_v57 }
 0x904   :  { %v6020_v1 = vsub.f32 %v1887_v41, %v1921_v42  ;;  %v1920_v2 = vmul.f32 0.015625, %v1906_v62  ;;  %v1949_v60 = vsel %vm187_vm0, %v1935_v50, 0.0  ;;  %v1934_v25 = vmul.f32 %v6016_v31, %v6016_v31  ;;  %2093 = vmatpush1.msra.mxu0 %v4163_v54  ;;  %v4160_v41 = vld [vmem:[%s6861_s3 + $0xd8] sm:$0xff] }
 0x905   :  { %1950 = vadd.xlane.f32.xlu1 %v1949_v60  ;;  %v1915_v3 = vpop.xlane.xlu1 %1914  ;;  %2094 = vmatprep.subr.mxu0 %v4162_v37 }
 0x906   :  { %v6025_v5 = vsub.f32 %v1886_v51, %v1920_v2  ;;  %v1923_v9 = vmul.f32 0.015625, %v1915_v3  ;;  %v1946_v24 = vsel %vm187_vm0, %v1934_v25, 0.0  ;;  %v1937_v63 = vmul.f32 %v6020_v1, %v6020_v1  ;;  %2095 = vmatpush1.msra.mxu0 %v4161_v61  ;;  %v4156_v51 = vld [vmem:[%s6861_s3 + $0xb8] sm:$0xff] }
 0x907   :  { %1947 = vadd.xlane.f32.xlu0 %v1946_v24  ;;  %v1912_v32 = vpop.xlane.xlu0 %1911  ;;  %2096 = vmatprep.subr.mxu0 %v4160_v41 }
 0x908   :  { %v6030_v4 = vsub.f32 %v1889_v47, %v1923_v9  ;;  %v1922_v21 = vmul.f32 0.015625, %v1912_v32  ;;  %v1955_v56 = vsel %vm187_vm0, %v1937_v63, 0.0  ;;  %v1936_v7 = vmul.f32 %v6025_v5, %v6025_v5  ;;  %2097 = vmatpush1.msra.mxu0 %v4159_v28  ;;  %v4152_v47 = vld [vmem:[%s6861_s3 + $0x98] sm:$0xff]  ;;  %v4149_v32 = vld [vmem:[%s6862_s2 + $0x8] ss:$0 sm:$0xff] }
 0x909   :  { %1956 = vadd.xlane.f32.xlu1 %v1955_v56  ;;  %2098 = vmatprep.subr.mxu0 %v4158_v59  ;;  %v4150_v56 = vld [vmem:[%s6862_s2 + $0x9] ss:$0 sm:$0xff] }
 0x90a   :  { %v6035_v55 = vsub.f32 %v1888_v8, %v1922_v21  ;;  %v1952_v35 = vsel %vm187_vm0, %v1936_v7, 0.0  ;;  %v1939_v22 = vmul.f32 %v6030_v4, %v6030_v4  ;;  %2099 = vmatpush1.msra.mxu0 %v4157_v36 }
 0x90b   :  { %1953 = vadd.xlane.f32.xlu0 %v1952_v35  ;;  %2100 = vmatprep.subr.mxu0 %v4156_v51 }
 0x90c   :  { %v1961_v38 = vsel %vm187_vm0, %v1939_v22, 0.0  ;;  %v1938_v49 = vmul.f32 %v6035_v55, %v6035_v55  ;;  %2101 = vmatpush1.msra.mxu0 %v4155_v23 }
 0x90d   :  { %1962 = vadd.xlane.f32.xlu1 %v1961_v38  ;;  %2102 = vmatprep.subr.mxu0 %v4154_v44 }
 0x90e   :  { %v1958_v46 = vsel %vm187_vm0, %v1938_v49, 0.0  ;;  %2103 = vmatpush1.msra.mxu0 %v4153_v53 }
 0x90f   :  { %1959 = vadd.xlane.f32.xlu0 %v1958_v46  ;;  %2104 = vmatprep.subr.mxu0 %v4152_v47 }
 0x910   :  { %2105 = vmatpush1.msra.mxu0 %v4151_v29 }
 0x989   :  { %v1945_v27 = vpop.xlane.xlu1 %1944 }
 0x98a   :  { %v1965_v8 = vmul.f32 0.015625, %v1945_v27 }
 0x98b   :  { %v1942_v48 = vpop.xlane.xlu0 %1941 }
 0x98c   :  { %v1973_v52 = vadd.f32 1e-05, %v1965_v8  ;;  %v1964_v58 = vmul.f32 0.015625, %v1942_v48 }
 0x98e   :  { %5103 = vrsqrt.f32 %v1973_v52  ;;  %v1972_v11 = vadd.f32 1e-05, %v1964_v58  ;;  %v1951_v15 = vpop.xlane.xlu1 %1950 }
 0x98f   :  { %v1967_v6 = vmul.f32 0.015625, %v1951_v15 }
 0x990   :  { %5105 = vrsqrt.f32 %v1972_v11  ;;  %v1948_v40 = vpop.xlane.xlu0 %1947 }
 0x991   :  { %v1966_v18 = vmul.f32 0.015625, %v1948_v40  ;;  %v1975_v20 = vadd.f32 1e-05, %v1967_v6 }
 0x992   :  { %v1957_v13 = vpop.xlane.xlu1 %1956 }
 0x993   :  { %v1974_v0 = vadd.f32 1e-05, %v1966_v18  ;;  %v1969_v43 = vmul.f32 0.015625, %v1957_v13 }
 0x994   :  { %v1954_v45 = vpop.xlane.xlu0 %1953 }
 0x995   :  { %5107 = vrsqrt.f32 %v1974_v0  ;;  %v1968_v26 = vmul.f32 0.015625, %v1954_v45  ;;  %v1977_v50 = vadd.f32 1e-05, %v1969_v43 }
 0x996   :  { %5109 = vrsqrt.f32 %v1975_v20  ;;  %v1963_v60 = vpop.xlane.xlu1 %1962 }
 0x997   :  { %v1976_v12 = vadd.f32 1e-05, %v1968_v26  ;;  %v1971_v9 = vmul.f32 0.015625, %v1963_v60 }
 0x998   :  { %v1960_v42 = vpop.xlane.xlu0 %1959 }
 0x999   :  { %5111 = vrsqrt.f32 %v1976_v12  ;;  %v1970_v62 = vmul.f32 0.015625, %v1960_v42  ;;  %v1979_v35 = vadd.f32 1e-05, %v1971_v9 }
 0x99a   :  { %5113 = vrsqrt.f32 %v1977_v50 }
 0x99b   :  { %v5104_v2 = vpop.eup %5103  ;;  %v1978_v24 = vadd.f32 1e-05, %v1970_v62 }
 0x99c   :  { %v1989_v63 = vmul.f32 %v5104_v2, %v6004_v19 }
 0x99d   :  { %v5106_v25 = vpop.eup %5105  ;;  %5115 = vrsqrt.f32 %v1978_v24 }
 0x99e   :  { %v1988_v3 = vmul.f32 %v5106_v25, %v6006_v33  ;;  %v2001_v38 = vmul.f32 %v4149_v32, %v1989_v63  ;;  %5117 = vrsqrt.f32 %v1979_v35 }
 0x9a0   :  { %v2000_v21 = vmul.f32 %v4149_v32, %v1988_v3  ;;  %v6106_v19 = vadd.f32 %v4150_v56, %v2001_v38 }
 0x9a2   :  { %v5108_v7 = vpop.eup %5107  ;;  %v6100_v22 = vadd.f32 %v4150_v56, %v2000_v21 }
 0x9a3   :  { %v5110_v33 = vpop.eup %5109  ;;  %v1990_v49 = vmul.f32 %v5108_v7, %v6016_v31 }
 0x9a4   :  { %4168 = vmatmul.mubr.msk.f32.vlgmr.msra.gmra.mxu0 %vm187_vm0, %v6100_v22  ;;  %v1991_v30 = vmul.f32 %v5110_v33, %v6013_v14 }
 0x9a5   :  { %2144 = vmatprep.mubr.f32.mxu0 %v5225_v10  ;;  %v2002_v46 = vmul.f32 %v4149_v32, %v1990_v49 }
 0x9a6   :  { %v5112_v39 = vpop.eup %5111  ;;  %v2003_v31 = vmul.f32 %v4149_v32, %v1991_v30 }
 0x9a7   :  { %v5114_v57 = vpop.eup %5113  ;;  %v6112_v54 = vadd.f32 %v4150_v56, %v2002_v46  ;;  %v1992_v37 = vmul.f32 %v5112_v39, %v6025_v5 }
 0x9a8   :  { %4169 = vmatmul.mubr.msk.f32.gmra.mxu0 %vm187_vm0, %v6106_v19  ;;  %v6118_v61 = vadd.f32 %v4150_v56, %v2003_v31  ;;  %v1993_v41 = vmul.f32 %v5114_v57, %v6020_v1 }
 0x9a9   :  { %2150 = vmatprep.mubr.f32.mxu0 %v5225_v10  ;;  %v2004_v14 = vmul.f32 %v4149_v32, %v1992_v37 }
 0x9aa   :  { %v5116_v28 = vpop.eup %5115  ;;  %v2005_v36 = vmul.f32 %v4149_v32, %v1993_v41 }
 0x9ab   :  { %v6124_v59 = vadd.f32 %v4150_v56, %v2004_v14  ;;  %v1994_v5 = vmul.f32 %v5116_v28, %v6035_v55  ;;  %v5118_v51 = vpop.eup %5117 }
 0x9ac   :  { %4170 = vmatmul.mubr.msk.f32.gmra.mxu0 %vm187_vm0, %v6112_v54  ;;  %v6130_v23 = vadd.f32 %v4150_v56, %v2005_v36  ;;  %v1995_v44 = vmul.f32 %v5118_v51, %v6030_v4  ;;  %v4167_v4 = vld [vmem:[%s6861_s3 + $0x110] ss:$8 sm:$0x3] }
 0x9ad   :  { %2156 = vmatprep.mubr.f32.mxu0 %v5225_v10  ;;  %v2006_v1 = vmul.f32 %v4149_v32, %v1994_v5  ;;  %v2043_v29 = vrot.slane %v4167_v4, %v179_v17  ;;  %v2047_v26 = vrot.slane %v4167_v4, %v183_v34 }
 0x9ae   :  { %v2007_v47 = vmul.f32 %v4149_v32, %v1995_v44 }
 0x9af   :  { %v6136_v53 = vadd.f32 %v4150_v56, %v2006_v1 }
 0x9b0   :  { %4171 = vmatmul.mubr.msk.f32.gmra.mxu0 %vm187_vm0, %v6118_v61  ;;  %v6141_v55 = vadd.f32 %v4150_v56, %v2007_v47 }
 0x9b1   :  { %2162 = vmatprep.mubr.f32.mxu0 %v5225_v10 }
 0x9b4   :  { %4172 = vmatmul.mubr.msk.f32.gmra.mxu0 %vm187_vm0, %v6124_v59 }
 0x9b5   :  { %2168 = vmatprep.mubr.f32.mxu0 %v5225_v10 }
 0x9b8   :  { %4173 = vmatmul.mubr.msk.f32.gmra.mxu0 %vm187_vm0, %v6130_v23 }
 0x9b9   :  { %2174 = vmatprep.mubr.f32.mxu0 %v5225_v10 }
 0x9bc   :  { %4174 = vmatmul.mubr.msk.f32.gmra.mxu0 %vm187_vm0, %v6136_v53 }
 0x9bd   :  { %2180 = vmatprep.mubr.f32.mxu0 %v5225_v10 }
 0x9c0   :  { %4175 = vmatmul.mubr.msk.f32.gmra.mxu0 %vm187_vm0, %v6141_v55 }
 0xa64   :  { %v2140_v27 = vpop.f32.mrf.mxu0 }
 0xa65   :  { %v6150_v8 = vadd.f32 %v2140_v27, %v2043_v29 }
 0xa66   :  { %v2142_v48 = vpop.f32.mrf.mxu0 }
 0xa67   :  { %4776 = vmatprep.mubr.msk.f32.mxu1 %vm357_vm1, %v6150_v8  ;;  %v6198_v21 = vadd.f32 %v2142_v48, %v2047_v26 }
 0xa68   :  { %v2146_v10 = vpop.f32.mrf.mxu0 }
 0xa69   :  { %v6178_v9 = vadd.f32 %v2146_v10, %v2043_v29 }
 0xa6a   :  { %v2148_v52 = vpop.f32.mrf.mxu0 }
 0xa6b   :  { %v6190_v32 = vadd.f32 %v2148_v52, %v2047_v26  ;;  %v5215_v52 = vld [vmem:[%s6863_s1 + $0x8] sm:$0xff] }
 0xa6c   :  { %v2152_v58 = vpop.f32.mrf.mxu0 }
 0xa6d   :  { %v6176_v34 = vadd.f32 %v2152_v58, %v2043_v29 }
 0xa6e   :  { %v2154_v11 = vpop.f32.mrf.mxu0 }
 0xa6f   :  { %v6186_v63 = vadd.f32 %v2154_v11, %v2047_v26 }
 0xa70   :  { %v2158_v15 = vpop.f32.mrf.mxu0 }
 0xa71   :  { %v6170_v25 = vadd.f32 %v2158_v15, %v2043_v29  ;;  %v5216_v15 = vld [vmem:[%s6863_s1] sm:$0xff] }
 0xa72   :  { %v2160_v6 = vpop.f32.mrf.mxu0 }
 0xa73   :  { %v6180_v24 = vadd.f32 %v2160_v6, %v2047_v26 }
 0xa74   :  { %v2164_v40 = vpop.f32.mrf.mxu0 }
 0xa75   :  { %v6168_v2 = vadd.f32 %v2164_v40, %v2043_v29 }
 0xa76   :  { %v2166_v18 = vpop.f32.mrf.mxu0 }
 0xa77   :  { %v2167_v3 = vadd.f32 %v2166_v18, %v2047_v26 }
 0xa78   :  { %v2170_v20 = vpop.f32.mrf.mxu0 }
 0xa79   :  { %v6160_v12 = vadd.f32 %v2170_v20, %v2043_v29  ;;  %v5217_v20 = vld [vmem:[%s6863_s1 + $0x18] sm:$0xff] }
 0xa7a   :  { %v2172_v13 = vpop.f32.mrf.mxu0 }
 0xa7b   :  { %v2173_v16 = vadd.f32 %v2172_v13, %v2047_v26 }
 0xa7c   :  { %v2176_v0 = vpop.f32.mrf.mxu0 }
 0xa7d   :  { %v6154_v45 = vadd.f32 %v2176_v0, %v2043_v29 }
 0xa7e   :  { %v2178_v17 = vpop.f32.mrf.mxu0 }
 0xa7f   :  { %2216 = vrot.lane.b32.xlu1 %v6154_v45, %s5226_s28  ;;  %v2179_v60 = vadd.f32 %v2178_v17, %v2047_v26  ;;  %v5218_v17 = vld [vmem:[%s6863_s1 + $0x10] sm:$0xff] }
 0xa80   :  { %v2182_v43 = vpop.f32.mrf.mxu0 }
 0xa81   :  { %v6162_v42 = vadd.f32 %v2182_v43, %v2043_v29 }
 0xa82   :  { %v2184_v50 = vpop.f32.mrf.mxu0 }
 0xa83   :  { %v2185_v62 = vadd.f32 %v2184_v50, %v2047_v26  ;;  %2218 = vrot.lane.b32.xlu0 %v6162_v42, %s5226_s28  ;;  %2214 = vrot.lane.b32.xlu1 %v6160_v12, %s5226_s28 }
 0xa85   :  { %4788 = vmatprep.subr.mxu0 %v2185_v62 }
 0xa86   :  { %4789 = vmatpush3.msra.mxu0 %v2185_v62 }
 0xa87   :  { %2212 = vrot.lane.b32.xlu0 %v6168_v2, %s5226_s28  ;;  %4790 = vmatprep.subr.mxu0 %v2179_v60 }
 0xa88   :  { %2210 = vrot.lane.b32.xlu1 %v6170_v25, %s5226_s28  ;;  %4791 = vmatpush3.msra.mxu0 %v2179_v60 }
 0xa89   :  { %4792 = vmatprep.subr.mxu0 %v2173_v16 }
 0xa8a   :  { %4793 = vmatpush3.msra.mxu0 %v2173_v16 }
 0xa8b   :  { %2208 = vrot.lane.b32.xlu0 %v6176_v34, %s5226_s28  ;;  %4794 = vmatprep.subr.mxu0 %v2167_v3 }
 0xa8c   :  { %2206 = vrot.lane.b32.xlu1 %v6178_v9, %s5226_s28  ;;  %4795 = vmatpush3.msra.mxu0 %v2167_v3 }
 0xa8d   :  { %4796 = vmatprep.subr.mxu0 %v6180_v24 }
 0xa8e   :  { %4797 = vmatpush3.msra.mxu0 %v6180_v24 }
 0xa8f   :  { %2204 = vrot.lane.b32.xlu0 %v6150_v8, %s5226_s28  ;;  %4798 = vmatprep.subr.mxu0 %v6186_v63 }
 0xa90   :  { %2628 = vrot.lane.b32.xlu1 %v6162_v42, %s5227_s29  ;;  %4799 = vmatpush3.msra.mxu0 %v6186_v63 }
 0xa91   :  { %4800 = vmatprep.subr.mxu0 %v6190_v32 }
 0xa92   :  { %4801 = vmatpush3.msra.mxu0 %v6190_v32 }
 0xa93   :  { %4802 = vmatprep.subr.mxu0 %v6198_v21  ;;  %2626 = vrot.lane.b32.xlu0 %v6154_v45, %s5227_s29 }
 0xa94   :  { %2624 = vrot.lane.b32.xlu1 %v6160_v12, %s5227_s29  ;;  %4803 = vmatpush3.msra.mxu0 %v6198_v21 }
 0xa97   :  { %2622 = vrot.lane.b32.xlu0 %v6168_v2, %s5227_s29 }
 0xa98   :  { %2620 = vrot.lane.b32.xlu1 %v6170_v25, %s5227_s29 }
 0xa9b   :  { %2618 = vrot.lane.b32.xlu0 %v6176_v34, %s5227_s29 }
 0xa9c   :  { %2616 = vrot.lane.b32.xlu1 %v6178_v9, %s5227_s29 }
 0xa9f   :  { %2614 = vrot.lane.b32.xlu0 %v6150_v8, %s5227_s29 }
 0xaa0   :  { %2598 = vrot.lane.b32.xlu1 %v6150_v8, %s5228_s30 }
 0xaa3   :  { %2600 = vrot.lane.b32.xlu0 %v6178_v9, %s5228_s30 }
 0xaa4   :  { %2602 = vrot.lane.b32.xlu1 %v6176_v34, %s5228_s30 }
 0xaa7   :  { %2604 = vrot.lane.b32.xlu0 %v6170_v25, %s5228_s30 }
 0xaa8   :  { %2606 = vrot.lane.b32.xlu1 %v6168_v2, %s5228_s30 }
 0xaab   :  { %2608 = vrot.lane.b32.xlu0 %v6160_v12, %s5228_s30 }
 0xaac   :  { %2610 = vrot.lane.b32.xlu1 %v6154_v45, %s5228_s30 }
 0xaaf   :  { %2612 = vrot.lane.b32.xlu0 %v6162_v42, %s5228_s30 }
 0xab0   :  { %2899 = vrot.lane.b32.xlu1 %v2179_v60, %s5228_s30  ;;  %v5220_v60 = vld [vmem:[%s6863_s1 + $0x20] sm:$0xff] }
 0xab3   :  { %2895 = vrot.lane.b32.xlu0 %v2167_v3, %s5228_s30 }
 0xab4   :  { %2897 = vrot.lane.b32.xlu1 %v2173_v16, %s5228_s30 }
 0xab7   :  { %2901 = vrot.lane.b32.xlu0 %v2185_v62, %s5228_s30 }
 0xaf1   :  { %v2217_v56 = vpop.permute.xlu1 %2216 }
 0xaf5   :  { %v2219_v7 = vpop.permute.xlu0 %2218  ;;  %v2215_v35 = vpop.permute.xlu1 %2214 }
 0xaf6   :  { %4760 = vmatprep.subr.msk.mxu1 %vm357_vm1, %v2219_v7 }
 0xaf7   :  { %4761 = vmatpush3.xpose.msk.msra.mxu1 %vm357_vm1, %v2219_v7 }
 0xaf8   :  { %4762 = vmatprep.subr.msk.mxu1 %vm357_vm1, %v2217_v56 }
 0xaf9   :  { %v2213_v38 = vpop.permute.xlu0 %2212 }
 0xafa   :  { %v2211_v49 = vpop.permute.xlu1 %2210 }
 0xafb   :  { %4763 = vmatpush3.xpose.msk.msra.mxu1 %vm357_vm1, %v2217_v56 }
 0xafc   :  { %4764 = vmatprep.subr.msk.mxu1 %vm357_vm1, %v2215_v35 }
 0xafd   :  { %v2209_v33 = vpop.permute.xlu0 %2208 }
 0xafe   :  { %v2207_v30 = vpop.permute.xlu1 %2206 }
 0xaff   :  { %4765 = vmatpush3.xpose.msk.msra.mxu1 %vm357_vm1, %v2215_v35  ;;  %v5222_v35 = vld [vmem:[%s6863_s1 + $0x30] sm:$0xff] }
 0xb00   :  { %4766 = vmatprep.subr.msk.mxu1 %vm357_vm1, %v2213_v38 }
 0xb01   :  { %v2205_v46 = vpop.permute.xlu0 %2204 }
 0xb02   :  { %v2629_v31 = vpop.permute.xlu1 %2628 }
 0xb03   :  { %4767 = vmatpush3.xpose.msk.msra.mxu1 %vm357_vm1, %v2213_v38 }
 0xb04   :  { %4768 = vmatprep.subr.msk.mxu1 %vm357_vm1, %v2211_v49 }
 0xb05   :  { %v2627_v39 = vpop.permute.xlu0 %2626 }
 0xb06   :  { %v2625_v14 = vpop.permute.xlu1 %2624 }
 0xb07   :  { %4769 = vmatpush3.xpose.msk.msra.mxu1 %vm357_vm1, %v2211_v49 }
 0xb08   :  { %4770 = vmatprep.subr.msk.mxu1 %vm357_vm1, %v2209_v33 }
 0xb09   :  { %v2623_v57 = vpop.permute.xlu0 %2622 }
 0xb0a   :  { %v2621_v36 = vpop.permute.xlu1 %2620 }
 0xb0b   :  { %4771 = vmatpush3.xpose.msk.msra.mxu1 %vm357_vm1, %v2209_v33 }
 0xb0c   :  { %4772 = vmatprep.subr.msk.mxu1 %vm357_vm1, %v2207_v30 }
 0xb0d   :  { %v2619_v37 = vpop.permute.xlu0 %2618 }
 0xb0e   :  { %v2617_v51 = vpop.permute.xlu1 %2616 }
 0xb0f   :  { %4773 = vmatpush3.xpose.msk.msra.mxu1 %vm357_vm1, %v2207_v30 }
 0xb10   :  { %4774 = vmatprep.subr.msk.mxu1 %vm357_vm1, %v2205_v46 }
 0xb11   :  { %v2615_v41 = vpop.permute.xlu0 %2614 }
 0xb12   :  { %v2599_v47 = vpop.permute.xlu1 %2598 }
 0xb13   :  { %4775 = vmatpush3.xpose.msk.msra.mxu1 %vm357_vm1, %v2205_v46 }
 0xb14   :  { %4816 = vmatprep.subr.msk.mxu1 %vm357_vm1, %v2629_v31 }
 0xb15   :  { %v2601_v28 = vpop.permute.xlu0 %2600 }
 0xb16   :  { %4777 = vmatmul.mubr.msk.f32.vlgmr.msra.gmra.mxu1 %vm357_vm1, %v6178_v9  ;;  %v2603_v27 = vpop.permute.xlu1 %2602 }
 0xb17   :  { %4779 = vmatprep.mubr.msk.f32.mxu1 %vm357_vm1, %v6176_v34  ;;  %4817 = vmatpush3.xpose.msk.msra.mxu1 %vm357_vm1, %v2629_v31  ;;  %v5221_v34 = vld [vmem:[%s6863_s1 + $0x38] sm:$0xff] }
 0xb18   :  { %4818 = vmatprep.subr.msk.mxu1 %vm357_vm1, %v2627_v39 }
 0xb19   :  { %v2605_v5 = vpop.permute.xlu0 %2604 }
 0xb1a   :  { %4780 = vmatmul.mubr.msk.f32.gmra.mxu1 %vm357_vm1, %v6170_v25  ;;  %v2607_v8 = vpop.permute.xlu1 %2606 }
 0xb1b   :  { %4782 = vmatprep.mubr.msk.f32.mxu1 %vm357_vm1, %v6168_v2  ;;  %4819 = vmatpush3.xpose.msk.msra.mxu1 %vm357_vm1, %v2627_v39 }
 0xb1c   :  { %4820 = vmatprep.subr.msk.mxu1 %vm357_vm1, %v2625_v14 }
 0xb1d   :  { %v2609_v1 = vpop.permute.xlu0 %2608 }
 0xb1e   :  { %4783 = vmatmul.mubr.msk.f32.gmra.mxu1 %vm357_vm1, %v6160_v12  ;;  %v2611_v48 = vpop.permute.xlu1 %2610  ;;  %v5219_v12 = vld [vmem:[%s6863_s1 + $0x28] sm:$0xff] }
 0xb1f   :  { %4785 = vmatprep.mubr.msk.f32.mxu1 %vm357_vm1, %v6154_v45  ;;  %4821 = vmatpush3.xpose.msk.msra.mxu1 %vm357_vm1, %v2625_v14 }
 0xb20   :  { %4822 = vmatprep.subr.msk.mxu1 %vm357_vm1, %v2623_v57 }
 0xb21   :  { %v2613_v44 = vpop.permute.xlu0 %2612 }
 0xb22   :  { %4786 = vmatmul.mubr.msk.f32.gmra.mxu1 %vm357_vm1, %v6162_v42 }
 0xb23   :  { %4823 = vmatpush3.xpose.msk.msra.mxu1 %vm357_vm1, %v2623_v57  ;;  %4832 = vmatprep.mubr.msk.f32.mxu1 %vm357_vm1, %v2599_v47 }
 0xb24   :  { %4824 = vmatprep.subr.msk.mxu1 %vm357_vm1, %v2621_v36 }
 0xb25   :  { %v6278_v4 = vpop.permute.xlu0 %2895 }
 0xb27   :  { %4825 = vmatpush3.xpose.msk.msra.mxu1 %vm357_vm1, %v2621_v36 }
 0xb28   :  { %4826 = vmatprep.subr.msk.mxu1 %vm357_vm1, %v2619_v37 }
 0xb29   :  { %v6282_v29 = vpop.permute.xlu0 %2901 }
 0xb2a   :  { %4844 = vmatprep.subr.mxu0 %v6282_v29 }
 0xb2b   :  { %4827 = vmatpush3.xpose.msk.msra.mxu1 %vm357_vm1, %v2619_v37 }
 0xb2c   :  { %4828 = vmatprep.subr.msk.mxu1 %vm357_vm1, %v2617_v51 }
 0xb2f   :  { %4829 = vmatpush3.xpose.msk.msra.mxu1 %vm357_vm1, %v2617_v51 }
 0xb30   :  { %4830 = vmatprep.subr.msk.mxu1 %vm357_vm1, %v2615_v41 }
 0xb33   :  { %4831 = vmatpush3.xpose.msk.msra.mxu1 %vm357_vm1, %v2615_v41 }
 0xb36   :  { %4833 = vmatmul.mubr.msk.f32.vlgmr.msra.gmra.mxu1 %vm357_vm1, %v2601_v28 }
 0xb37   :  { %4835 = vmatprep.mubr.msk.f32.mxu1 %vm357_vm1, %v2603_v27 }
 0xb3a   :  { %4836 = vmatmul.mubr.msk.f32.gmra.mxu1 %vm357_vm1, %v2605_v5 }
 0xb3b   :  { %4838 = vmatprep.mubr.msk.f32.mxu1 %vm357_vm1, %v2607_v8 }
 0xb3e   :  { %4839 = vmatmul.mubr.msk.f32.gmra.mxu1 %vm357_vm1, %v2609_v1 }
 0xb3f   :  { %4841 = vmatprep.mubr.msk.f32.mxu1 %vm357_vm1, %v2611_v48 }
 0xb42   :  { %4842 = vmatmul.mubr.msk.f32.gmra.mxu1 %vm357_vm1, %v2613_v44 }
 0xbd6   :  { %v4778_v10 = vpop.f32.mrf.mxu1 }
 0xbd7   :  { %v6300_v58 = vadd.f32 %v5215_v52, %v4778_v10 }
 0xbd8   :  { %v2318_v11 = vpop.f32.mrf.mxu1 }
 0xbd9   :  { %v6305_v6 = vadd.f32 %v5216_v15, %v2318_v11  ;;  %v2360_v40 = vsel %vm187_vm0, %v6300_v58, -inf }
 0xbda   :  { %2361 = vmax.xlane.f32.xlu0 %v2360_v40  ;;  %v4781_v18 = vpop.f32.mrf.mxu1 }
 0xbdb   :  { %v6312_v13 = vadd.f32 %v5217_v20, %v4781_v18  ;;  %v2357_v0 = vsel %vm187_vm0, %v6305_v6, -inf }
 0xbdc   :  { %v2328_v45 = vpop.f32.mrf.mxu1  ;;  %2358 = vmax.xlane.f32.xlu1 %v2357_v0 }
 0xbdd   :  { %v6319_v43 = vadd.f32 %v5218_v17, %v2328_v45  ;;  %v2366_v62 = vsel %vm187_vm0, %v6312_v13, -inf }
 0xbde   :  { %v4784_v26 = vpop.f32.mrf.mxu1 }
 0xbdf   :  { %v6324_v42 = vadd.f32 %v5219_v12, %v4784_v26  ;;  %v2363_v50 = vsel %vm187_vm0, %v6319_v43, -inf }
 0xbe0   :  { %v2338_v2 = vpop.f32.mrf.mxu1  ;;  %2364 = vmax.xlane.f32.xlu0 %v2363_v50  ;;  %2367 = vmax.xlane.f32.xlu1 %v2366_v62 }
 0xbe1   :  { %v6333_v25 = vadd.f32 %v5220_v60, %v2338_v2  ;;  %v2372_v56 = vsel %vm187_vm0, %v6324_v42, -inf }
 0xbe2   :  { %v4787_v16 = vpop.f32.mrf.mxu1 }
 0xbe3   :  { %v6338_v3 = vadd.f32 %v5221_v34, %v4787_v16  ;;  %v2369_v9 = vsel %vm187_vm0, %v6333_v25, -inf }
 0xbe4   :  { %v2348_v7 = vpop.f32.mrf.mxu1  ;;  %2370 = vmax.xlane.f32.xlu0 %v2369_v9  ;;  %2373 = vmax.xlane.f32.xlu1 %v2372_v56 }
 0xbe5   :  { %v6347_v38 = vadd.f32 %v5222_v35, %v2348_v7  ;;  %v2378_v49 = vsel %vm187_vm0, %v6338_v3, -inf }
 0xbe7   :  { %v2375_v33 = vsel %vm187_vm0, %v6347_v38, -inf }
 0xbe8   :  { %2376 = vmax.xlane.f32.xlu0 %v2375_v33  ;;  %2379 = vmax.xlane.f32.xlu1 %v2378_v49 }
 0xbf6   :  { %v4834_v46 = vpop.f32.mrf.mxu1 }
 0xbf7   :  { %v6353_v30 = vadd.f32 %v5215_v52, %v4834_v46 }
 0xbf8   :  { %v2728_v39 = vpop.f32.mrf.mxu1 }
 0xbf9   :  { %v6355_v57 = vadd.f32 %v5216_v15, %v2728_v39  ;;  %v2770_v31 = vsel %vm187_vm0, %v6353_v30, -inf }
 0xbfa   :  { %2771 = vmax.xlane.f32.xlu1 %v2770_v31  ;;  %v4837_v37 = vpop.f32.mrf.mxu1 }
 0xbfb   :  { %v6359_v14 = vadd.f32 %v5217_v20, %v4837_v37  ;;  %v2767_v41 = vsel %vm187_vm0, %v6355_v57, -inf  ;;  %v6389_v20 = vpop.permute.xlu1 %2899 }
 0xbfc   :  { %2768 = vmax.xlane.f32.xlu0 %v2767_v41  ;;  %v2738_v28 = vpop.f32.mrf.mxu1 }
 0xbfd   :  { %v6363_v36 = vadd.f32 %v5218_v17, %v2738_v28  ;;  %v2776_v5 = vsel %vm187_vm0, %v6359_v14, -inf }
 0xbfe   :  { %2777 = vmax.xlane.f32.xlu1 %v2776_v5  ;;  %v4840_v51 = vpop.f32.mrf.mxu1 }
 0xbff   :  { %v6367_v1 = vadd.f32 %v5219_v12, %v4840_v51  ;;  %v2773_v44 = vsel %vm187_vm0, %v6363_v36, -inf  ;;  %v6391_v0 = vpop.permute.xlu1 %2897 }
 0xc00   :  { %2774 = vmax.xlane.f32.xlu0 %v2773_v44  ;;  %v2748_v47 = vpop.f32.mrf.mxu1 }
 0xc01   :  { %v6371_v27 = vadd.f32 %v5220_v60, %v2748_v47  ;;  %v2782_v8 = vsel %vm187_vm0, %v6367_v1, -inf }
 0xc02   :  { %2783 = vmax.xlane.f32.xlu1 %v2782_v8  ;;  %v4843_v48 = vpop.f32.mrf.mxu1 }
 0xc03   :  { %v6375_v10 = vadd.f32 %v5221_v34, %v4843_v48  ;;  %v2779_v52 = vsel %vm187_vm0, %v6371_v27, -inf }
 0xc04   :  { %2780 = vmax.xlane.f32.xlu0 %v2779_v52  ;;  %v2758_v11 = vpop.f32.mrf.mxu1 }
 0xc05   :  { %v6379_v15 = vadd.f32 %v5222_v35, %v2758_v11  ;;  %v2788_v40 = vsel %vm187_vm0, %v6375_v10, -inf }
 0xc06   :  { %2789 = vmax.xlane.f32.xlu1 %v2788_v40 }
 0xc07   :  { %v2785_v18 = vsel %vm187_vm0, %v6379_v15, -inf }
 0xc08   :  { %2786 = vmax.xlane.f32.xlu0 %v2785_v18 }
 0xc17   :  { %2893 = vrot.lane.b32.xlu1 %v6180_v24, %s5228_s30 }
 0xc1e   :  { %2891 = vrot.lane.b32.xlu0 %v6186_v63, %s5228_s30 }
 0xc63   :  { %v2362_v45 = vpop.xlane.xlu0 %2361 }
 0xc64   :  { %v2382_v17 = vsub.f32 %v6300_v58, %v2362_v45 }
 0xc65   :  { %v2359_v26 = vpop.xlane.xlu1 %2358 }
 0xc66   :  { %v2391_v12 = vmul.f32 1.442695, %v2382_v17  ;;  %v2381_v50 = vsub.f32 %v6305_v6, %v2359_v26 }
 0xc68   :  { %5119 = vpow2.f32 %v2391_v12  ;;  %v2389_v62 = vmul.f32 1.442695, %v2381_v50 }
 0xc69   :  { %v2365_v2 = vpop.xlane.xlu0 %2364  ;;  %v2368_v60 = vpop.xlane.xlu1 %2367 }
 0xc6a   :  { %5121 = vpow2.f32 %v2389_v62  ;;  %v2383_v24 = vsub.f32 %v6319_v43, %v2365_v2  ;;  %v2384_v63 = vsub.f32 %v6312_v13, %v2368_v60 }
 0xc6c   :  { %v2393_v16 = vmul.f32 1.442695, %v2383_v24  ;;  %v2395_v34 = vmul.f32 1.442695, %v2384_v63 }
 0xc6d   :  { %v2371_v9 = vpop.xlane.xlu0 %2370  ;;  %v2374_v56 = vpop.xlane.xlu1 %2373 }
 0xc6e   :  { %5123 = vpow2.f32 %v2393_v16  ;;  %v2385_v58 = vsub.f32 %v6333_v25, %v2371_v9  ;;  %v2386_v7 = vsub.f32 %v6324_v42, %v2374_v56 }
 0xc6f   :  { %5125 = vpow2.f32 %v2395_v34 }
 0xc70   :  { %v2397_v6 = vmul.f32 1.442695, %v2385_v58  ;;  %v2399_v35 = vmul.f32 1.442695, %v2386_v7 }
 0xc71   :  { %v2377_v33 = vpop.xlane.xlu0 %2376  ;;  %v2380_v49 = vpop.xlane.xlu1 %2379 }
 0xc72   :  { %5127 = vpow2.f32 %v2397_v6  ;;  %v2387_v46 = vsub.f32 %v6347_v38, %v2377_v33  ;;  %v2388_v43 = vsub.f32 %v6338_v3, %v2380_v49 }
 0xc73   :  { %5129 = vpow2.f32 %v2399_v35 }
 0xc74   :  { %v2401_v13 = vmul.f32 1.442695, %v2387_v46  ;;  %v2403_v39 = vmul.f32 1.442695, %v2388_v43 }
 0xc75   :  { %v6401_v31 = vpop.eup %5119 }
 0xc76   :  { %5131 = vpow2.f32 %v2401_v13  ;;  %v2408_v25 = vsel %vm187_vm0, %v6401_v31, 0.0 }
 0xc77   :  { %v6405_v42 = vpop.eup %5121  ;;  %5133 = vpow2.f32 %v2403_v39  ;;  %2409 = vadd.xlane.f32.xlu1 %v2408_v25 }
 0xc78   :  { %v2405_v37 = vsel %vm187_vm0, %v6405_v42, 0.0 }
 0xc79   :  { %2406 = vadd.xlane.f32.xlu0 %v2405_v37 }
 0xc7b   :  { %v6409_v38 = vpop.eup %5123 }
 0xc7c   :  { %v6411_v3 = vpop.eup %5125  ;;  %v2411_v41 = vsel %vm187_vm0, %v6409_v38, 0.0 }
 0xc7d   :  { %2412 = vadd.xlane.f32.xlu0 %v2411_v41  ;;  %v2414_v28 = vsel %vm187_vm0, %v6411_v3, 0.0 }
 0xc7e   :  { %2415 = vadd.xlane.f32.xlu1 %v2414_v28 }
 0xc7f   :  { %v6417_v5 = vpop.eup %5127 }
 0xc80   :  { %v6419_v51 = vpop.eup %5129  ;;  %v2417_v44 = vsel %vm187_vm0, %v6417_v5, 0.0 }
 0xc81   :  { %2418 = vadd.xlane.f32.xlu0 %v2417_v44  ;;  %v2420_v47 = vsel %vm187_vm0, %v6419_v51, 0.0 }
 0xc82   :  { %2421 = vadd.xlane.f32.xlu1 %v2420_v47 }
 0xc83   :  { %v6425_v8 = vpop.eup %5131  ;;  %v2772_v48 = vpop.xlane.xlu1 %2771 }
 0xc84   :  { %v6427_v52 = vpop.eup %5133  ;;  %v2792_v11 = vsub.f32 %v6353_v30, %v2772_v48  ;;  %v2423_v40 = vsel %vm187_vm0, %v6425_v8, 0.0  ;;  %v4179_v48 = vld [vmem:[%s6864_s4 + $0xd8] sm:$0xff] }
 0xc85   :  { %v2769_v18 = vpop.xlane.xlu0 %2768  ;;  %2424 = vadd.xlane.f32.xlu0 %v2423_v40  ;;  %v2426_v45 = vsel %vm187_vm0, %v6427_v52, 0.0  ;;  %4892 = vmatprep.subr.mxu1 %v4179_v48 }
 0xc86   :  { %v2801_v17 = vmul.f32 1.442695, %v2792_v11  ;;  %v2791_v26 = vsub.f32 %v6355_v57, %v2769_v18  ;;  %2427 = vadd.xlane.f32.xlu1 %v2426_v45  ;;  %v4178_v11 = vld [vmem:[%s6864_s4 + $0xd0] sm:$0xff]  ;;  %4893 = vmatpush3.msra.mxu1 %v4179_v48 }
 0xc87   :  { %v2778_v12 = vpop.xlane.xlu1 %2777  ;;  %4894 = vmatprep.subr.mxu1 %v4178_v11 }
 0xc88   :  { %5135 = vpow2.f32 %v2801_v17  ;;  %v2799_v50 = vmul.f32 1.442695, %v2791_v26  ;;  %v2794_v62 = vsub.f32 %v6359_v14, %v2778_v12  ;;  %4895 = vmatpush3.msra.mxu1 %v4178_v11 }
 0xc89   :  { %v2775_v2 = vpop.xlane.xlu0 %2774 }
 0xc8a   :  { %5137 = vpow2.f32 %v2799_v50  ;;  %v2805_v30 = vmul.f32 1.442695, %v2794_v62  ;;  %v2793_v60 = vsub.f32 %v6363_v36, %v2775_v2 }
 0xc8b   :  { %v2784_v24 = vpop.xlane.xlu1 %2783 }
 0xc8c   :  { %5139 = vpow2.f32 %v2805_v30  ;;  %v2803_v63 = vmul.f32 1.442695, %v2793_v60  ;;  %v2796_v16 = vsub.f32 %v6367_v1, %v2784_v24 }
 0xc8d   :  { %v2781_v34 = vpop.xlane.xlu0 %2780 }
 0xc8e   :  { %5141 = vpow2.f32 %v2803_v63  ;;  %v2809_v9 = vmul.f32 1.442695, %v2796_v16  ;;  %v2795_v57 = vsub.f32 %v6371_v27, %v2781_v34 }
 0xc8f   :  { %v2790_v56 = vpop.xlane.xlu1 %2789 }
 0xc90   :  { %5143 = vpow2.f32 %v2809_v9  ;;  %v2807_v58 = vmul.f32 1.442695, %v2795_v57  ;;  %v2798_v14 = vsub.f32 %v6375_v10, %v2790_v56 }
 0xc91   :  { %v2787_v7 = vpop.xlane.xlu0 %2786 }
 0xc92   :  { %5145 = vpow2.f32 %v2807_v58  ;;  %v2813_v6 = vmul.f32 1.442695, %v2798_v14  ;;  %v2797_v36 = vsub.f32 %v6379_v15, %v2787_v7 }
 0xc93   :  { %v6483_v40 = vpop.permute.xlu1 %2893 }
 0xc94   :  { %5147 = vpow2.f32 %v2813_v6  ;;  %v2811_v35 = vmul.f32 1.442695, %v2797_v36 }
 0xc95   :  { %v6441_v33 = vpop.eup %5135  ;;  %v6485_v18 = vpop.permute.xlu0 %2891 }
 0xc96   :  { %5149 = vpow2.f32 %v2811_v35  ;;  %v2818_v1 = vsel %vm187_vm0, %v6441_v33, 0.0 }
 0xc97   :  { %v6445_v49 = vpop.eup %5137  ;;  %2819 = vadd.xlane.f32.xlu1 %v2818_v1 }
 0xc98   :  { %v2815_v27 = vsel %vm187_vm0, %v6445_v49, 0.0 }
 0xc99   :  { %v6449_v10 = vpop.eup %5139  ;;  %2816 = vadd.xlane.f32.xlu0 %v2815_v27 }
 0xc9a   :  { %v2824_v15 = vsel %vm187_vm0, %v6449_v10, 0.0 }
 0xc9b   :  { %v6453_v46 = vpop.eup %5141  ;;  %2825 = vadd.xlane.f32.xlu1 %v2824_v15 }
 0xc9c   :  { %v2821_v43 = vsel %vm187_vm0, %v6453_v46, 0.0 }
 0xc9d   :  { %v6457_v13 = vpop.eup %5143  ;;  %2822 = vadd.xlane.f32.xlu0 %v2821_v43 }
 0xc9e   :  { %v2830_v39 = vsel %vm187_vm0, %v6457_v13, 0.0 }
 0xc9f   :  { %v6461_v25 = vpop.eup %5145  ;;  %2831 = vadd.xlane.f32.xlu1 %v2830_v39 }
 0xca0   :  { %v2827_v37 = vsel %vm187_vm0, %v6461_v25, 0.0 }
 0xca1   :  { %v6465_v41 = vpop.eup %5147  ;;  %2828 = vadd.xlane.f32.xlu0 %v2827_v37 }
 0xca2   :  { %v2836_v28 = vsel %vm187_vm0, %v6465_v41, 0.0 }
 0xca3   :  { %v6469_v44 = vpop.eup %5149  ;;  %2837 = vadd.xlane.f32.xlu1 %v2836_v28 }
 0xca4   :  { %v2833_v47 = vsel %vm187_vm0, %v6469_v44, 0.0 }
 0xca5   :  { %2834 = vadd.xlane.f32.xlu0 %v2833_v47 }
 0xcb4   :  { %2889 = vrot.lane.b32.xlu1 %v6190_v32, %s5228_s30 }
 0xcbb   :  { %2887 = vrot.lane.b32.xlu0 %v6198_v21, %s5228_s30 }
 0xd00   :  { %v2410_v32 = vpop.xlane.xlu1 %2409 }
 0xd01   :  { %5151 = vrcp.f32 %v2410_v32 }
 0xd02   :  { %v2407_v45 = vpop.xlane.xlu0 %2406 }
 0xd03   :  { %5153 = vrcp.f32 %v2407_v45 }
 0xd06   :  { %v2413_v21 = vpop.xlane.xlu0 %2412 }
 0xd07   :  { %5155 = vrcp.f32 %v2413_v21  ;;  %v2416_v17 = vpop.xlane.xlu1 %2415 }
 0xd08   :  { %5157 = vrcp.f32 %v2416_v17 }
 0xd0a   :  { %v2419_v26 = vpop.xlane.xlu0 %2418 }
 0xd0b   :  { %5159 = vrcp.f32 %v2419_v26  ;;  %v2422_v12 = vpop.xlane.xlu1 %2421 }
 0xd0c   :  { %5161 = vrcp.f32 %v2422_v12 }
 0xd0e   :  { %v5152_v50 = vpop.eup %5151  ;;  %v2425_v62 = vpop.xlane.xlu0 %2424 }
 0xd0f   :  { %v2438_v2 = vmul.f32 %v5152_v50, %v2410_v32  ;;  %5163 = vrcp.f32 %v2425_v62  ;;  %v2428_v30 = vpop.xlane.xlu1 %2427 }
 0xd10   :  { %v5154_v60 = vpop.eup %5153  ;;  %5165 = vrcp.f32 %v2428_v30 }
 0xd11   :  { %v2446_v24 = vsub.f32 2.0, %v2438_v2  ;;  %v2437_v63 = vmul.f32 %v5154_v60, %v2407_v45 }
 0xd13   :  { %v2445_v16 = vsub.f32 2.0, %v2437_v63  ;;  %v2454_v9 = vmul.f32 %v5152_v50, %v2446_v24 }
 0xd14   :  { %v5156_v34 = vpop.eup %5155 }
 0xd15   :  { %v5158_v57 = vpop.eup %5157  ;;  %v2453_v56 = vmul.f32 %v5154_v60, %v2445_v16  ;;  %v2439_v58 = vmul.f32 %v5156_v34, %v2413_v21  ;;  %v2462_v35 = vmul.f32 %v6401_v31, %v2454_v9 }
 0xd16   :  { %v2440_v14 = vmul.f32 %v5158_v57, %v2416_v17 }
 0xd17   :  { %v2461_v7 = vmul.f32 %v6405_v42, %v2453_v56  ;;  %v2447_v6 = vsub.f32 2.0, %v2439_v58 }
 0xd18   :  { %v5160_v36 = vpop.eup %5159  ;;  %v2448_v1 = vsub.f32 2.0, %v2440_v14 }
 0xd19   :  { %v5162_v27 = vpop.eup %5161  ;;  %v2455_v15 = vmul.f32 %v5156_v34, %v2447_v6  ;;  %v2441_v43 = vmul.f32 %v5160_v36, %v2419_v26  ;;  %4804 = vmatprep.mubr.msk.f32.mxu0 %vm187_vm0, %v2461_v7 }
 0xd1a   :  { %v2456_v39 = vmul.f32 %v5158_v57, %v2448_v1  ;;  %v2442_v37 = vmul.f32 %v5162_v27, %v2422_v12  ;;  %4805 = vmatmul.mubr.msk.f32.vlgmr.msra.gmra.mxu0 %vm187_vm0, %v2462_v35 }
 0xd1b   :  { %v2463_v28 = vmul.f32 %v6409_v38, %v2455_v15  ;;  %v2449_v47 = vsub.f32 2.0, %v2441_v43  ;;  %4845 = vmatpush3.msra.mxu0 %v6282_v29 }
 0xd1c   :  { %v5164_v42 = vpop.eup %5163  ;;  %v2464_v48 = vmul.f32 %v6411_v3, %v2456_v39  ;;  %v2450_v11 = vsub.f32 2.0, %v2442_v37  ;;  %4846 = vmatprep.subr.mxu0 %v6389_v20 }
 0xd1d   :  { %v5166_v31 = vpop.eup %5165  ;;  %v2457_v32 = vmul.f32 %v5160_v36, %v2449_v47  ;;  %v2443_v45 = vmul.f32 %v5164_v42, %v2425_v62  ;;  %4847 = vmatpush3.msra.mxu0 %v6389_v20  ;;  %4807 = vmatprep.mubr.msk.f32.mxu0 %vm187_vm0, %v2463_v28 }
 0xd1e   :  { %v2458_v21 = vmul.f32 %v5162_v27, %v2450_v11  ;;  %v2444_v17 = vmul.f32 %v5166_v31, %v2428_v30  ;;  %4848 = vmatprep.subr.mxu0 %v6391_v0  ;;  %4808 = vmatmul.mubr.msk.f32.gmra.mxu0 %vm187_vm0, %v2464_v48 }
 0xd1f   :  { %v2465_v29 = vmul.f32 %v6417_v5, %v2457_v32  ;;  %v2451_v38 = vsub.f32 2.0, %v2443_v45  ;;  %4849 = vmatpush3.msra.mxu0 %v6391_v0 }
 0xd20   :  { %v2466_v3 = vmul.f32 %v6419_v51, %v2458_v21  ;;  %v2452_v26 = vsub.f32 2.0, %v2444_v17  ;;  %4850 = vmatprep.subr.mxu0 %v6278_v4  ;;  %v2820_v12 = vpop.xlane.xlu1 %2819 }
 0xd21   :  { %v2459_v20 = vmul.f32 %v5164_v42, %v2451_v38  ;;  %4851 = vmatpush3.msra.mxu0 %v6278_v4  ;;  %5167 = vrcp.f32 %v2820_v12  ;;  %4810 = vmatprep.mubr.msk.f32.mxu0 %vm187_vm0, %v2465_v29 }
 0xd22   :  { %v2460_v50 = vmul.f32 %v5166_v31, %v2452_v26  ;;  %4852 = vmatprep.subr.mxu0 %v6483_v40  ;;  %v2817_v62 = vpop.xlane.xlu0 %2816  ;;  %4811 = vmatmul.mubr.msk.f32.gmra.mxu0 %vm187_vm0, %v2466_v3 }
 0xd23   :  { %v2467_v0 = vmul.f32 %v6425_v8, %v2459_v20  ;;  %5169 = vrcp.f32 %v2817_v62  ;;  %4853 = vmatpush3.msra.mxu0 %v6483_v40 }
 0xd24   :  { %v2468_v5 = vmul.f32 %v6427_v52, %v2460_v50  ;;  %4854 = vmatprep.subr.mxu0 %v6485_v18  ;;  %v2826_v51 = vpop.xlane.xlu1 %2825  ;;  %v4181_v50 = vld [vmem:[%s6864_s4 + $0xe8] sm:$0xff] }
 0xd25   :  { %4855 = vmatpush3.msra.mxu0 %v6485_v18  ;;  %5171 = vrcp.f32 %v2826_v51  ;;  %4813 = vmatprep.mubr.msk.f32.mxu0 %vm187_vm0, %v2467_v0 }
 0xd26   :  { %v2823_v4 = vpop.xlane.xlu0 %2822  ;;  %4814 = vmatmul.mubr.msk.f32.gmra.mxu0 %vm187_vm0, %v2468_v5 }
 0xd27   :  { %5173 = vrcp.f32 %v2823_v4 }
 0xd28   :  { %v2832_v2 = vpop.xlane.xlu1 %2831 }
 0xd29   :  { %5175 = vrcp.f32 %v2832_v2 }
 0xd2a   :  { %v2829_v8 = vpop.xlane.xlu0 %2828 }
 0xd2b   :  { %5177 = vrcp.f32 %v2829_v8 }
 0xd2c   :  { %v2838_v30 = vpop.xlane.xlu1 %2837 }
 0xd2d   :  { %5179 = vrcp.f32 %v2838_v30 }
 0xd2e   :  { %v5168_v40 = vpop.eup %5167  ;;  %v2835_v52 = vpop.xlane.xlu0 %2834 }
 0xd2f   :  { %v2848_v60 = vmul.f32 %v5168_v40, %v2820_v12  ;;  %5181 = vrcp.f32 %v2835_v52 }
 0xd30   :  { %v5170_v24 = vpop.eup %5169  ;;  %v2890_v63 = vpop.permute.xlu1 %2889 }
 0xd31   :  { %v2856_v18 = vsub.f32 2.0, %v2848_v60  ;;  %v2847_v16 = vmul.f32 %v5170_v24, %v2817_v62  ;;  %4856 = vmatprep.subr.mxu0 %v2890_v63  ;;  %v4180_v62 = vld [vmem:[%s6864_s4 + $0xe0] sm:$0xff] }
 0xd32   :  { %v5172_v34 = vpop.eup %5171  ;;  %v2888_v9 = vpop.permute.xlu0 %2887  ;;  %4857 = vmatpush3.msra.mxu0 %v2890_v63 }
 0xd33   :  { %v2855_v57 = vsub.f32 2.0, %v2847_v16  ;;  %v2850_v56 = vmul.f32 %v5172_v34, %v2826_v51  ;;  %4858 = vmatprep.subr.mxu0 %v2888_v9  ;;  %v2864_v14 = vmul.f32 %v5168_v40, %v2856_v18 }
 0xd34   :  { %v5174_v58 = vpop.eup %5173  ;;  %4859 = vmatpush3.msra.mxu0 %v2888_v9 }
 0xd35   :  { %v2863_v7 = vmul.f32 %v5170_v24, %v2855_v57  ;;  %v2858_v6 = vsub.f32 2.0, %v2850_v56  ;;  %v2849_v36 = vmul.f32 %v5174_v58, %v2823_v4  ;;  %v2872_v39 = vmul.f32 %v6441_v33, %v2864_v14 }
 0xd36   :  { %v5176_v35 = vpop.eup %5175 }
 0xd37   :  { %v2871_v1 = vmul.f32 %v6445_v49, %v2863_v7  ;;  %v2857_v27 = vsub.f32 2.0, %v2849_v36  ;;  %v2852_v15 = vmul.f32 %v5176_v35, %v2832_v2  ;;  %v2866_v37 = vmul.f32 %v5172_v34, %v2858_v6  ;;  %v4248_v6 = vld [vmem:[%s6862_s2 + $0xa] ss:$0 sm:$0xff] }
 0xd38   :  { %v5178_v43 = vpop.eup %5177 }
 0xd39   :  { %v2865_v28 = vmul.f32 %v5174_v58, %v2857_v27  ;;  %v2860_v47 = vsub.f32 2.0, %v2852_v15  ;;  %v2851_v42 = vmul.f32 %v5178_v43, %v2829_v8  ;;  %4860 = vmatprep.mubr.msk.f32.mxu0 %vm187_vm0, %v2871_v1  ;;  %v2874_v49 = vmul.f32 %v6449_v10, %v2866_v37 }
 0xd3a   :  { %v5180_v48 = vpop.eup %5179  ;;  %4861 = vmatmul.mubr.msk.f32.vlgmr.msra.gmra.mxu0 %vm187_vm0, %v2872_v39 }
 0xd3b   :  { %v2873_v11 = vmul.f32 %v6453_v46, %v2865_v28  ;;  %v2859_v31 = vsub.f32 2.0, %v2851_v42  ;;  %v2854_v32 = vmul.f32 %v5180_v48, %v2838_v30  ;;  %v2868_v21 = vmul.f32 %v5176_v35, %v2860_v47 }
 0xd3c   :  { %v5182_v45 = vpop.eup %5181 }
 0xd3d   :  { %v2867_v17 = vmul.f32 %v5178_v43, %v2859_v31  ;;  %v2862_v29 = vsub.f32 2.0, %v2854_v32  ;;  %v2853_v33 = vmul.f32 %v5182_v45, %v2835_v52  ;;  %4863 = vmatprep.mubr.msk.f32.mxu0 %vm187_vm0, %v2873_v11  ;;  %v2876_v26 = vmul.f32 %v6457_v13, %v2868_v21  ;;  %v4176_v13 = vld [vmem:[%s6864_s4 + $0xc0] sm:$0xff] }
 0xd3e   :  { %4864 = vmatmul.mubr.msk.f32.gmra.mxu0 %vm187_vm0, %v2874_v49 }
 0xd3f   :  { %v2875_v38 = vmul.f32 %v6461_v25, %v2867_v17  ;;  %v2861_v3 = vsub.f32 2.0, %v2853_v33  ;;  %v2870_v12 = vmul.f32 %v5180_v48, %v2862_v29  ;;  %v4177_v25 = vld [vmem:[%s6864_s4 + $0xc8] sm:$0xff] }
 0xd40   :  { %4896 = vmatprep.subr.mxu1 %v4177_v25 }
 0xd41   :  { %v2869_v46 = vmul.f32 %v5182_v45, %v2861_v3  ;;  %4866 = vmatprep.mubr.msk.f32.mxu0 %vm187_vm0, %v2875_v38  ;;  %v2878_v20 = vmul.f32 %v6465_v41, %v2870_v12  ;;  %4897 = vmatpush3.msra.mxu1 %v4177_v25  ;;  %v4183_v41 = vld [vmem:[%s6864_s4 + $0xf8] sm:$0xff] }
 0xd42   :  { %4867 = vmatmul.mubr.msk.f32.gmra.mxu0 %vm187_vm0, %v2876_v26  ;;  %4898 = vmatprep.subr.mxu1 %v4176_v13 }
 0xd43   :  { %v2877_v10 = vmul.f32 %v6469_v44, %v2869_v46  ;;  %4899 = vmatpush3.msra.mxu1 %v4176_v13  ;;  %v4182_v44 = vld [vmem:[%s6864_s4 + $0xf0] sm:$0xff]  ;;  %4872 = vmatprep.subr.mxu0 %v4183_v41 }
 0xd44   :  { %4873 = vmatpush3.msra.mxu0 %v4183_v41 }
 0xd45   :  { %4869 = vmatprep.mubr.msk.f32.mxu0 %vm187_vm0, %v2877_v10  ;;  %4874 = vmatprep.subr.mxu0 %v4182_v44 }
 0xd46   :  { %4870 = vmatmul.mubr.msk.f32.gmra.mxu0 %vm187_vm0, %v2878_v20 }
 0xd47   :  { %4875 = vmatpush3.msra.mxu0 %v4182_v44 }
 0xd48   :  { %4876 = vmatprep.subr.mxu0 %v4181_v50 }
 0xd49   :  { %4877 = vmatpush3.msra.mxu0 %v4181_v50 }
 0xd4a   :  { %4878 = vmatprep.subr.mxu0 %v4180_v62 }
 0xd4b   :  { %4879 = vmatpush3.msra.mxu0 %v4180_v62 }
 0xdda   :  { %v4806_v0 = vpop.f32.mrf.mxu0 }
 0xddc   :  { %v2559_v5 = vpop.f32.mrf.mxu0 }
 0xddd   :  { %4900 = vmatprep.mubr.msk.f32.mxu1 %vm357_vm1, %v2559_v5 }
 0xdde   :  { %v4809_v51 = vpop.f32.mrf.mxu0  ;;  %4901 = vmatmul.mubr.msk.f32.vlgmr.msra.gmra.mxu1 %vm357_vm1, %v4806_v0 }
 0xde0   :  { %v2569_v4 = vpop.f32.mrf.mxu0 }
 0xde1   :  { %4903 = vmatprep.mubr.msk.f32.mxu1 %vm357_vm1, %v2569_v4 }
 0xde2   :  { %v4812_v2 = vpop.f32.mrf.mxu0  ;;  %4904 = vmatmul.mubr.msk.f32.gmra.mxu1 %vm357_vm1, %v4809_v51 }
 0xde4   :  { %v2579_v8 = vpop.f32.mrf.mxu0 }
 0xde5   :  { %4906 = vmatprep.mubr.msk.f32.mxu1 %vm357_vm1, %v2579_v8 }
 0xde6   :  { %v4815_v30 = vpop.f32.mrf.mxu0  ;;  %4907 = vmatmul.mubr.msk.f32.gmra.mxu1 %vm357_vm1, %v4812_v2 }
 0xde8   :  { %v2589_v40 = vpop.f32.mrf.mxu0 }
 0xde9   :  { %4909 = vmatprep.mubr.msk.f32.mxu1 %vm357_vm1, %v2589_v40 }
 0xdea   :  { %4910 = vmatmul.mubr.msk.f32.gmra.mxu1 %vm357_vm1, %v4815_v30 }
 0xdfa   :  { %v4862_v52 = vpop.f32.mrf.mxu0 }
 0xdfc   :  { %v3001_v60 = vpop.f32.mrf.mxu0 }
 0xdfd   :  { %4880 = vmatprep.mubr.msk.f32.mxu0 %vm357_vm1, %v3001_v60 }
 0xdfe   :  { %v4865_v24 = vpop.f32.mrf.mxu0  ;;  %4881 = vmatmul.mubr.msk.f32.vlgmr.msra.gmra.mxu0 %vm357_vm1, %v4862_v52 }
 0xe00   :  { %v3011_v63 = vpop.f32.mrf.mxu0 }
 0xe01   :  { %4883 = vmatprep.mubr.msk.f32.mxu0 %vm357_vm1, %v3011_v63 }
 0xe02   :  { %v4868_v18 = vpop.f32.mrf.mxu0  ;;  %4884 = vmatmul.mubr.msk.f32.gmra.mxu0 %vm357_vm1, %v4865_v24 }
 0xe04   :  { %v3021_v16 = vpop.f32.mrf.mxu0 }
 0xe05   :  { %4886 = vmatprep.mubr.msk.f32.mxu0 %vm357_vm1, %v3021_v16 }
 0xe06   :  { %v4871_v34 = vpop.f32.mrf.mxu0  ;;  %4887 = vmatmul.mubr.msk.f32.gmra.mxu0 %vm357_vm1, %v4868_v18 }
 0xe08   :  { %v3031_v9 = vpop.f32.mrf.mxu0 }
 0xe09   :  { %4889 = vmatprep.mubr.msk.f32.mxu0 %vm357_vm1, %v3031_v9 }
 0xe0a   :  { %4890 = vmatmul.mubr.msk.f32.gmra.mxu0 %vm357_vm1, %v4871_v34 }
 0xe9e   :  { %v4902_v57 = vpop.f32.mrf.mxu1 }
 0xea0   :  { %v3259_v56 = vpop.f32.mrf.mxu1 }
 0xea2   :  { %v4905_v58 = vpop.f32.mrf.mxu1 }
 0xea4   :  { %v3269_v14 = vpop.f32.mrf.mxu1 }
 0xea6   :  { %v4908_v35 = vpop.f32.mrf.mxu1 }
 0xea8   :  { %v3279_v47 = vpop.f32.mrf.mxu1 }
 0xeaa   :  { %v4911_v33 = vpop.f32.mrf.mxu1 }
 0xeac   :  { %v3289_v13 = vpop.f32.mrf.mxu1 }
 0xebe   :  { %v4882_v7 = vpop.f32.mrf.mxu0 }
 0xebf   :  { %v3265_v36 = vadd.f32 %v4902_v57, %v4882_v7 }
 0xec0   :  { %v3130_v1 = vpop.f32.mrf.mxu0 }
 0xec1   :  { %v3304_v27 = vadd.f32 %v4248_v6, %v3265_v36  ;;  %v3260_v15 = vadd.f32 %v3259_v56, %v3130_v1 }
 0xec2   :  { %v4885_v43 = vpop.f32.mrf.mxu0 }
 0xec3   :  { %v3303_v39 = vadd.f32 %v4248_v6, %v3260_v15  ;;  %v3275_v37 = vadd.f32 %v4905_v58, %v4885_v43  ;;  %v3312_v28 = vadd.f32 %v3304_v27, %v6106_v19 }
 0xec4   :  { %v3140_v42 = vpop.f32.mrf.mxu0 }
 0xec5   :  { %v3306_v48 = vadd.f32 %v4248_v6, %v3275_v37  ;;  %v3270_v11 = vadd.f32 %v3269_v14, %v3140_v42  ;;  %v3324_v31 = vsel %vm187_vm0, %v3312_v28, 0.0  ;;  %v3311_v32 = vadd.f32 %v3303_v39, %v6100_v22 }
 0xec6   :  { %3325 = vadd.xlane.f32.xlu0 %v3324_v31  ;;  %v4888_v45 = vpop.f32.mrf.mxu0 }
 0xec7   :  { %v3305_v49 = vadd.f32 %v4248_v6, %v3270_v11  ;;  %v3285_v21 = vadd.f32 %v4908_v35, %v4888_v45  ;;  %v3321_v17 = vsel %vm187_vm0, %v3311_v32, 0.0  ;;  %v3314_v29 = vadd.f32 %v3306_v48, %v6118_v61 }
 0xec8   :  { %3322 = vadd.xlane.f32.xlu1 %v3321_v17  ;;  %v3150_v38 = vpop.f32.mrf.mxu0 }
 0xec9   :  { %v3308_v19 = vadd.f32 %v4248_v6, %v3285_v21  ;;  %v3280_v3 = vadd.f32 %v3279_v47, %v3150_v38  ;;  %v3313_v26 = vadd.f32 %v3305_v49, %v6112_v54  ;;  %v3330_v46 = vsel %vm187_vm0, %v3314_v29, 0.0  ;;  %v4256_v38 = vld [vmem:[%s6864_s4 + $0x128] sm:$0xff] }
 0xeca   :  { %v4891_v12 = vpop.f32.mrf.mxu0 }
 0xecb   :  { %v3307_v10 = vadd.f32 %v4248_v6, %v3280_v3  ;;  %v3295_v22 = vadd.f32 %v4911_v33, %v4891_v12  ;;  %v3327_v20 = vsel %vm187_vm0, %v3313_v26, 0.0  ;;  %v3316_v25 = vadd.f32 %v3308_v19, %v6130_v23  ;;  %v4257_v33 = vld [vmem:[%s6864_s4 + $0x130] sm:$0xff]  ;;  %v4255_v19 = vld [vmem:[%s6864_s4 + $0x120] sm:$0xff]  ;;  %v4254_v3 = vld [vmem:[%s6864_s4 + $0x118] sm:$0xff] }
 0xecc   :  { %3331 = vadd.xlane.f32.xlu1 %v3330_v46  ;;  %3328 = vadd.xlane.f32.xlu0 %v3327_v20  ;;  %v3160_v61 = vpop.f32.mrf.mxu0  ;;  %v4252_v12 = vld [vmem:[%s6864_s4 + $0x108] sm:$0xff]  ;;  %v4251_v46 = vld [vmem:[%s6864_s4 + $0x100] sm:$0xff] }
 0xecd   :  { %v3310_v41 = vadd.f32 %v4248_v6, %v3295_v22  ;;  %v3290_v44 = vadd.f32 %v3289_v13, %v3160_v61  ;;  %v3315_v50 = vadd.f32 %v3307_v10, %v6124_v59  ;;  %v3336_v54 = vsel %vm187_vm0, %v3316_v25, 0.0  ;;  %v4275_v10 = vld [vmem:[%s6864_s4 + $0x178] sm:$0xff]  ;;  %v4274_v22 = vld [vmem:[%s6864_s4 + $0x170] sm:$0xff]  ;;  %v4273_v20 = vld [vmem:[%s6864_s4 + $0x168] sm:$0xff] }
 0xece   :  { %4940 = vmatprep.subr.mxu1 %v4275_v10  ;;  %v4271_v13 = vld [vmem:[%s6864_s4 + $0x158] sm:$0xff] }
 0xecf   :  { %v3309_v62 = vadd.f32 %v4248_v6, %v3290_v44  ;;  %v3333_v0 = vsel %vm187_vm0, %v3315_v50, 0.0  ;;  %v3318_v5 = vadd.f32 %v3310_v41, %v6141_v55  ;;  %4941 = vmatpush3.msra.mxu1 %v4275_v10 }
 0xed0   :  { %3337 = vadd.xlane.f32.xlu1 %v3336_v54  ;;  %3334 = vadd.xlane.f32.xlu0 %v3333_v0 }
 0xed1   :  { %v3317_v51 = vadd.f32 %v3309_v62, %v6136_v53  ;;  %v3342_v23 = vsel %vm187_vm0, %v3318_v5, 0.0  ;;  %4942 = vmatprep.subr.mxu1 %v4274_v22 }
 0xed2   :  { %4943 = vmatpush3.msra.mxu1 %v4274_v22  ;;  %v4268_v22 = vld [vmem:[%s6864_s4 + $0x140] sm:$0xff] }
 0xed3   :  { %v3339_v4 = vsel %vm187_vm0, %v3317_v51, 0.0  ;;  %4944 = vmatprep.subr.mxu1 %v4273_v20 }
 0xed4   :  { %3343 = vadd.xlane.f32.xlu1 %v3342_v23  ;;  %3340 = vadd.xlane.f32.xlu0 %v3339_v4 }
 0xed5   :  { %4945 = vmatpush3.msra.mxu1 %v4273_v20  ;;  %v4259_v20 = vld [vmem:[%s6862_s2 + $0xb] ss:$0 sm:$0xff] }
 0xf4f   :  { %v3326_v2 = vpop.xlane.xlu0 %3325 }
 0xf50   :  { %v3346_v8 = vmul.f32 0.015625, %v3326_v2 }
 0xf51   :  { %v3323_v59 = vpop.xlane.xlu1 %3322 }
 0xf52   :  { %v6583_v30 = vsub.f32 %v3312_v28, %v3346_v8  ;;  %v3345_v40 = vmul.f32 0.015625, %v3323_v59 }
 0xf54   :  { %v6585_v52 = vsub.f32 %v3311_v32, %v3345_v40  ;;  %v3362_v55 = vmul.f32 %v6583_v30, %v6583_v30 }
 0xf55   :  { %v3332_v60 = vpop.xlane.xlu1 %3331  ;;  %v3329_v24 = vpop.xlane.xlu0 %3328 }
 0xf56   :  { %v3348_v53 = vmul.f32 0.015625, %v3332_v60  ;;  %v3347_v63 = vmul.f32 0.015625, %v3329_v24  ;;  %v3372_v18 = vsel %vm187_vm0, %v3362_v55, 0.0  ;;  %v3361_v16 = vmul.f32 %v6585_v52, %v6585_v52 }
 0xf57   :  { %3373 = vadd.xlane.f32.xlu1 %v3372_v18 }
 0xf58   :  { %v6592_v34 = vsub.f32 %v3314_v29, %v3348_v53  ;;  %v6594_v9 = vsub.f32 %v3313_v26, %v3347_v63  ;;  %v3369_v57 = vsel %vm187_vm0, %v3361_v16, 0.0  ;;  %v4258_v29 = vld [vmem:[%s6864_s4 + $0x138] sm:$0xff]  ;;  %v4253_v26 = vld [vmem:[%s6864_s4 + $0x110] sm:$0xff] }
 0xf59   :  { %v3338_v56 = vpop.xlane.xlu1 %3337  ;;  %v3335_v58 = vpop.xlane.xlu0 %3334  ;;  %3370 = vadd.xlane.f32.xlu0 %v3369_v57  ;;  %4912 = vmatprep.subr.mxu0 %v4258_v29 }
 0xf5a   :  { %v3350_v14 = vmul.f32 0.015625, %v3338_v56  ;;  %v3349_v7 = vmul.f32 0.015625, %v3335_v58  ;;  %v3364_v6 = vmul.f32 %v6592_v34, %v6592_v34  ;;  %v3363_v36 = vmul.f32 %v6594_v9, %v6594_v9  ;;  %4913 = vmatpush3.msra.mxu0 %v4258_v29 }
 0xf5b   :  { %4914 = vmatprep.subr.mxu0 %v4257_v33 }
 0xf5c   :  { %v6601_v35 = vsub.f32 %v3316_v25, %v3350_v14  ;;  %v6603_v1 = vsub.f32 %v3315_v50, %v3349_v7  ;;  %v3378_v27 = vsel %vm187_vm0, %v3364_v6, 0.0  ;;  %v3375_v15 = vsel %vm187_vm0, %v3363_v36, 0.0  ;;  %4915 = vmatpush3.msra.mxu0 %v4257_v33  ;;  %v4272_v25 = vld [vmem:[%s6864_s4 + $0x160] sm:$0xff]  ;;  %v4249_v14 = vld [vmem:[%s6862_s2 + $0xd] ss:$0 sm:$0xff] }
 0xf5d   :  { %3379 = vadd.xlane.f32.xlu1 %v3378_v27  ;;  %v3344_v43 = vpop.xlane.xlu1 %3343  ;;  %3376 = vadd.xlane.f32.xlu0 %v3375_v15  ;;  %v3341_v39 = vpop.xlane.xlu0 %3340  ;;  %v4250_v15 = vld [vmem:[%s6862_s2 + $0xe] ss:$0 sm:$0xff] }
 0xf5e   :  { %v3352_v37 = vmul.f32 0.015625, %v3344_v43  ;;  %v3351_v28 = vmul.f32 0.015625, %v3341_v39  ;;  %v3366_v47 = vmul.f32 %v6601_v35, %v6601_v35  ;;  %v3365_v42 = vmul.f32 %v6603_v1, %v6603_v1  ;;  %4916 = vmatprep.subr.mxu0 %v4256_v38  ;;  %4946 = vmatprep.subr.mxu1 %v4272_v25 }
 0xf5f   :  { %4917 = vmatpush3.msra.mxu0 %v4256_v38  ;;  %4947 = vmatpush3.msra.mxu1 %v4272_v25 }
 0xf60   :  { %v6611_v48 = vsub.f32 %v3318_v5, %v3352_v37  ;;  %v6613_v11 = vsub.f32 %v3317_v51, %v3351_v28  ;;  %v3384_v31 = vsel %vm187_vm0, %v3366_v47, 0.0  ;;  %v3381_v32 = vsel %vm187_vm0, %v3365_v42, 0.0  ;;  %4918 = vmatprep.subr.mxu0 %v4255_v19  ;;  %4948 = vmatprep.subr.mxu1 %v4271_v13 }
 0xf61   :  { %3385 = vadd.xlane.f32.xlu1 %v3384_v31  ;;  %3382 = vadd.xlane.f32.xlu0 %v3381_v32 }
 0xf62   :  { %v3368_v45 = vmul.f32 %v6611_v48, %v6611_v48  ;;  %v3367_v49 = vmul.f32 %v6613_v11, %v6613_v11  ;;  %4919 = vmatpush3.msra.mxu0 %v4255_v19  ;;  %4949 = vmatpush3.msra.mxu1 %v4271_v13 }
 0xf63   :  { %4920 = vmatprep.subr.mxu0 %v4254_v3 }
 0xf64   :  { %v3390_v21 = vsel %vm187_vm0, %v3368_v45, 0.0  ;;  %v3387_v17 = vsel %vm187_vm0, %v3367_v49, 0.0  ;;  %4921 = vmatpush3.msra.mxu0 %v4254_v3 }
 0xf65   :  { %3391 = vadd.xlane.f32.xlu1 %v3390_v21  ;;  %3388 = vadd.xlane.f32.xlu0 %v3387_v17 }
 0xf66   :  { %4922 = vmatprep.subr.mxu0 %v4253_v26 }
 0xf67   :  { %4923 = vmatpush3.msra.mxu0 %v4253_v26 }
 0xf68   :  { %4924 = vmatprep.subr.mxu0 %v4252_v12 }
 0xf69   :  { %4925 = vmatpush3.msra.mxu0 %v4252_v12 }
 0xf6a   :  { %4926 = vmatprep.subr.mxu0 %v4251_v46 }
 0xf6b   :  { %4927 = vmatpush3.msra.mxu0 %v4251_v46 }
 0xfe0   :  { %v3374_v61 = vpop.xlane.xlu1 %3373 }
 0xfe1   :  { %v3394_v41 = vmul.f32 0.015625, %v3374_v61 }
 0xfe2   :  { %v3371_v44 = vpop.xlane.xlu0 %3370 }
 0xfe3   :  { %v3402_v50 = vadd.f32 1e-05, %v3394_v41  ;;  %v3393_v62 = vmul.f32 0.015625, %v3371_v44 }
 0xfe5   :  { %5183 = vrsqrt.f32 %v3402_v50  ;;  %v3401_v54 = vadd.f32 1e-05, %v3393_v62 }
 0xfe6   :  { %v3380_v0 = vpop.xlane.xlu1 %3379  ;;  %v3377_v5 = vpop.xlane.xlu0 %3376 }
 0xfe7   :  { %5185 = vrsqrt.f32 %v3401_v54  ;;  %v3396_v51 = vmul.f32 0.015625, %v3380_v0  ;;  %v3395_v23 = vmul.f32 0.015625, %v3377_v5 }
 0xfe9   :  { %v3404_v4 = vadd.f32 1e-05, %v3396_v51  ;;  %v3403_v2 = vadd.f32 1e-05, %v3395_v23 }
 0xfea   :  { %v3386_v8 = vpop.xlane.xlu1 %3385  ;;  %v3383_v59 = vpop.xlane.xlu0 %3382 }
 0xfeb   :  { %5187 = vrsqrt.f32 %v3404_v4  ;;  %v3398_v40 = vmul.f32 0.015625, %v3386_v8  ;;  %v3397_v55 = vmul.f32 0.015625, %v3383_v59 }
 0xfec   :  { %5189 = vrsqrt.f32 %v3403_v2 }
 0xfed   :  { %v3406_v60 = vadd.f32 1e-05, %v3398_v40  ;;  %v3405_v24 = vadd.f32 1e-05, %v3397_v55 }
 0xfee   :  { %v3392_v53 = vpop.xlane.xlu1 %3391  ;;  %v3389_v63 = vpop.xlane.xlu0 %3388 }
 0xfef   :  { %5191 = vrsqrt.f32 %v3406_v60  ;;  %v3400_v18 = vmul.f32 0.015625, %v3392_v53  ;;  %v3399_v16 = vmul.f32 0.015625, %v3389_v63 }
 0xff0   :  { %5193 = vrsqrt.f32 %v3405_v24 }
 0xff1   :  { %v3408_v57 = vadd.f32 1e-05, %v3400_v18  ;;  %v3407_v56 = vadd.f32 1e-05, %v3399_v16 }
 0xff2   :  { %v5184_v58 = vpop.eup %5183 }
 0xff3   :  { %v3418_v7 = vmul.f32 %v5184_v58, %v6583_v30  ;;  %5195 = vrsqrt.f32 %v3408_v57  ;;  %v4276_v57 = vld [vmem:[%s6862_s2 + $0xc] ss:$0 sm:$0xff] }
 0xff4   :  { %v5186_v6 = vpop.eup %5185  ;;  %5197 = vrsqrt.f32 %v3407_v56 }
 0xff5   :  { %v3417_v36 = vmul.f32 %v5186_v6, %v6585_v52  ;;  %v3430_v27 = vmul.f32 %v4249_v14, %v3418_v7 }
 0xff7   :  { %v3429_v43 = vmul.f32 %v4249_v14, %v3417_v36  ;;  %v6673_v42 = vadd.f32 %v4250_v15, %v3430_v27 }
 0xff8   :  { %v5188_v39 = vpop.eup %5187 }
 0xff9   :  { %v5190_v37 = vpop.eup %5189  ;;  %v6670_v28 = vadd.f32 %v4250_v15, %v3429_v43  ;;  %v3420_v47 = vmul.f32 %v5188_v39, %v6592_v34 }
 0xffa   :  { %v3419_v30 = vmul.f32 %v5190_v37, %v6594_v9 }
 0xffb   :  { %4928 = vmatprep.mubr.msk.f32.mxu0 %vm187_vm0, %v6670_v28  ;;  %v3432_v52 = vmul.f32 %v4249_v14, %v3420_v47 }
 0xffc   :  { %v5192_v31 = vpop.eup %5191  ;;  %4929 = vmatmul.mubr.msk.f32.vlgmr.msra.gmra.mxu0 %vm187_vm0, %v6673_v42  ;;  %v3431_v32 = vmul.f32 %v4249_v14, %v3419_v30 }
 0xffd   :  { %v5194_v45 = vpop.eup %5193  ;;  %v6680_v49 = vadd.f32 %v4250_v15, %v3432_v52  ;;  %v3422_v21 = vmul.f32 %v5192_v31, %v6601_v35 }
 0xffe   :  { %v6683_v17 = vadd.f32 %v4250_v15, %v3431_v32  ;;  %v3421_v34 = vmul.f32 %v5194_v45, %v6603_v1 }
 0xfff   :  { %v3434_v29 = vmul.f32 %v4249_v14, %v3422_v21 }
0x1000   :  { %v5196_v9 = vpop.eup %5195  ;;  %4931 = vmatprep.mubr.msk.f32.mxu0 %vm187_vm0, %v6683_v17  ;;  %v3433_v33 = vmul.f32 %v4249_v14, %v3421_v34 }
0x1001   :  { %v5198_v38 = vpop.eup %5197  ;;  %4932 = vmatmul.mubr.msk.f32.gmra.mxu0 %vm187_vm0, %v6680_v49  ;;  %v6690_v19 = vadd.f32 %v4250_v15, %v3434_v29  ;;  %v3424_v3 = vmul.f32 %v5196_v9, %v6611_v48  ;;  %v4270_v48 = vld [vmem:[%s6864_s4 + $0x150] sm:$0xff] }
0x1002   :  { %v6693_v26 = vadd.f32 %v4250_v15, %v3433_v33  ;;  %v3423_v35 = vmul.f32 %v5198_v38, %v6613_v11  ;;  %4950 = vmatprep.subr.mxu1 %v4270_v48  ;;  %v4269_v11 = vld [vmem:[%s6864_s4 + $0x148] sm:$0xff] }
0x1003   :  { %v3436_v12 = vmul.f32 %v4249_v14, %v3424_v3  ;;  %4951 = vmatpush3.msra.mxu1 %v4270_v48 }
0x1004   :  { %4934 = vmatprep.mubr.msk.f32.mxu0 %vm187_vm0, %v6693_v26  ;;  %v3435_v1 = vmul.f32 %v4249_v14, %v3423_v35  ;;  %4952 = vmatprep.subr.mxu1 %v4269_v11 }
0x1005   :  { %4935 = vmatmul.mubr.msk.f32.gmra.mxu0 %vm187_vm0, %v6690_v19  ;;  %v6700_v46 = vadd.f32 %v4250_v15, %v3436_v12  ;;  %4953 = vmatpush3.msra.mxu1 %v4269_v11 }
0x1006   :  { %v6702_v10 = vadd.f32 %v4250_v15, %v3435_v1  ;;  %4954 = vmatprep.subr.mxu1 %v4268_v22 }
0x1007   :  { %4955 = vmatpush3.msra.mxu1 %v4268_v22 }
0x1008   :  { %4937 = vmatprep.mubr.msk.f32.mxu0 %vm187_vm0, %v6702_v10 }
0x1009   :  { %4938 = vmatmul.mubr.msk.f32.gmra.mxu0 %vm187_vm0, %v6700_v46 }
0x10bc   :  { %v4930_v25 = vpop.f32.mrf.mxu0 }
0x10bd   :  { %v3559_v13 = vadd.f32 %v4930_v25, %v4259_v20 }
0x10be   :  { %v3553_v61 = vpop.f32.mrf.mxu0 }
0x10bf   :  { %v3554_v41 = vadd.f32 %v4259_v20, %v3553_v61  ;;  %v3593_v62 = vmax.f32 %v3559_v13, 0.0 }
0x10c1   :  { %v3592_v44 = vmax.f32 %v3554_v41, 0.0  ;;  %v4933_v50 = vpop.f32.mrf.mxu0 }
0x10c2   :  { %v3569_v54 = vadd.f32 %v4933_v50, %v4259_v20 }
0x10c3   :  { %v3563_v0 = vpop.f32.mrf.mxu0  ;;  %4956 = vmatprep.mubr.msk.f32.mxu1 %vm187_vm0, %v3592_v44 }
0x10c4   :  { %v3564_v5 = vadd.f32 %v4259_v20, %v3563_v0  ;;  %4957 = vmatmul.mubr.msk.f32.vlgmr.msra.gmra.mxu1 %vm187_vm0, %v3593_v62  ;;  %v3595_v4 = vmax.f32 %v3569_v54, 0.0 }
0x10c5   :  { %v4936_v51 = vpop.f32.mrf.mxu0 }
0x10c6   :  { %v3594_v23 = vmax.f32 %v3564_v5, 0.0  ;;  %v3579_v2 = vadd.f32 %v4936_v51, %v4259_v20 }
0x10c7   :  { %v3573_v8 = vpop.f32.mrf.mxu0 }
0x10c8   :  { %v3574_v59 = vadd.f32 %v4259_v20, %v3573_v8  ;;  %4959 = vmatprep.mubr.msk.f32.mxu1 %vm187_vm0, %v3594_v23  ;;  %v3597_v60 = vmax.f32 %v3579_v2, 0.0 }
0x10c9   :  { %v4939_v40 = vpop.f32.mrf.mxu0  ;;  %4960 = vmatmul.mubr.msk.f32.gmra.mxu1 %vm187_vm0, %v3595_v4 }
0x10ca   :  { %v3596_v55 = vmax.f32 %v3574_v59, 0.0  ;;  %v3589_v24 = vadd.f32 %v4939_v40, %v4259_v20 }
0x10cb   :  { %v3583_v53 = vpop.f32.mrf.mxu0 }
0x10cc   :  { %v3584_v63 = vadd.f32 %v4259_v20, %v3583_v53  ;;  %4962 = vmatprep.mubr.msk.f32.mxu1 %vm187_vm0, %v3596_v55  ;;  %v3599_v16 = vmax.f32 %v3589_v24, 0.0 }
0x10cd   :  { %4963 = vmatmul.mubr.msk.f32.gmra.mxu1 %vm187_vm0, %v3597_v60 }
0x10ce   :  { %v3598_v18 = vmax.f32 %v3584_v63, 0.0 }
0x10d0   :  { %4965 = vmatprep.mubr.msk.f32.mxu1 %vm187_vm0, %v3598_v18 }
0x10d1   :  { %4966 = vmatmul.mubr.msk.f32.gmra.mxu1 %vm187_vm0, %v3599_v16 }
0x1184   :  { %v4958_v56 = vpop.f32.mrf.mxu1 }
0x1185   :  { %v3710_v58 = vadd.f32 %v4958_v56, %v4276_v57 }
0x1186   :  { %v3704_v14 = vpop.f32.mrf.mxu1 }
0x1187   :  { %v3744_v7 = vadd.f32 %v3710_v58, %v6673_v42  ;;  %v3705_v6 = vadd.f32 %v4276_v57, %v3704_v14 }
0x1189   :  { %v3743_v36 = vadd.f32 %v3705_v6, %v6670_v28  ;;  %v4961_v27 = vpop.f32.mrf.mxu1  ;;  %v3756_v15 = vsel %vm187_vm0, %v3744_v7, 0.0 }
0x118a   :  { %v3720_v43 = vadd.f32 %v4961_v27, %v4276_v57  ;;  %3757 = vadd.xlane.f32.xlu1 %v3756_v15 }
0x118b   :  { %v3714_v39 = vpop.f32.mrf.mxu1  ;;  %v3753_v37 = vsel %vm187_vm0, %v3743_v36, 0.0 }
0x118c   :  { %v3746_v47 = vadd.f32 %v3720_v43, %v6680_v49  ;;  %v3715_v30 = vadd.f32 %v4276_v57, %v3714_v39  ;;  %3754 = vadd.xlane.f32.xlu0 %v3753_v37  ;;  %v3888_v43 = vld [vmem:[%s6865_s5 + $0x38] sm:$0xff]  ;;  %v3887_v39 = vld [vmem:[%s6865_s5 + $0x30] sm:$0xff]  ;;  %v3886_v37 = vld [vmem:[%s6865_s5 + $0x28] sm:$0xff] }
0x118d   :  { %v4964_v52 = vpop.f32.mrf.mxu1  ;;  %4968 = vmatprep.subr.mxu0 %v3888_v43 }
0x118e   :  { %v3745_v31 = vadd.f32 %v3715_v30, %v6683_v17  ;;  %v3730_v32 = vadd.f32 %v4964_v52, %v4276_v57  ;;  %v3762_v42 = vsel %vm187_vm0, %v3746_v47, 0.0  ;;  %4969 = vmatpush3.msra.mxu0 %v3888_v43  ;;  %v3884_v30 = vld [vmem:[%s6865_s5 + $0x18] sm:$0xff]  ;;  %v3883_v52 = vld [vmem:[%s6865_s5 + $0x10] sm:$0xff] }
0x118f   :  { %3763 = vadd.xlane.f32.xlu1 %v3762_v42  ;;  %v3724_v28 = vpop.f32.mrf.mxu1  ;;  %4970 = vmatprep.subr.mxu0 %v3887_v39 }
0x1190   :  { %v3748_v45 = vadd.f32 %v3730_v32, %v6690_v19  ;;  %v3725_v21 = vadd.f32 %v4276_v57, %v3724_v28  ;;  %v3759_v34 = vsel %vm187_vm0, %v3745_v31, 0.0  ;;  %4971 = vmatpush3.msra.mxu0 %v3887_v39  ;;  %v3881_v32 = vld [vmem:[%s6865_s5] sm:$0xff] }
0x1191   :  { %3760 = vadd.xlane.f32.xlu0 %v3759_v34  ;;  %v4967_v29 = vpop.f32.mrf.mxu1  ;;  %4972 = vmatprep.subr.mxu0 %v3886_v37 }
0x1192   :  { %v3747_v9 = vadd.f32 %v3725_v21, %v6693_v26  ;;  %v3740_v49 = vadd.f32 %v4967_v29, %v4276_v57  ;;  %v3768_v33 = vsel %vm187_vm0, %v3748_v45, 0.0  ;;  %4973 = vmatpush3.msra.mxu0 %v3886_v37 }
0x1193   :  { %3769 = vadd.xlane.f32.xlu1 %v3768_v33  ;;  %v3734_v38 = vpop.f32.mrf.mxu1 }
0x1194   :  { %v3750_v17 = vadd.f32 %v3740_v49, %v6700_v46  ;;  %v3735_v3 = vadd.f32 %v4276_v57, %v3734_v38  ;;  %v3765_v35 = vsel %vm187_vm0, %v3747_v9, 0.0 }
0x1195   :  { %3766 = vadd.xlane.f32.xlu0 %v3765_v35 }
0x1196   :  { %v3749_v19 = vadd.f32 %v3735_v3, %v6702_v10  ;;  %v3774_v12 = vsel %vm187_vm0, %v3750_v17, 0.0 }
0x1197   :  { %3775 = vadd.xlane.f32.xlu1 %v3774_v12 }
0x1198   :  { %v3771_v1 = vsel %vm187_vm0, %v3749_v19, 0.0 }
0x1199   :  { %3772 = vadd.xlane.f32.xlu0 %v3771_v1 }
0x1213   :  { %v3758_v26 = vpop.xlane.xlu1 %3757 }
0x1214   :  { %v3778_v48 = vmul.f32 0.015625, %v3758_v26 }
0x1215   :  { %v3755_v11 = vpop.xlane.xlu0 %3754 }
0x1216   :  { %v6747_v22 = vsub.f32 %v3744_v7, %v3778_v48  ;;  %v3777_v20 = vmul.f32 0.015625, %v3755_v11 }
0x1218   :  { %v6749_v25 = vsub.f32 %v3743_v36, %v3777_v20  ;;  %v3764_v46 = vpop.xlane.xlu1 %3763  ;;  %v3794_v13 = vmul.f32 %v6747_v22, %v6747_v22 }
0x1219   :  { %v3780_v61 = vmul.f32 0.015625, %v3764_v46 }
0x121a   :  { %v3761_v10 = vpop.xlane.xlu0 %3760  ;;  %v3804_v41 = vsel %vm187_vm0, %v3794_v13, 0.0  ;;  %v3793_v44 = vmul.f32 %v6749_v25, %v6749_v25 }
0x121b   :  { %v6756_v50 = vsub.f32 %v3746_v47, %v3780_v61  ;;  %v3779_v62 = vmul.f32 0.015625, %v3761_v10  ;;  %3805 = vadd.xlane.f32.xlu1 %v3804_v41  ;;  %v3885_v47 = vld [vmem:[%s6865_s5 + $0x20] sm:$0xff] }
0x121c   :  { %v3770_v54 = vpop.xlane.xlu1 %3769  ;;  %v3801_v0 = vsel %vm187_vm0, %v3793_v44, 0.0  ;;  %4974 = vmatprep.subr.mxu0 %v3885_v47  ;;  %v4285_v44 = vld [vmem:[%s6862_s2 + $0xf] ss:$0 sm:$0xff] }
0x121d   :  { %v6759_v5 = vsub.f32 %v3745_v31, %v3779_v62  ;;  %v3782_v51 = vmul.f32 0.015625, %v3770_v54  ;;  %3802 = vadd.xlane.f32.xlu0 %v3801_v0  ;;  %v3796_v23 = vmul.f32 %v6756_v50, %v6756_v50  ;;  %4975 = vmatpush3.msra.mxu0 %v3885_v47  ;;  %v3882_v31 = vld [vmem:[%s6865_s5 + $0x8] sm:$0xff] }
0x121e   :  { %v3767_v4 = vpop.xlane.xlu0 %3766  ;;  %4976 = vmatprep.subr.mxu0 %v3884_v30 }
0x121f   :  { %v6763_v2 = vsub.f32 %v3748_v45, %v3782_v51  ;;  %v3781_v8 = vmul.f32 0.015625, %v3767_v4  ;;  %v3810_v59 = vsel %vm187_vm0, %v3796_v23, 0.0  ;;  %v3795_v40 = vmul.f32 %v6759_v5, %v6759_v5  ;;  %4977 = vmatpush3.msra.mxu0 %v3884_v30  ;;  %v4286_v4 = vld [vmem:[%s6862_s2 + $0x10] ss:$0 sm:$0xff] }
0x1220   :  { %3811 = vadd.xlane.f32.xlu1 %v3810_v59  ;;  %v3776_v55 = vpop.xlane.xlu1 %3775  ;;  %4978 = vmatprep.subr.mxu0 %v3883_v52 }
0x1221   :  { %v6768_v60 = vsub.f32 %v3747_v9, %v3781_v8  ;;  %v3784_v24 = vmul.f32 0.015625, %v3776_v55  ;;  %v3807_v53 = vsel %vm187_vm0, %v3795_v40, 0.0  ;;  %v3798_v63 = vmul.f32 %v6763_v2, %v6763_v2  ;;  %4979 = vmatpush3.msra.mxu0 %v3883_v52 }
0x1222   :  { %3808 = vadd.xlane.f32.xlu0 %v3807_v53  ;;  %v3773_v18 = vpop.xlane.xlu0 %3772  ;;  %4980 = vmatprep.subr.mxu0 %v3882_v31 }
0x1223   :  { %v6773_v16 = vsub.f32 %v3750_v17, %v3784_v24  ;;  %v3783_v57 = vmul.f32 0.015625, %v3773_v18  ;;  %v3816_v56 = vsel %vm187_vm0, %v3798_v63, 0.0  ;;  %v3797_v58 = vmul.f32 %v6768_v60, %v6768_v60  ;;  %4981 = vmatpush3.msra.mxu0 %v3882_v31 }
0x1224   :  { %3817 = vadd.xlane.f32.xlu1 %v3816_v56  ;;  %4982 = vmatprep.subr.mxu0 %v3881_v32 }
0x1225   :  { %v6778_v14 = vsub.f32 %v3749_v19, %v3783_v57  ;;  %v3813_v7 = vsel %vm187_vm0, %v3797_v58, 0.0  ;;  %v3800_v6 = vmul.f32 %v6773_v16, %v6773_v16  ;;  %4983 = vmatpush3.msra.mxu0 %v3881_v32 }
0x1226   :  { %3814 = vadd.xlane.f32.xlu0 %v3813_v7 }
0x1227   :  { %v3822_v36 = vsel %vm187_vm0, %v3800_v6, 0.0  ;;  %v3799_v27 = vmul.f32 %v6778_v14, %v6778_v14 }
0x1228   :  { %3823 = vadd.xlane.f32.xlu1 %v3822_v36 }
0x1229   :  { %v3819_v15 = vsel %vm187_vm0, %v3799_v27, 0.0 }
0x122a   :  { %3820 = vadd.xlane.f32.xlu0 %v3819_v15 }
0x12a4   :  { %v3806_v42 = vpop.xlane.xlu1 %3805 }
0x12a5   :  { %v3826_v28 = vmul.f32 0.015625, %v3806_v42 }
0x12a6   :  { %v3803_v45 = vpop.xlane.xlu0 %3802 }
0x12a7   :  { %v3834_v21 = vadd.f32 1e-05, %v3826_v28  ;;  %v3825_v34 = vmul.f32 0.015625, %v3803_v45 }
0x12a9   :  { %5199 = vrsqrt.f32 %v3834_v21  ;;  %v3833_v29 = vadd.f32 1e-05, %v3825_v34  ;;  %v3812_v9 = vpop.xlane.xlu1 %3811 }
0x12aa   :  { %v3828_v49 = vmul.f32 0.015625, %v3812_v9 }
0x12ab   :  { %5201 = vrsqrt.f32 %v3833_v29  ;;  %v3809_v33 = vpop.xlane.xlu0 %3808 }
0x12ac   :  { %v3836_v38 = vadd.f32 1e-05, %v3828_v49  ;;  %v3827_v17 = vmul.f32 0.015625, %v3809_v33 }
0x12ad   :  { %v3818_v3 = vpop.xlane.xlu1 %3817 }
0x12ae   :  { %5203 = vrsqrt.f32 %v3836_v38  ;;  %v3835_v35 = vadd.f32 1e-05, %v3827_v17  ;;  %v3830_v19 = vmul.f32 0.015625, %v3818_v3 }
0x12af   :  { %v3815_v12 = vpop.xlane.xlu0 %3814 }
0x12b0   :  { %5205 = vrsqrt.f32 %v3835_v35  ;;  %v3838_v1 = vadd.f32 1e-05, %v3830_v19  ;;  %v3829_v26 = vmul.f32 0.015625, %v3815_v12 }
0x12b1   :  { %v3824_v48 = vpop.xlane.xlu1 %3823 }
0x12b2   :  { %5207 = vrsqrt.f32 %v3838_v1  ;;  %v3837_v11 = vadd.f32 1e-05, %v3829_v26  ;;  %v3832_v20 = vmul.f32 0.015625, %v3824_v48 }
0x12b3   :  { %v3821_v46 = vpop.xlane.xlu0 %3820 }
0x12b4   :  { %5209 = vrsqrt.f32 %v3837_v11  ;;  %v3840_v13 = vadd.f32 1e-05, %v3832_v20  ;;  %v3831_v61 = vmul.f32 0.015625, %v3821_v46 }
0x12b6   :  { %v5200_v10 = vpop.eup %5199  ;;  %5211 = vrsqrt.f32 %v3840_v13  ;;  %v3839_v41 = vadd.f32 1e-05, %v3831_v61 }
0x12b7   :  { %v3850_v62 = vmul.f32 %v5200_v10, %v6747_v22 }
0x12b8   :  { %v5202_v54 = vpop.eup %5201  ;;  %5213 = vrsqrt.f32 %v3839_v41 }
0x12b9   :  { %v3849_v0 = vmul.f32 %v5202_v54, %v6749_v25  ;;  %v3862_v51 = vmul.f32 %v4285_v44, %v3850_v62 }
0x12bb   :  { %v5204_v23 = vpop.eup %5203  ;;  %v3861_v8 = vmul.f32 %v4285_v44, %v3849_v0  ;;  %v3874_v24 = vadd.f32 %v4286_v4, %v3862_v51 }
0x12bc   :  { %v3852_v59 = vmul.f32 %v5204_v23, %v6756_v50 }
0x12bd   :  { %v5206_v40 = vpop.eup %5205  ;;  %v3873_v55 = vadd.f32 %v4286_v4, %v3861_v8 }
0x12be   :  { %v3851_v53 = vmul.f32 %v5206_v40, %v6759_v5  ;;  %v3864_v22 = vmul.f32 %v4285_v44, %v3852_v59 }
0x12bf   :  { %v5208_v63 = vpop.eup %5207  ;;  %4984 = vmatprep.mubr.msk.f32.mxu0 %vm187_vm0, %v3873_v55 }
0x12c0   :  { %4985 = vmatmul.mubr.msk.f32.vlgmr.msra.gmra.mxu0 %vm187_vm0, %v3874_v24  ;;  %v3863_v25 = vmul.f32 %v4285_v44, %v3851_v53  ;;  %v3854_v18 = vmul.f32 %v5208_v63, %v6763_v2  ;;  %v3876_v50 = vadd.f32 %v4286_v4, %v3864_v22 }
0x12c1   :  { %v5210_v57 = vpop.eup %5209 }
0x12c2   :  { %v3875_v56 = vadd.f32 %v4286_v4, %v3863_v25  ;;  %v3853_v58 = vmul.f32 %v5210_v57, %v6768_v60  ;;  %v3866_v6 = vmul.f32 %v4285_v44, %v3854_v18 }
0x12c3   :  { %v5212_v7 = vpop.eup %5211 }
0x12c4   :  { %4987 = vmatprep.mubr.msk.f32.mxu0 %vm187_vm0, %v3875_v56  ;;  %v3865_v36 = vmul.f32 %v4285_v44, %v3853_v58  ;;  %v3856_v5 = vmul.f32 %v5212_v7, %v6773_v16  ;;  %v3878_v39 = vadd.f32 %v4286_v4, %v3866_v6  ;;  %v4287_v16 = vld [vmem:[%s6865_s5 + $0x40] ss:$0 sm:$0xff] }
0x12c5   :  { %v5214_v27 = vpop.eup %5213  ;;  %4988 = vmatmul.mubr.msk.f32.gmra.mxu0 %vm187_vm0, %v3876_v50 }
0x12c6   :  { %v3877_v15 = vadd.f32 %v4286_v4, %v3865_v36  ;;  %v3855_v43 = vmul.f32 %v5214_v27, %v6778_v14  ;;  %v3868_v2 = vmul.f32 %v4285_v44, %v3856_v5 }
0x12c8   :  { %4990 = vmatprep.mubr.msk.f32.mxu0 %vm187_vm0, %v3877_v15  ;;  %v3867_v37 = vmul.f32 %v4285_v44, %v3855_v43  ;;  %v3880_v47 = vadd.f32 %v4286_v4, %v3868_v2 }
0x12c9   :  { %4991 = vmatmul.mubr.msk.f32.gmra.mxu0 %vm187_vm0, %v3878_v39 }
0x12ca   :  { %v3879_v60 = vadd.f32 %v4286_v4, %v3867_v37 }
0x12cc   :  { %4993 = vmatprep.mubr.msk.f32.mxu0 %vm187_vm0, %v3879_v60 }
0x12cd   :  { %4994 = vmatmul.mubr.msk.f32.gmra.mxu0 %vm187_vm0, %v3880_v47 }
0x1380   :  { %v4986_v30 = vpop.f32.mrf.mxu0 }
0x1381   :  { %v3990_v52 = vadd.f32 %v4986_v30, %v4287_v16 }
0x1382   :  { %v3984_v14 = vpop.f32.mrf.mxu0 }
0x1383   :  { %4024 = vst [vmem:[%s6866_s6 + $0x8] sm:$0xff] %v3990_v52  ;;  %v3985_v31 = vadd.f32 %v4287_v16, %v3984_v14 }
0x1385   :  { %4023 = vst [vmem:[%s6866_s6] sm:$0xff] %v3985_v31  ;;  %v4989_v32 = vpop.f32.mrf.mxu0 }
0x1386   :  { %v4000_v42 = vadd.f32 %v4989_v32, %v4287_v16 }
0x1387   :  { %v3994_v28 = vpop.f32.mrf.mxu0 }
0x1388   :  { %4026 = vst [vmem:[%s6866_s6 + $0x18] sm:$0xff] %v4000_v42  ;;  %v3995_v45 = vadd.f32 %v4287_v16, %v3994_v28 }
0x1389   :  { %v4992_v21 = vpop.f32.mrf.mxu0 }
0x138a   :  { %4025 = vst [vmem:[%s6866_s6 + $0x10] sm:$0xff] %v3995_v45  ;;  %v4010_v34 = vadd.f32 %v4992_v21, %v4287_v16 }
0x138b   :  { %v4004_v29 = vpop.f32.mrf.mxu0 }
0x138c   :  { %4028 = vst [vmem:[%s6866_s6 + $0x28] sm:$0xff] %v4010_v34  ;;  %v4005_v9 = vadd.f32 %v4287_v16, %v4004_v29 }
0x138d   :  { %v4995_v49 = vpop.f32.mrf.mxu0 }
0x138e   :  { %4027 = vst [vmem:[%s6866_s6 + $0x20] sm:$0xff] %v4005_v9  ;;  %v4020_v33 = vadd.f32 %v4995_v49, %v4287_v16 }
0x138f   :  { %v4014_v38 = vpop.f32.mrf.mxu0 }
0x1390   :  { %4030 = vst [vmem:[%s6866_s6 + $0x38] sm:$0xff] %v4020_v33  ;;  %v4015_v17 = vadd.f32 %v4287_v16, %v4014_v38 }
0x1392   :  { %4029 = vst [vmem:[%s6866_s6 + $0x30] sm:$0xff] %v4015_v17 }

</bundles_post_ra>
